<compile_context>
chip_gen: v7x
topology: tpu7x:2x2x1
jax: 0.10.0
libtpu: 0.0.40
codegen_flags: <defaults>
</compile_context>

<pallas_src>
import functools

import numpy as np
import jax
import jax.numpy as jnp
from jax import lax
from jax.experimental import pallas as pl
from jax.experimental.pallas import tpu as pltpu


# ----------------------------- Pallas kernel --------------------------------
def _repsr_fused_kernel(x_ref, res_ref, t_ref, b_ref, a_ref, o_ref, act_ref):
    # x_ref   : (N, H, WPC)       input rows, horizontally pre-padded + channel-padded (f32)
    # res_ref : (N, H, WPC)       pixel-unshuffled bilinear residual, same layout (f32)
    # t_ref   : (L, 3, WPC, WPC)  block-Toeplitz conv weights, bf16 (per layer, per dy)
    # b_ref   : (L, 1, WPC)       bias rows, f32 (zero on the horizontal-padding blocks)
    # a_ref   : (L, 1, WPC)       PReLU negative slopes, f32
    # o_ref   : (N, H, WPC)       last conv output + residual (padded layout, f32)
    # act_ref : (R, WPC)          VMEM-resident activation slab; all N images stacked
    #                             vertically with `sep` zero rows before/between/after.
    N, H, WPC = x_ref.shape
    L = t_ref.shape[0]
    R = act_ref.shape[0]
    sep = (R - N * H) // (N + 1)          # static (= 8): zero-separator height

    # Zero only the border / separator row segments; interiors are overwritten below.
    act_ref[0:sep, :] = jnp.zeros((sep, WPC), jnp.float32)
    for n in range(N):                    # static unroll over batch
        s0 = sep + n * (H + sep)
        act_ref[s0 + H:s0 + H + sep, :] = jnp.zeros((sep, WPC), jnp.float32)
        act_ref[s0:s0 + H, :] = x_ref[n]

    for l in range(L):                    # static unroll over conv layers
        # conv3x3 = 3 lane-dense bf16 matmuls against block-Toeplitz weights (dy=0,1,2).
        # acc[i] is the conv output for slab row i+1 (uses slab rows i, i+1, i+2).
        act_b = act_ref[...].astype(jnp.bfloat16)
        acc = jnp.dot(act_b[0:R - 2, :], t_ref[l, 0],
                      preferred_element_type=jnp.float32)
        acc = acc + jnp.dot(act_b[1:R - 1, :], t_ref[l, 1],
                            preferred_element_type=jnp.float32)
        acc = acc + jnp.dot(act_b[2:R, :], t_ref[l, 2],
                            preferred_element_type=jnp.float32)
        acc = acc + b_ref[l]              # (1, WPC) broadcast; exactly 0 on pad blocks
        if l < L - 1:
            acc = jnp.where(acc > 0, acc, a_ref[l] * acc)     # PReLU (f32)
            for n in range(N):            # write back interiors only -> separators stay 0
                s0 = sep + n * (H + sep)
                act_ref[s0:s0 + H, :] = acc[s0 - 1:s0 - 1 + H, :]
        else:
            # fused residual add (pixel-unshuffled bilinear upsample), f32
            for n in range(N):
                s0 = sep + n * (H + sep)
                o_ref[n, :, :] = acc[s0 - 1:s0 - 1 + H, :] + res_ref[n]


# ------------------------------ weight packing --------------------------------
def prepare_params(params, W):
    """Pack torch-layout (OIHW weight, bias, PReLU slope) into the kernel layout.

    Done ONCE outside jit.  For each layer l and kernel row dy we build a
    block-Toeplitz matrix T[l, dy] of shape ((W+2)*Cmax, (W+2)*Cmax) such that
      acc[h, q*Cmax + co] += sum_p sum_ci x_pad[h+dy, p, ci] * T[l,dy, p*Cmax+ci, q*Cmax+co]
    equals the dy-row contribution of the 3x3 cross-correlation for pixel w = q-1
    (column blocks q=0 and q=W+1 stay exactly zero -> they ARE the next layer's
    horizontal padding; the bf16 cast preserves those zeros).
    Weights are returned in bf16 (MXU operands); bias / slopes stay f32.
    """
    L = len(params)
    Cmax = int(max(max(w.shape[0], w.shape[1]) for (w, _, _) in params))
    WPC = (W + 2) * Cmax
    T = np.zeros((L, 3, WPC, WPC), np.float32)
    B = np.zeros((L, 1, WPC), np.float32)
    A = np.ones((L, 1, WPC), np.float32)
    for l, (w, b, a) in enumerate(params):
        w = np.asarray(w); b = np.asarray(b); a = np.asarray(a)
        cout, cin = w.shape[0], w.shape[1]
        k_hwio = np.transpose(w, (2, 3, 1, 0))            # (3, 3, cin, cout)
        for q in range(1, W + 1):                         # output pixel block
            B[l, 0, q * Cmax:q * Cmax + cout] = b
            A[l, 0, q * Cmax:q * Cmax + cout] = a
            for dy in range(3):
                for dx in range(3):
                    p = (q - 1) + dx                      # input pixel block
                    T[l, dy,
                      p * Cmax:p * Cmax + cin,
                      q * Cmax:q * Cmax + cout] = k_hwio[dy, dx]
    return (jnp.asarray(T, dtype=jnp.bfloat16),
            jnp.asarray(B),
            jnp.asarray(A))


# ------------------------------- glue (JAX) ----------------------------------
def _bilinear_matrix(in_size, out_size, scale):
    # Matches torch F.interpolate(mode='bilinear', align_corners=False).
    dst = jnp.arange(out_size, dtype=jnp.float32)
    src = (dst + 0.5) / float(scale) - 0.5
    src = jnp.maximum(src, 0.0)
    x0 = jnp.floor(src)
    lam = src - x0
    x0i = x0.astype(jnp.int32)
    x1i = jnp.minimum(x0i + 1, in_size - 1)
    rows = jnp.arange(out_size)
    m = jnp.zeros((out_size, in_size), jnp.float32)
    m = m.at[rows, x0i].add(1.0 - lam)
    m = m.at[rows, x1i].add(lam)
    return m


def bilinear_upsample_nhwc(x, scale):
    # Separable exact bilinear resize (glue, not the hot path).
    N, H, W, C = x.shape
    my = _bilinear_matrix(H, H * scale, scale)
    mx = _bilinear_matrix(W, W * scale, scale)
    y = jnp.einsum('Oh,nhwc->nOwc', my, x)
    y = jnp.einsum('Pw,nOwc->nOPc', mx, y)
    return y


def pixel_shuffle_nhwc(x, r):
    # out[n, h*r+i, w*r+j, c] = x[n, h, w, c*r*r + i*r + j]   (torch ordering)
    N, H, W, Crr = x.shape
    C = Crr // (r * r)
    x = x.reshape(N, H, W, C, r, r)
    x = jnp.transpose(x, (0, 1, 4, 2, 5, 3))
    return x.reshape(N, H * r, W * r, C)


def pixel_unshuffle_nhwc(x, r):
    # inverse of pixel_shuffle_nhwc: out[n,h,w, c*r*r + i*r + j] = x[n, h*r+i, w*r+j, c]
    N, Hr, Wr, C = x.shape
    H, W = Hr // r, Wr // r
    x = x.reshape(N, H, r, W, r, C)
    x = jnp.transpose(x, (0, 1, 3, 5, 2, 4))
    return x.reshape(N, H, W, C * r * r)


def init_params(key, m, c, scale, colors):
    """Deterministic synthetic weights (shapes match the nn.Module __init__)."""
    params = []
    chans = [colors] + [c] * (m + 1) + [colors * scale * scale]
    for i in range(len(chans) - 1):
        cin, cout = chans[i], chans[i + 1]
        key, kw, kb = jax.random.split(key, 3)
        w = jax.random.normal(kw, (cout, cin, 3, 3), jnp.float32) * 0.1   # torch OIHW
        b = jax.random.normal(kb, (cout,), jnp.float32) * 0.05
        is_last = (i == len(chans) - 2)
        a = jnp.ones((cout,), jnp.float32) if is_last else jnp.full((cout,), 0.25, jnp.float32)
        params.append((w, b, a))
    return params


def repsr_plain_forward(x_nchw, packed, *, scale, colors):
    # NCHW in (like PyTorch), NCHW out.
    t_pack, b_pack, a_pack = packed
    N, _, H, W = x_nchw.shape
    L = t_pack.shape[0]
    WPC = t_pack.shape[-1]
    Cmax = WPC // (W + 2)
    r2c = colors * scale * scale
    SEP = 8                                   # sublane-aligned zero separator height
    R = SEP + N * (H + SEP)                   # total scratch rows (all images stacked)

    x = jnp.transpose(x_nchw, (0, 2, 3, 1)).astype(jnp.float32)          # NHWC
    resize = bilinear_upsample_nhwc(x, scale)                            # (N, H*s, W*s, colors)
    res_u = pixel_unshuffle_nhwc(resize, scale)                          # (N, H, W, r2c)

    def to_rows(a):
        # (N, H, W, c) -> (N, H, (W+2)*Cmax): pad W by 1 each side, pad channels to Cmax.
        c = a.shape[-1]
        a = jnp.pad(a, ((0, 0), (0, 0), (1, 1), (0, Cmax - c)))
        return a.reshape(N, H, WPC)

    x_rows = to_rows(x)
    res_rows = to_rows(res_u)

    out_rows = pl.pallas_call(
        _repsr_fused_kernel,
        out_shape=jax.ShapeDtypeStruct((N, H, WPC), jnp.float32),
        grid_spec=pltpu.PrefetchScalarGridSpec(
            num_scalar_prefetch=0,
            grid=(1,),                                                    # batch folded into M
            in_specs=[
                pl.BlockSpec((N, H, WPC), lambda i: (0, 0, 0)),           # x rows
                pl.BlockSpec((N, H, WPC), lambda i: (0, 0, 0)),           # residual rows
                pl.BlockSpec((L, 3, WPC, WPC), lambda i: (0, 0, 0, 0)),   # Toeplitz weights (bf16)
                pl.BlockSpec((L, 1, WPC), lambda i: (0, 0, 0)),           # bias
                pl.BlockSpec((L, 1, WPC), lambda i: (0, 0, 0)),           # PReLU slopes
            ],
            out_specs=pl.BlockSpec((N, H, WPC), lambda i: (0, 0, 0)),
            scratch_shapes=[pltpu.VMEM((R, WPC), jnp.float32)],
        ),
        compiler_params=pltpu.CompilerParams(
            dimension_semantics=("arbitrary",),
            vmem_limit_bytes=16 * 1024 * 1024),
    )(x_rows, res_rows, t_pack, b_pack, a_pack)

    # Drop the horizontal padding blocks / channel padding, then pixel-shuffle.
    out = out_rows.reshape(N, H, W + 2, Cmax)[:, :, 1:W + 1, :r2c]
    # TODO(synk): pixel-shuffle index remap kept as XLA glue (tiny tensor); the
    # residual add is already fused into the kernel so this is layout-only work.
    y = pixel_shuffle_nhwc(out, scale)
    return jnp.transpose(y, (0, 3, 1, 2))                                # -> NCHW


# --------------------------- pure-JAX reference -------------------------------
def _ref_forward(x_nchw, params, scale):
    x = jnp.transpose(x_nchw, (0, 2, 3, 1)).astype(jnp.float32)
    resize = bilinear_upsample_nhwc(x, scale)
    h = x
    n_layers = len(params)
    for i, (w, b, a) in enumerate(params):
        w_hwio = jnp.transpose(w, (2, 3, 1, 0))
        h = lax.conv_general_dilated(
            h, w_hwio, window_strides=(1, 1), padding='SAME',
            dimension_numbers=('NHWC', 'HWIO', 'NHWC'))
        h = h + b.reshape(1, 1, 1, -1)
        if i < n_layers - 1:
            al = a.reshape(1, 1, 1, -1)
            h = jnp.where(h > 0, h, al * h)
    h = pixel_shuffle_nhwc(h, scale)
    return jnp.transpose(h + resize, (0, 3, 1, 2))


# ----------------------------------- main -------------------------------------
if __name__ == "__main__":
    m, c, scale, colors = 2, 16, 2, 3
    N, H, W = 2, 16, 16

    key = jax.random.PRNGKey(0)
    kx, kp = jax.random.split(key)
    x = jax.random.normal(kx, (N, colors, H, W), jnp.float32)
    params = init_params(kp, m, c, scale, colors)

    packed = prepare_params(params, W)        # weight packing once, outside jit

    fwd = jax.jit(functools.partial(repsr_plain_forward, scale=scale, colors=colors))
    y = jax.block_until_ready(fwd(x, packed))

    y_ref = jax.block_until_ready(_ref_forward(x, params, scale))
    assert y.shape == (N, colors, H * scale, W * scale), y.shape
    # bf16 MXU operands vs. f32 reference -> relaxed tolerance (per perf review).
    max_err = float(jnp.max(jnp.abs(y - y_ref)))
    assert jnp.allclose(y, y_ref, atol=5e-2, rtol=5e-2), max_err

    print("KERNEL_OK")
</pallas_src>

<mosaic_0001>
module attributes {stable_mosaic.version = 11 : i64} {
  func.func private @main(%arg0: i32) attributes {dimension_semantics = [#tpu.dimension_semantics<core_parallel>], iteration_bounds = array<i64: 2>, tpu.core_type = #tpu.core_type<sc_scalar_subcore>, window_params = []} {
    return
  }
}

module attributes {stable_mosaic.version = 11 : i64} {
  func.func private @main(%arg0: i32) attributes {dimension_semantics = [#tpu.dimension_semantics<core_parallel>], iteration_bounds = array<i64: 2>, tpu.core_type = #tpu.core_type<sc_scalar_subcore>, window_params = []} {
    return
  }
}

module attributes {stable_mosaic.version = 11 : i64} {
  func.func @_repsr_fused_kernel(%arg0: i32, %arg1: memref<2x16x288xf32, #tpu.memory_space<vmem>>, %arg2: memref<2x16x288xf32, #tpu.memory_space<vmem>>, %arg3: memref<4x3x288x288xbf16, #tpu.memory_space<vmem>>, %arg4: memref<4x1x288xf32, #tpu.memory_space<vmem>>, %arg5: memref<4x1x288xf32, #tpu.memory_space<vmem>>, %arg6: memref<2x16x288xf32, #tpu.memory_space<vmem>>, %arg7: memref<56x288xf32, #tpu.memory_space<vmem>>) attributes {dimension_semantics = [#tpu.dimension_semantics<arbitrary>], iteration_bounds = array<i64: 1>, scalar_prefetch = 0 : i64, scratch_operands = 1 : i64, tpu.core_type = #tpu.core_type<tc>, window_params = [{pipeline_mode = #tpu.pipeline_mode<synchronous>, transform_indices = @transform_0, window_bounds = array<i64: 2, 16, 288>}, {pipeline_mode = #tpu.pipeline_mode<synchronous>, transform_indices = @transform_1, window_bounds = array<i64: 2, 16, 288>}, {pipeline_mode = #tpu.pipeline_mode<synchronous>, transform_indices = @transform_2, window_bounds = array<i64: 4, 3, 288, 288>}, {pipeline_mode = #tpu.pipeline_mode<synchronous>, transform_indices = @transform_3, window_bounds = array<i64: 4, 1, 288>}, {pipeline_mode = #tpu.pipeline_mode<synchronous>, transform_indices = @transform_4, window_bounds = array<i64: 4, 1, 288>}, {pipeline_mode = #tpu.pipeline_mode<synchronous>, transform_indices = @transform_5, window_bounds = array<i64: 2, 16, 288>}]} {
    %cst = arith.constant 0.000000e+00 : f32
    %0 = vector.broadcast %cst : f32 to vector<8x288xf32>
    %c0 = arith.constant 0 : index
    %c0_0 = arith.constant 0 : index
    %1 = vector.load %arg7[%c0, %c0_0] : memref<56x288xf32, #tpu.memory_space<vmem>>, vector<8x288xf32>
    tpu.vector_store %arg7[%c0, %c0_0], %0 {strides = array<i32>} : memref<56x288xf32, #tpu.memory_space<vmem>>, vector<8x288xf32>,
    %cst_1 = arith.constant 0.000000e+00 : f32
    %2 = vector.broadcast %cst_1 : f32 to vector<8x288xf32>
    %c24 = arith.constant 24 : index
    %c0_2 = arith.constant 0 : index
    %3 = vector.load %arg7[%c24, %c0_2] : memref<56x288xf32, #tpu.memory_space<vmem>>, vector<8x288xf32>
    tpu.vector_store %arg7[%c24, %c0_2], %2 {strides = array<i32>} : memref<56x288xf32, #tpu.memory_space<vmem>>, vector<8x288xf32>,
    %c0_3 = arith.constant 0 : index
    %c0_4 = arith.constant 0 : index
    %c0_5 = arith.constant 0 : index
    %4 = vector.load %arg1[%c0_3, %c0_4, %c0_5] : memref<2x16x288xf32, #tpu.memory_space<vmem>>, vector<1x16x288xf32>
    %5 = vector.shape_cast %4 : vector<1x16x288xf32> to vector<16x288xf32>
    %c8 = arith.constant 8 : index
    %c0_6 = arith.constant 0 : index
    %6 = vector.load %arg7[%c8, %c0_6] : memref<56x288xf32, #tpu.memory_space<vmem>>, vector<16x288xf32>
    tpu.vector_store %arg7[%c8, %c0_6], %5 {strides = array<i32>} : memref<56x288xf32, #tpu.memory_space<vmem>>, vector<16x288xf32>,
    %cst_7 = arith.constant 0.000000e+00 : f32
    %7 = vector.broadcast %cst_7 : f32 to vector<8x288xf32>
    %c48 = arith.constant 48 : index
    %c0_8 = arith.constant 0 : index
    %8 = vector.load %arg7[%c48, %c0_8] : memref<56x288xf32, #tpu.memory_space<vmem>>, vector<8x288xf32>
    tpu.vector_store %arg7[%c48, %c0_8], %7 {strides = array<i32>} : memref<56x288xf32, #tpu.memory_space<vmem>>, vector<8x288xf32>,
    %c1 = arith.constant 1 : index
    %c0_9 = arith.constant 0 : index
    %c0_10 = arith.constant 0 : index
    %9 = vector.load %arg1[%c1, %c0_9, %c0_10] : memref<2x16x288xf32, #tpu.memory_space<vmem>>, vector<1x16x288xf32>
    %10 = vector.shape_cast %9 : vector<1x16x288xf32> to vector<16x288xf32>
    %c32 = arith.constant 32 : index
    %c0_11 = arith.constant 0 : index
    %11 = vector.load %arg7[%c32, %c0_11] : memref<56x288xf32, #tpu.memory_space<vmem>>, vector<16x288xf32>
    tpu.vector_store %arg7[%c32, %c0_11], %10 {strides = array<i32>} : memref<56x288xf32, #tpu.memory_space<vmem>>, vector<16x288xf32>,
    %c0_12 = arith.constant 0 : index
    %c0_13 = arith.constant 0 : index
    %12 = vector.load %arg7[%c0_12, %c0_13] : memref<56x288xf32, #tpu.memory_space<vmem>>, vector<56x288xf32>
    %13 = arith.truncf %12 : vector<56x288xf32> to vector<56x288xbf16>
    %14 = vector.extract_strided_slice %13 {offsets = [0, 0], sizes = [54, 288], strides = [1, 1]} : vector<56x288xbf16> to vector<54x288xbf16>
    %c0_14 = arith.constant 0 : index
    %c0_15 = arith.constant 0 : index
    %c0_16 = arith.constant 0 : index
    %c0_17 = arith.constant 0 : index
    %15 = vector.load %arg3[%c0_14, %c0_15, %c0_16, %c0_17] : memref<4x3x288x288xbf16, #tpu.memory_space<vmem>>, vector<1x1x288x288xbf16>
    %16 = vector.shape_cast %15 : vector<1x1x288x288xbf16> to vector<288x288xbf16>
    %cst_18 = arith.constant dense<0.000000e+00> : vector<54x288xf32>
    %17 = tpu.matmul %14, %16, %cst_18 {dimension_numbers = #tpu.dot_dimension_numbers<[1], [0], [0], [1], [0, 0, 1, 1], [], []>} : vector<54x288xbf16>, vector<288x288xbf16>, vector<54x288xf32> -> vector<54x288xf32>
    %18 = vector.extract_strided_slice %13 {offsets = [1, 0], sizes = [54, 288], strides = [1, 1]} : vector<56x288xbf16> to vector<54x288xbf16>
    %c0_19 = arith.constant 0 : index
    %c1_20 = arith.constant 1 : index
    %c0_21 = arith.constant 0 : index
    %c0_22 = arith.constant 0 : index
    %19 = vector.load %arg3[%c0_19, %c1_20, %c0_21, %c0_22] : memref<4x3x288x288xbf16, #tpu.memory_space<vmem>>, vector<1x1x288x288xbf16>
    %20 = vector.shape_cast %19 : vector<1x1x288x288xbf16> to vector<288x288xbf16>
    %cst_23 = arith.constant dense<0.000000e+00> : vector<54x288xf32>
    %21 = tpu.matmul %18, %20, %cst_23 {dimension_numbers = #tpu.dot_dimension_numbers<[1], [0], [0], [1], [0, 0, 1, 1], [], []>} : vector<54x288xbf16>, vector<288x288xbf16>, vector<54x288xf32> -> vector<54x288xf32>
    %22 = arith.addf %17, %21 : vector<54x288xf32>
    %23 = vector.extract_strided_slice %13 {offsets = [2, 0], sizes = [54, 288], strides = [1, 1]} : vector<56x288xbf16> to vector<54x288xbf16>
    %c0_24 = arith.constant 0 : index
    %c2 = arith.constant 2 : index
    %c0_25 = arith.constant 0 : index
    %c0_26 = arith.constant 0 : index
    %24 = vector.load %arg3[%c0_24, %c2, %c0_25, %c0_26] : memref<4x3x288x288xbf16, #tpu.memory_space<vmem>>, vector<1x1x288x288xbf16>
    %25 = vector.shape_cast %24 : vector<1x1x288x288xbf16> to vector<288x288xbf16>
    %cst_27 = arith.constant dense<0.000000e+00> : vector<54x288xf32>
    %26 = tpu.matmul %23, %25, %cst_27 {dimension_numbers = #tpu.dot_dimension_numbers<[1], [0], [0], [1], [0, 0, 1, 1], [], []>} : vector<54x288xbf16>, vector<288x288xbf16>, vector<54x288xf32> -> vector<54x288xf32>
    %27 = arith.addf %22, %26 : vector<54x288xf32>
    %c0_28 = arith.constant 0 : index
    %c0_29 = arith.constant 0 : index
    %c0_30 = arith.constant 0 : index
    %28 = vector.load %arg4[%c0_28, %c0_29, %c0_30] : memref<4x1x288xf32, #tpu.memory_space<vmem>>, vector<1x1x288xf32>
    %29 = vector.shape_cast %28 : vector<1x1x288xf32> to vector<1x288xf32>
    %30 = vector.broadcast %29 : vector<1x288xf32> to vector<54x288xf32>
    %31 = arith.addf %27, %30 : vector<54x288xf32>
    %cst_31 = arith.constant 0.000000e+00 : f32
    %32 = vector.broadcast %cst_31 : f32 to vector<54x288xf32>
    %33 = arith.cmpf ogt, %31, %32 : vector<54x288xf32>
    %c0_32 = arith.constant 0 : index
    %c0_33 = arith.constant 0 : index
    %c0_34 = arith.constant 0 : index
    %34 = vector.load %arg5[%c0_32, %c0_33, %c0_34] : memref<4x1x288xf32, #tpu.memory_space<vmem>>, vector<1x1x288xf32>
    %35 = vector.shape_cast %34 : vector<1x1x288xf32> to vector<1x288xf32>
    %36 = vector.broadcast %35 : vector<1x288xf32> to vector<54x288xf32>
    %37 = arith.mulf %36, %31 : vector<54x288xf32>
    %38 = arith.select %33, %31, %37 : vector<54x288xi1>, vector<54x288xf32>
    %39 = vector.extract_strided_slice %38 {offsets = [7, 0], sizes = [16, 288], strides = [1, 1]} : vector<54x288xf32> to vector<16x288xf32>
    %c8_35 = arith.constant 8 : index
    %c0_36 = arith.constant 0 : index
    %40 = vector.load %arg7[%c8_35, %c0_36] : memref<56x288xf32, #tpu.memory_space<vmem>>, vector<16x288xf32>
    tpu.vector_store %arg7[%c8_35, %c0_36], %39 {strides = array<i32>} : memref<56x288xf32, #tpu.memory_space<vmem>>, vector<16x288xf32>,
    %41 = vector.extract_strided_slice %38 {offsets = [31, 0], sizes = [16, 288], strides = [1, 1]} : vector<54x288xf32> to vector<16x288xf32>
    %c32_37 = arith.constant 32 : index
    %c0_38 = arith.constant 0 : index
    %42 = vector.load %arg7[%c32_37, %c0_38] : memref<56x288xf32, #tpu.memory_space<vmem>>, vector<16x288xf32>
    tpu.vector_store %arg7[%c32_37, %c0_38], %41 {strides = array<i32>} : memref<56x288xf32, #tpu.memory_space<vmem>>, vector<16x288xf32>,
    %c0_39 = arith.constant 0 : index
    %c0_40 = arith.constant 0 : index
    %43 = vector.load %arg7[%c0_39, %c0_40] : memref<56x288xf32, #tpu.memory_space<vmem>>, vector<56x288xf32>
    %44 = arith.truncf %43 : vector<56x288xf32> to vector<56x288xbf16>
    %45 = vector.extract_strided_slice %44 {offsets = [0, 0], sizes = [54, 288], strides = [1, 1]} : vector<56x288xbf16> to vector<54x288xbf16>
    %c1_41 = arith.constant 1 : index
    %c0_42 = arith.constant 0 : index
    %c0_43 = arith.constant 0 : index
    %c0_44 = arith.constant 0 : index
    %46 = vector.load %arg3[%c1_41, %c0_42, %c0_43, %c0_44] : memref<4x3x288x288xbf16, #tpu.memory_space<vmem>>, vector<1x1x288x288xbf16>
    %47 = vector.shape_cast %46 : vector<1x1x288x288xbf16> to vector<288x288xbf16>
    %cst_45 = arith.constant dense<0.000000e+00> : vector<54x288xf32>
    %48 = tpu.matmul %45, %47, %cst_45 {dimension_numbers = #tpu.dot_dimension_numbers<[1], [0], [0], [1], [0, 0, 1, 1], [], []>} : vector<54x288xbf16>, vector<288x288xbf16>, vector<54x288xf32> -> vector<54x288xf32>
    %49 = vector.extract_strided_slice %44 {offsets = [1, 0], sizes = [54, 288], strides = [1, 1]} : vector<56x288xbf16> to vector<54x288xbf16>
    %c1_46 = arith.constant 1 : index
    %c1_47 = arith.constant 1 : index
    %c0_48 = arith.constant 0 : index
    %c0_49 = arith.constant 0 : index
    %50 = vector.load %arg3[%c1_46, %c1_47, %c0_48, %c0_49] : memref<4x3x288x288xbf16, #tpu.memory_space<vmem>>, vector<1x1x288x288xbf16>
    %51 = vector.shape_cast %50 : vector<1x1x288x288xbf16> to vector<288x288xbf16>
    %cst_50 = arith.constant dense<0.000000e+00> : vector<54x288xf32>
    %52 = tpu.matmul %49, %51, %cst_50 {dimension_numbers = #tpu.dot_dimension_numbers<[1], [0], [0], [1], [0, 0, 1, 1], [], []>} : vector<54x288xbf16>, vector<288x288xbf16>, vector<54x288xf32> -> vector<54x288xf32>
    %53 = arith.addf %48, %52 : vector<54x288xf32>
    %54 = vector.extract_strided_slice %44 {offsets = [2, 0], sizes = [54, 288], strides = [1, 1]} : vector<56x288xbf16> to vector<54x288xbf16>
    %c1_51 = arith.constant 1 : index
    %c2_52 = arith.constant 2 : index
    %c0_53 = arith.constant 0 : index
    %c0_54 = arith.constant 0 : index
    %55 = vector.load %arg3[%c1_51, %c2_52, %c0_53, %c0_54] : memref<4x3x288x288xbf16, #tpu.memory_space<vmem>>, vector<1x1x288x288xbf16>
    %56 = vector.shape_cast %55 : vector<1x1x288x288xbf16> to vector<288x288xbf16>
    %cst_55 = arith.constant dense<0.000000e+00> : vector<54x288xf32>
    %57 = tpu.matmul %54, %56, %cst_55 {dimension_numbers = #tpu.dot_dimension_numbers<[1], [0], [0], [1], [0, 0, 1, 1], [], []>} : vector<54x288xbf16>, vector<288x288xbf16>, vector<54x288xf32> -> vector<54x288xf32>
    %58 = arith.addf %53, %57 : vector<54x288xf32>
    %c1_56 = arith.constant 1 : index
    %c0_57 = arith.constant 0 : index
    %c0_58 = arith.constant 0 : index
    %59 = vector.load %arg4[%c1_56, %c0_57, %c0_58] : memref<4x1x288xf32, #tpu.memory_space<vmem>>, vector<1x1x288xf32>
    %60 = vector.shape_cast %59 : vector<1x1x288xf32> to vector<1x288xf32>
    %61 = vector.broadcast %60 : vector<1x288xf32> to vector<54x288xf32>
    %62 = arith.addf %58, %61 : vector<54x288xf32>
    %cst_59 = arith.constant 0.000000e+00 : f32
    %63 = vector.broadcast %cst_59 : f32 to vector<54x288xf32>
    %64 = arith.cmpf ogt, %62, %63 : vector<54x288xf32>
    %c1_60 = arith.constant 1 : index
    %c0_61 = arith.constant 0 : index
    %c0_62 = arith.constant 0 : index
    %65 = vector.load %arg5[%c1_60, %c0_61, %c0_62] : memref<4x1x288xf32, #tpu.memory_space<vmem>>, vector<1x1x288xf32>
    %66 = vector.shape_cast %65 : vector<1x1x288xf32> to vector<1x288xf32>
    %67 = vector.broadcast %66 : vector<1x288xf32> to vector<54x288xf32>
    %68 = arith.mulf %67, %62 : vector<54x288xf32>
    %69 = arith.select %64, %62, %68 : vector<54x288xi1>, vector<54x288xf32>
    %70 = vector.extract_strided_slice %69 {offsets = [7, 0], sizes = [16, 288], strides = [1, 1]} : vector<54x288xf32> to vector<16x288xf32>
    %c8_63 = arith.constant 8 : index
    %c0_64 = arith.constant 0 : index
    %71 = vector.load %arg7[%c8_63, %c0_64] : memref<56x288xf32, #tpu.memory_space<vmem>>, vector<16x288xf32>
    tpu.vector_store %arg7[%c8_63, %c0_64], %70 {strides = array<i32>} : memref<56x288xf32, #tpu.memory_space<vmem>>, vector<16x288xf32>,
    %72 = vector.extract_strided_slice %69 {offsets = [31, 0], sizes = [16, 288], strides = [1, 1]} : vector<54x288xf32> to vector<16x288xf32>
    %c32_65 = arith.constant 32 : index
    %c0_66 = arith.constant 0 : index
    %73 = vector.load %arg7[%c32_65, %c0_66] : memref<56x288xf32, #tpu.memory_space<vmem>>, vector<16x288xf32>
    tpu.vector_store %arg7[%c32_65, %c0_66], %72 {strides = array<i32>} : memref<56x288xf32, #tpu.memory_space<vmem>>, vector<16x288xf32>,
    %c0_67 = arith.constant 0 : index
    %c0_68 = arith.constant 0 : index
    %74 = vector.load %arg7[%c0_67, %c0_68] : memref<56x288xf32, #tpu.memory_space<vmem>>, vector<56x288xf32>
    %75 = arith.truncf %74 : vector<56x288xf32> to vector<56x288xbf16>
    %76 = vector.extract_strided_slice %75 {offsets = [0, 0], sizes = [54, 288], strides = [1, 1]} : vector<56x288xbf16> to vector<54x288xbf16>
    %c2_69 = arith.constant 2 : index
    %c0_70 = arith.constant 0 : index
    %c0_71 = arith.constant 0 : index
    %c0_72 = arith.constant 0 : index
    %77 = vector.load %arg3[%c2_69, %c0_70, %c0_71, %c0_72] : memref<4x3x288x288xbf16, #tpu.memory_space<vmem>>, vector<1x1x288x288xbf16>
    %78 = vector.shape_cast %77 : vector<1x1x288x288xbf16> to vector<288x288xbf16>
    %cst_73 = arith.constant dense<0.000000e+00> : vector<54x288xf32>
    %79 = tpu.matmul %76, %78, %cst_73 {dimension_numbers = #tpu.dot_dimension_numbers<[1], [0], [0], [1], [0, 0, 1, 1], [], []>} : vector<54x288xbf16>, vector<288x288xbf16>, vector<54x288xf32> -> vector<54x288xf32>
    %80 = vector.extract_strided_slice %75 {offsets = [1, 0], sizes = [54, 288], strides = [1, 1]} : vector<56x288xbf16> to vector<54x288xbf16>
    %c2_74 = arith.constant 2 : index
    %c1_75 = arith.constant 1 : index
    %c0_76 = arith.constant 0 : index
    %c0_77 = arith.constant 0 : index
    %81 = vector.load %arg3[%c2_74, %c1_75, %c0_76, %c0_77] : memref<4x3x288x288xbf16, #tpu.memory_space<vmem>>, vector<1x1x288x288xbf16>
    %82 = vector.shape_cast %81 : vector<1x1x288x288xbf16> to vector<288x288xbf16>
    %cst_78 = arith.constant dense<0.000000e+00> : vector<54x288xf32>
    %83 = tpu.matmul %80, %82, %cst_78 {dimension_numbers = #tpu.dot_dimension_numbers<[1], [0], [0], [1], [0, 0, 1, 1], [], []>} : vector<54x288xbf16>, vector<288x288xbf16>, vector<54x288xf32> -> vector<54x288xf32>
    %84 = arith.addf %79, %83 : vector<54x288xf32>
    %85 = vector.extract_strided_slice %75 {offsets = [2, 0], sizes = [54, 288], strides = [1, 1]} : vector<56x288xbf16> to vector<54x288xbf16>
    %c2_79 = arith.constant 2 : index
    %c2_80 = arith.constant 2 : index
    %c0_81 = arith.constant 0 : index
    %c0_82 = arith.constant 0 : index
    %86 = vector.load %arg3[%c2_79, %c2_80, %c0_81, %c0_82] : memref<4x3x288x288xbf16, #tpu.memory_space<vmem>>, vector<1x1x288x288xbf16>
    %87 = vector.shape_cast %86 : vector<1x1x288x288xbf16> to vector<288x288xbf16>
    %cst_83 = arith.constant dense<0.000000e+00> : vector<54x288xf32>
    %88 = tpu.matmul %85, %87, %cst_83 {dimension_numbers = #tpu.dot_dimension_numbers<[1], [0], [0], [1], [0, 0, 1, 1], [], []>} : vector<54x288xbf16>, vector<288x288xbf16>, vector<54x288xf32> -> vector<54x288xf32>
    %89 = arith.addf %84, %88 : vector<54x288xf32>
    %c2_84 = arith.constant 2 : index
    %c0_85 = arith.constant 0 : index
    %c0_86 = arith.constant 0 : index
    %90 = vector.load %arg4[%c2_84, %c0_85, %c0_86] : memref<4x1x288xf32, #tpu.memory_space<vmem>>, vector<1x1x288xf32>
    %91 = vector.shape_cast %90 : vector<1x1x288xf32> to vector<1x288xf32>
    %92 = vector.broadcast %91 : vector<1x288xf32> to vector<54x288xf32>
    %93 = arith.addf %89, %92 : vector<54x288xf32>
    %cst_87 = arith.constant 0.000000e+00 : f32
    %94 = vector.broadcast %cst_87 : f32 to vector<54x288xf32>
    %95 = arith.cmpf ogt, %93, %94 : vector<54x288xf32>
    %c2_88 = arith.constant 2 : index
    %c0_89 = arith.constant 0 : index
    %c0_90 = arith.constant 0 : index
    %96 = vector.load %arg5[%c2_88, %c0_89, %c0_90] : memref<4x1x288xf32, #tpu.memory_space<vmem>>, vector<1x1x288xf32>
    %97 = vector.shape_cast %96 : vector<1x1x288xf32> to vector<1x288xf32>
    %98 = vector.broadcast %97 : vector<1x288xf32> to vector<54x288xf32>
    %99 = arith.mulf %98, %93 : vector<54x288xf32>
    %100 = arith.select %95, %93, %99 : vector<54x288xi1>, vector<54x288xf32>
    %101 = vector.extract_strided_slice %100 {offsets = [7, 0], sizes = [16, 288], strides = [1, 1]} : vector<54x288xf32> to vector<16x288xf32>
    %c8_91 = arith.constant 8 : index
    %c0_92 = arith.constant 0 : index
    %102 = vector.load %arg7[%c8_91, %c0_92] : memref<56x288xf32, #tpu.memory_space<vmem>>, vector<16x288xf32>
    tpu.vector_store %arg7[%c8_91, %c0_92], %101 {strides = array<i32>} : memref<56x288xf32, #tpu.memory_space<vmem>>, vector<16x288xf32>,
    %103 = vector.extract_strided_slice %100 {offsets = [31, 0], sizes = [16, 288], strides = [1, 1]} : vector<54x288xf32> to vector<16x288xf32>
    %c32_93 = arith.constant 32 : index
    %c0_94 = arith.constant 0 : index
    %104 = vector.load %arg7[%c32_93, %c0_94] : memref<56x288xf32, #tpu.memory_space<vmem>>, vector<16x288xf32>
    tpu.vector_store %arg7[%c32_93, %c0_94], %103 {strides = array<i32>} : memref<56x288xf32, #tpu.memory_space<vmem>>, vector<16x288xf32>,
    %c0_95 = arith.constant 0 : index
    %c0_96 = arith.constant 0 : index
    %105 = vector.load %arg7[%c0_95, %c0_96] : memref<56x288xf32, #tpu.memory_space<vmem>>, vector<56x288xf32>
    %106 = arith.truncf %105 : vector<56x288xf32> to vector<56x288xbf16>
    %107 = vector.extract_strided_slice %106 {offsets = [0, 0], sizes = [54, 288], strides = [1, 1]} : vector<56x288xbf16> to vector<54x288xbf16>
    %c3 = arith.constant 3 : index
    %c0_97 = arith.constant 0 : index
    %c0_98 = arith.constant 0 : index
    %c0_99 = arith.constant 0 : index
    %108 = vector.load %arg3[%c3, %c0_97, %c0_98, %c0_99] : memref<4x3x288x288xbf16, #tpu.memory_space<vmem>>, vector<1x1x288x288xbf16>
    %109 = vector.shape_cast %108 : vector<1x1x288x288xbf16> to vector<288x288xbf16>
    %cst_100 = arith.constant dense<0.000000e+00> : vector<54x288xf32>
    %110 = tpu.matmul %107, %109, %cst_100 {dimension_numbers = #tpu.dot_dimension_numbers<[1], [0], [0], [1], [0, 0, 1, 1], [], []>} : vector<54x288xbf16>, vector<288x288xbf16>, vector<54x288xf32> -> vector<54x288xf32>
    %111 = vector.extract_strided_slice %106 {offsets = [1, 0], sizes = [54, 288], strides = [1, 1]} : vector<56x288xbf16> to vector<54x288xbf16>
    %c3_101 = arith.constant 3 : index
    %c1_102 = arith.constant 1 : index
    %c0_103 = arith.constant 0 : index
    %c0_104 = arith.constant 0 : index
    %112 = vector.load %arg3[%c3_101, %c1_102, %c0_103, %c0_104] : memref<4x3x288x288xbf16, #tpu.memory_space<vmem>>, vector<1x1x288x288xbf16>
    %113 = vector.shape_cast %112 : vector<1x1x288x288xbf16> to vector<288x288xbf16>
    %cst_105 = arith.constant dense<0.000000e+00> : vector<54x288xf32>
    %114 = tpu.matmul %111, %113, %cst_105 {dimension_numbers = #tpu.dot_dimension_numbers<[1], [0], [0], [1], [0, 0, 1, 1], [], []>} : vector<54x288xbf16>, vector<288x288xbf16>, vector<54x288xf32> -> vector<54x288xf32>
    %115 = arith.addf %110, %114 : vector<54x288xf32>
    %116 = vector.extract_strided_slice %106 {offsets = [2, 0], sizes = [54, 288], strides = [1, 1]} : vector<56x288xbf16> to vector<54x288xbf16>
    %c3_106 = arith.constant 3 : index
    %c2_107 = arith.constant 2 : index
    %c0_108 = arith.constant 0 : index
    %c0_109 = arith.constant 0 : index
    %117 = vector.load %arg3[%c3_106, %c2_107, %c0_108, %c0_109] : memref<4x3x288x288xbf16, #tpu.memory_space<vmem>>, vector<1x1x288x288xbf16>
    %118 = vector.shape_cast %117 : vector<1x1x288x288xbf16> to vector<288x288xbf16>
    %cst_110 = arith.constant dense<0.000000e+00> : vector<54x288xf32>
    %119 = tpu.matmul %116, %118, %cst_110 {dimension_numbers = #tpu.dot_dimension_numbers<[1], [0], [0], [1], [0, 0, 1, 1], [], []>} : vector<54x288xbf16>, vector<288x288xbf16>, vector<54x288xf32> -> vector<54x288xf32>
    %120 = arith.addf %115, %119 : vector<54x288xf32>
    %c3_111 = arith.constant 3 : index
    %c0_112 = arith.constant 0 : index
    %c0_113 = arith.constant 0 : index
    %121 = vector.load %arg4[%c3_111, %c0_112, %c0_113] : memref<4x1x288xf32, #tpu.memory_space<vmem>>, vector<1x1x288xf32>
    %122 = vector.shape_cast %121 : vector<1x1x288xf32> to vector<1x288xf32>
    %123 = vector.broadcast %122 : vector<1x288xf32> to vector<54x288xf32>
    %124 = arith.addf %120, %123 : vector<54x288xf32>
    %125 = vector.extract_strided_slice %124 {offsets = [7, 0], sizes = [16, 288], strides = [1, 1]} : vector<54x288xf32> to vector<16x288xf32>
    %c0_114 = arith.constant 0 : index
    %c0_115 = arith.constant 0 : index
    %c0_116 = arith.constant 0 : index
    %126 = vector.load %arg2[%c0_114, %c0_115, %c0_116] : memref<2x16x288xf32, #tpu.memory_space<vmem>>, vector<1x16x288xf32>
    %127 = vector.shape_cast %126 : vector<1x16x288xf32> to vector<16x288xf32>
    %128 = arith.addf %125, %127 : vector<16x288xf32>
    %c0_117 = arith.constant 0 : index
    %c0_118 = arith.constant 0 : index
    %c0_119 = arith.constant 0 : index
    %129 = vector.load %arg6[%c0_117, %c0_118, %c0_119] : memref<2x16x288xf32, #tpu.memory_space<vmem>>, vector<1x16x288xf32>
    %130 = vector.shape_cast %129 : vector<1x16x288xf32> to vector<16x288xf32>
    %131 = vector.shape_cast %128 : vector<16x288xf32> to vector<1x16x288xf32>
    tpu.vector_store %arg6[%c0_117, %c0_118, %c0_119], %131 {strides = array<i32>} : memref<2x16x288xf32, #tpu.memory_space<vmem>>, vector<1x16x288xf32>,
    %132 = vector.extract_strided_slice %124 {offsets = [31, 0], sizes = [16, 288], strides = [1, 1]} : vector<54x288xf32> to vector<16x288xf32>
    %c1_120 = arith.constant 1 : index
    %c0_121 = arith.constant 0 : index
    %c0_122 = arith.constant 0 : index
    %133 = vector.load %arg2[%c1_120, %c0_121, %c0_122] : memref<2x16x288xf32, #tpu.memory_space<vmem>>, vector<1x16x288xf32>
    %134 = vector.shape_cast %133 : vector<1x16x288xf32> to vector<16x288xf32>
    %135 = arith.addf %132, %134 : vector<16x288xf32>
    %c1_123 = arith.constant 1 : index
    %c0_124 = arith.constant 0 : index
    %c0_125 = arith.constant 0 : index
    %136 = vector.load %arg6[%c1_123, %c0_124, %c0_125] : memref<2x16x288xf32, #tpu.memory_space<vmem>>, vector<1x16x288xf32>
    %137 = vector.shape_cast %136 : vector<1x16x288xf32> to vector<16x288xf32>
    %138 = vector.shape_cast %135 : vector<16x288xf32> to vector<1x16x288xf32>
    tpu.vector_store %arg6[%c1_123, %c0_124, %c0_125], %138 {strides = array<i32>} : memref<2x16x288xf32, #tpu.memory_space<vmem>>, vector<1x16x288xf32>,
    return
  }
  func.func @transform_0(%arg0: i32) -> (i32, i32, i32) {
    %c0_i32 = arith.constant 0 : i32
    %c0_i32_0 = arith.constant 0 : i32
    %c0_i32_1 = arith.constant 0 : i32
    %c0_i32_2 = arith.constant 0 : i32
    return %c0_i32, %c0_i32_0, %c0_i32_1 : i32, i32, i32
  }
  func.func @transform_1(%arg0: i32) -> (i32, i32, i32) {
    %c0_i32 = arith.constant 0 : i32
    %c0_i32_0 = arith.constant 0 : i32
    %c0_i32_1 = arith.constant 0 : i32
    %c0_i32_2 = arith.constant 0 : i32
    return %c0_i32, %c0_i32_0, %c0_i32_1 : i32, i32, i32
  }
  func.func @transform_2(%arg0: i32) -> (i32, i32, i32, i32) {
    %c0_i32 = arith.constant 0 : i32
    %c0_i32_0 = arith.constant 0 : i32
    %c0_i32_1 = arith.constant 0 : i32
    %c0_i32_2 = arith.constant 0 : i32
    %c0_i32_3 = arith.constant 0 : i32
    return %c0_i32, %c0_i32_0, %c0_i32_1, %c0_i32_2 : i32, i32, i32, i32
  }
  func.func @transform_3(%arg0: i32) -> (i32, i32, i32) {
    %c0_i32 = arith.constant 0 : i32
    %c0_i32_0 = arith.constant 0 : i32
    %c0_i32_1 = arith.constant 0 : i32
    %c0_i32_2 = arith.constant 0 : i32
    return %c0_i32, %c0_i32_0, %c0_i32_1 : i32, i32, i32
  }
  func.func @transform_4(%arg0: i32) -> (i32, i32, i32) {
    %c0_i32 = arith.constant 0 : i32
    %c0_i32_0 = arith.constant 0 : i32
    %c0_i32_1 = arith.constant 0 : i32
    %c0_i32_2 = arith.constant 0 : i32
    return %c0_i32, %c0_i32_0, %c0_i32_1 : i32, i32, i32
  }
  func.func @transform_5(%arg0: i32) -> (i32, i32, i32) {
    %c0_i32 = arith.constant 0 : i32
    %c0_i32_0 = arith.constant 0 : i32
    %c0_i32_1 = arith.constant 0 : i32
    %c0_i32_2 = arith.constant 0 : i32
    return %c0_i32, %c0_i32_0, %c0_i32_1 : i32, i32, i32
  }
}

</mosaic_0001>

<bundles_post_ra>
// kernel: repsr_plain_forward.1
= control target key start
LH: loop header
LB: loop body
LE: loop exit
PB: predicated region body
PF: predicated region fallthrough
CT: control target
= control target key end

     0   :  { %vm23_vm0 = vcmask 261120   ;;  %v12633_v1 = vmov 0   ;;  %v12634_v2 = vmov 0.0   ;;  %vm234_vm1 = vsmask.f32 7424  ;;  %s16167_s2 = inlined_call_operand.vmem [shape: bf16[4,3,288,288], index: 2, kind: input, shape index: {}]   ;;  %s16168_s0 = inlined_call_operand.vmem [shape: f32[2,16,288], index: 0, kind: input, shape index: {}]   ;;  %s16169_s3 = inlined_call_operand.vmem [shape: f32[4,1,288], index: 3, kind: input, shape index: {}]   ;;  %s16170_s4 = inlined_call_operand.vmem [shape: f32[4,1,288], index: 4, kind: input, shape index: {}]   ;;  %s16171_s1 = inlined_call_operand.vmem [shape: f32[2,16,288], index: 1, kind: input, shape index: {}]   ;;  %s16172_s5 = inlined_call_operand.vmem [shape: f32[2,16,288], index: 5, kind: output, shape index: {}]  }
   0x1   :  { %v11766_v0 = vld [vmem:[%s16167_s2 + $0x1b4] ss:$12 sps:$4 sm:$0xff]   ;;  %737 = vmatprep.mubr.bf16.mxu1 %v12633_v1  ;;  %24 = vst.msk [vmem:[#allocation2 + $0x10] sm:$0xff] %vm23_vm0, %v12634_v2  ;;  %27 = vst.msk [vmem:[#allocation2 + $0x58] sm:$0xff] %vm23_vm0, %v12634_v2  ;;  %v11768_v3 = vld [vmem:[%s16167_s2 + $0x1b0] ss:$12 sps:$4 sm:$0xff]  }
   0x2   :  { %21 = vst [vmem:[#allocation2] sm:$0xff] %v12634_v2  ;;  %42 = vst.msk [vmem:[#allocation2 + $0xa0] sm:$0xff] %vm23_vm0, %v12634_v2  ;;  %636 = vmatprep.subr.bf16.mxu0 %v11766_v0  ;;  %v11769_v4 = vld [vmem:[%s16167_s2 + $0x1cc] ss:$12 sps:$4 sm:$0xff]   ;;  %v11771_v5 = vld [vmem:[%s16167_s2 + $0x1c8] ss:$12 sps:$4 sm:$0xff]  }
   0x3   :  { %637 = vmatpush1.bf16.msra.mxu0 %v11768_v3  ;;  %v11772_v6 = vld [vmem:[%s16167_s2 + $0x334] ss:$12 sps:$4 sm:$0xff]   ;;  %v11774_v7 = vld [vmem:[%s16167_s2 + $0x1e4] ss:$12 sps:$4 sm:$0xff]   ;;  %v11778_v9 = vld [vmem:[%s16167_s2 + $0x34c] ss:$12 sps:$4 sm:$0xff]  }
   0x4   :  { %638 = vmatprep.subr.bf16.mxu0 %v11769_v4  ;;  %v11776_v8 = vld [vmem:[%s16167_s2 + $0x330] ss:$12 sps:$4 sm:$0xff]   ;;  %705 = vmatprep.subr.bf16.mxu1 %v11772_v6  ;;  %v11777_v10 = vld [vmem:[%s16167_s2 + $0x1e0] ss:$12 sps:$4 sm:$0xff]   ;;  %v11782_v11 = vld [vmem:[%s16167_s2 + $0x348] ss:$12 sps:$4 sm:$0xff]  }
   0x5   :  { %706 = vmatpush1.bf16.msra.mxu1 %v11776_v8  ;;  %v11780_v12 = vld [vmem:[%s16167_s2 + $0x1fc] ss:$12 sps:$4 sm:$0xff]   ;;  %v30_v13 = vld [vmem:[%s16168_s0 + $0x10] sm:$0xff]  ;;  %v11784_v15 = vld [vmem:[%s16167_s2 + $0x278] ss:$12 sps:$4 sm:$0xff]   ;;  %vm1545_vm2 = vcmask 1046528  }
   0x6   :  { %707 = vmatprep.subr.bf16.mxu1 %v11778_v9  ;;  %v33_v14 = vld [vmem:[%s16168_s0 + $0x28] sm:$0xff]  ;;  %36 = vst.msk [vmem:[#allocation2 + $0x28] sm:$0xff] %vm23_vm0, %v30_v13  ;;  %v11783_v16 = vld [vmem:[%s16167_s2 + $0x1f8] ss:$12 sps:$4 sm:$0xff]   ;;  %v11785_v17 = vld [vmem:[%s16167_s2 + $0x214] ss:$12 sps:$4 sm:$0xff]  }
   0x7   :  { %639 = vmatpush1.bf16.msra.mxu0 %v11771_v5  ;;  %39 = vst.msk [vmem:[#allocation2 + $0x40] sm:$0xff] %vm23_vm0, %v33_v14  ;;  %v11788_v20 = vld [vmem:[%s16167_s2 + $0x210] ss:$12 sps:$4 sm:$0xff]   ;;  %v11790_v21 = vld [vmem:[%s16167_s2 + $0x22c] ss:$12 sps:$4 sm:$0xff]   ;;  %v9191_v24 = vld [vmem:[%s16168_s0 + $0x40] sm:$0xff] }
   0x8   :  { %640 = vmatprep.subr.bf16.mxu0 %v11774_v7  ;;  %v58_v18 = vld [vmem:[#allocation2 + $0x10] sm:$0xff]  ;;  %v67_v19 = vld [vmem:[#allocation2 + $0x58] sm:$0xff]  ;;  %52 = vst.msk [vmem:[#allocation2 + $0x70] sm:$0xff] %vm23_vm0, %v9191_v24  ;;  %v11798_v40 = vld [vmem:[%s16167_s2 + $0x240] ss:$12 sps:$4 sm:$0xff]   ;;  %vm2272_vm6 = vcmask 1040384  }
   0x9   :  { %708 = vmatpush1.bf16.msra.mxu1 %v11782_v11  ;;  %v9194_v27 = vld [vmem:[%s16168_s0 + $0x58] sm:$0xff]  ;;  %v11793_v31 = vld [vmem:[%s16167_s2 + $0x228] ss:$12 sps:$4 sm:$0xff]   ;;  %v11795_v32 = vld [vmem:[%s16167_s2 + $0x244] ss:$12 sps:$4 sm:$0xff]  }
   0xa   :  { %10748 = vmatprep.subr.bf16.mxu1 %v11784_v15  ;;  %55 = vst.msk [vmem:[#allocation2 + $0x88] sm:$0xff] %vm23_vm0, %v9194_v27  ;;  %v11787_v35 = vld [vmem:[%s16167_s2 + $0x1b8] ss:$12 sps:$4 sm:$0xff]   ;;  %v11789_v37 = vld [vmem:[%s16167_s2 + $0x290] ss:$12 sps:$4 sm:$0xff]  }
   0xb   :  { %641 = vmatpush1.bf16.msra.mxu0 %v11777_v10  ;;  %v11800_v43 = vld [vmem:[%s16167_s2 + $0x25c] ss:$12 sps:$4 sm:$0xff]   ;;  %v76_v44 = vld [vmem:[#allocation2 + $0xa0] sm:$0xff]  ;;  %v11810_v60 = vld [vmem:[%s16167_s2 + $0x28c] ss:$12 sps:$4 sm:$0xff]  }
   0xc   :  { %642 = vmatprep.subr.bf16.mxu0 %v11780_v12  ;;  %v11792_v45 = vld [vmem:[%s16167_s2 + $0x1d0] ss:$12 sps:$4 sm:$0xff]   ;;  %v11794_v47 = vld [vmem:[%s16167_s2 + $0x2a8] ss:$12 sps:$4 sm:$0xff]   ;;  %v12778_v48 = vpack.c.bf16 %v76_v44, %v76_v44  ;;  %v11803_v51 = vld [vmem:[%s16167_s2 + $0x258] ss:$12 sps:$4 sm:$0xff]  }
   0xd   :  { %v61_v22 = vld [vmem:[#allocation2 + $0x28] sm:$0xff]  ;;  %v11805_v53 = vld [vmem:[%s16167_s2 + $0x274] ss:$12 sps:$4 sm:$0xff]   ;;  %v11808_v59 = vld [vmem:[%s16167_s2 + $0x270] ss:$12 sps:$4 sm:$0xff]  }
   0xe   :  { %v64_v23 = vld [vmem:[#allocation2 + $0x40] sm:$0xff]  ;;  %v12733_v25 = vpack.c.bf16 %v61_v22, %v58_v18  ;;  %v11797_v52 = vld [vmem:[%s16167_s2 + $0x1e8] ss:$12 sps:$4 sm:$0xff]   ;;  %v315_v57 = vshll.u32 %v12778_v48, 16  ;;  %v11809_v6 = vld [vmem:[%s16167_s2 + $0x2f0] ss:$12 sps:$4 sm:$0xff]  }
   0xf   :  { %643 = vmatpush1.bf16.msra.mxu0 %v11783_v16  ;;  %v12735_v26 = vpack.c.bf16 %v67_v19, %v64_v23  ;;  %v70_v38 = vld [vmem:[#allocation2 + $0x70] sm:$0xff]  ;;  %v11799_v55 = vld [vmem:[%s16167_s2 + $0x2c0] ss:$12 sps:$4 sm:$0xff]   ;;  %v11804_v0 = vld [vmem:[%s16167_s2 + $0x2d8] ss:$12 sps:$4 sm:$0xff]   ;;  %v325_v18 = vshrl.u32 %v12778_v48, 16 }
  0x10   :  { %644 = vmatprep.subr.bf16.mxu0 %v11785_v17  ;;  %v260_v28 = vshrl.u32 %v12733_v25, 16  ;;  %v262_v29 = vshll.u32 %v12733_v25, 16  ;;  %v11802_v61 = vld [vmem:[%s16167_s2 + $0x200] ss:$12 sps:$4 sm:$0xff]   ;;  %v317_v63 = vrot.slane %v315_v57, 1  ;;  %v31_v15 = vld [vmem:[%s16168_s0 + $0x18] sm:$0xff] }
  0x11   :  { %v267_v30 = vshll.u32 %v12735_v26, 16  ;;  %v287_v39 = vshrl.u32 %v12735_v26, 16  ;;  %v73_v42 = vld [vmem:[#allocation2 + $0x88] sm:$0xff]  ;;  %v11807_v4 = vld [vmem:[%s16167_s2 + $0x218] ss:$12 sps:$4 sm:$0xff]   ;;  %v12869_v23 = vpack.c.bf16 %v12634_v2, %v31_v15 }
  0x12   :  { %v264_v33 = vrot.slane %v262_v29, 1  ;;  %v12772_v46 = vpack.c.bf16 %v73_v42, %v70_v38  ;;  %v11813_v3 = vld [vmem:[%s16167_s2 + $0x288] ss:$12 sps:$4 sm:$0xff]   ;;  %v11815_v5 = vld [vmem:[%s16167_s2 + $0x2a4] ss:$12 sps:$4 sm:$0xff]  }
  0x13   :  { %645 = vmatpush1.bf16.msra.mxu0 %v11788_v20  ;;  %v269_v34 = vrot.slane %v267_v30, 1  ;;  %v11818_v8 = vld [vmem:[%s16167_s2 + $0x2a0] ss:$12 sps:$4 sm:$0xff]   ;;  %v11820_v9 = vld [vmem:[%s16167_s2 + $0x2bc] ss:$12 sps:$4 sm:$0xff]   ;;  %v243_v38 = vshll.u32 %v12869_v23, 16 }
  0x14   :  { %646 = vmatprep.subr.bf16.mxu0 %v11790_v21  ;;  %v265_v36 = vor.u32 %v264_v33, %v260_v28  ;;  %v291_v50 = vshll.u32 %v12772_v46, 16  ;;  %v311_v56 = vshrl.u32 %v12772_v46, 16  ;;  %v29_v10 = vld [vmem:[%s16168_s0 + $0x8] sm:$0xff]  ;;  %v32_v11 = vld [vmem:[%s16168_s0 + $0x20] sm:$0xff]  ;;  %v11812_v17 = vld [vmem:[%s16167_s2 + $0x230] ss:$12 sps:$4 sm:$0xff]  }
  0x15   :  { %v289_v49 = vor.u32 %v287_v39, %v269_v34  ;;  %v28_v12 = vld [vmem:[%s16168_s0] sm:$0xff]  ;;  %v12844_v13 = vpack.c.bf16 %v29_v10, %v12634_v2  ;;  %v12847_v14 = vpack.c.bf16 %v12634_v2, %v32_v11  ;;  %v11814_v19 = vld [vmem:[%s16167_s2 + $0x308] ss:$12 sps:$4 sm:$0xff]   ;;  %v11827_v39 = vld [vmem:[%s16167_s2 + $0x2d0] ss:$12 sps:$4 sm:$0xff]   ;;  %v12945_v10 = vrot.slane %v12633_v1, 1 }
  0x16   :  { %v12762_v41 = vsel %vm234_vm1, %v265_v36, %v269_v34  ;;  %v293_v54 = vrot.slane %v291_v50, 1  ;;  %v12853_v16 = vpack.c.bf16 %v28_v12, %v12634_v2  ;;  %v11823_v24 = vld [vmem:[%s16167_s2 + $0x2b8] ss:$12 sps:$4 sm:$0xff]   ;;  %v11817_v28 = vld [vmem:[%s16167_s2 + $0x248] ss:$12 sps:$4 sm:$0xff]  }
  0x17   :  { %647 = vmatpush1.bf16.msra.mxu0 %v11793_v31  ;;  %9321 = vmatmul.mubr.msk.bf16.vlgmr.msra.gmra.mrb[0].mxu1 %vm23_vm0, %v12762_v41  ;;  %v248_v20 = vshrl.u32 %v12844_v13, 16  ;;  %v250_v21 = vshll.u32 %v12844_v13, 16  ;;  %v255_v22 = vshll.u32 %v12847_v14, 16  ;;  %v11825_v2 = vld [vmem:[%s16167_s2 + $0x2d4] ss:$12 sps:$4 sm:$0xff]   ;;  %v12881_v31 = vor.u32 %v325_v18, %v317_v63  ;;  %v9190_v34 = vld [vmem:[%s16168_s0 + $0x38] sm:$0xff] }
  0x18   :  { %648 = vmatprep.subr.bf16.mxu0 %v11795_v32  ;;  %10749 = vmatpush3.bf16.msra.mxu1 %v11787_v35  ;;  %v12796_v58 = vsel %vm234_vm1, %v289_v49, %v293_v54  ;;  %v313_v62 = vor.u32 %v311_v56, %v293_v54  ;;  %v238_v27 = vshll.u32 %v12853_v16, 16  ;;  %v11819_v32 = vld [vmem:[%s16167_s2 + $0x320] ss:$12 sps:$4 sm:$0xff]   ;;  %v236_v33 = vshrl.u32 %v12853_v16, 16  ;;  %v9193_v35 = vld [vmem:[%s16168_s0 + $0x50] sm:$0xff] }
  0x19   :  { %747 = vmatprep.mubr.bf16.mxu1 %v12633_v1  ;;  %10750 = vmatprep.subr.bf16.mxu1 %v11789_v37  ;;  %v252_v29 = vrot.slane %v250_v21, 1  ;;  %v257_v30 = vrot.slane %v255_v22, 1  ;;  %v279_v42 = vshrl.u32 %v12847_v14, 16  ;;  %v9192_v44 = vld [vmem:[%s16168_s0 + $0x48] sm:$0xff]  ;;  %v11824_v54 = vld [vmem:[%s16167_s2 + $0x338] ss:$12 sps:$4 sm:$0xff]  }
  0x1a   :  { %v12826_v7 = vsel %vm234_vm1, %v313_v62, %v317_v63  ;;  %v240_v37 = vrot.slane %v238_v27, 1  ;;  %v11822_v50 = vld [vmem:[%s16167_s2 + $0x260] ss:$12 sps:$4 sm:$0xff]   ;;  %v11850_v12 = vld [vmem:[%s16167_s2 + $0xc8] ss:$12 sps:$4 sm:$0xff]  }
  0x1b   :  { %649 = vmatpush1.bf16.msra.mxu0 %v11798_v40  ;;  %v253_v36 = vor.u32 %v252_v29, %v248_v20  ;;  %v12897_v40 = vpack.c.bf16 %v9193_v35, %v9190_v34  ;;  %v281_v56 = vor.u32 %v279_v42, %v257_v30  ;;  %v11833_v63 = vld [vmem:[%s16167_s2 + $0x300] ss:$12 sps:$4 sm:$0xff]   ;;  %v11840_v15 = vld [vmem:[%s16167_s2 + $0x4] ss:$12 sps:$4 sm:$0xff]   ;;  %v11843_v21 = vld [vmem:[%s16167_s2 + $0x1c] ss:$12 sps:$4 sm:$0xff]  }
  0x1c   :  { %650 = vmatprep.subr.bf16.mxu0 %v11800_v43  ;;  %10751 = vmatpush3.bf16.msra.mxu1 %v11792_v45  ;;  %v9189_v43 = vld [vmem:[%s16168_s0 + $0x30] sm:$0xff]  ;;  %v11838_v20 = vld [vmem:[%s16167_s2] ss:$12 sps:$4 sm:$0xff]   ;;  %v11859_v34 = vld [vmem:[%s16167_s2 + $0x7c] ss:$12 sps:$4 sm:$0xff]  }
  0x1d   :  { %10752 = vmatprep.subr.bf16.mxu1 %v11794_v47  ;;  %v258_v45 = vsel %vm234_vm1, %v253_v36, %v257_v30  ;;  %v11828_v47 = vld [vmem:[%s16167_s2 + $0x2ec] ss:$12 sps:$4 sm:$0xff]   ;;  %v283_v49 = vshll.u32 %v12897_v40, 16  ;;  %v11846_v27 = vld [vmem:[%s16167_s2 + $0x34] ss:$12 sps:$4 sm:$0xff]  }
  0x1e   :  { %668 = vmatprep.mubr.bf16.mxu0 %v258_v45  ;;  %v11844_v29 = vld [vmem:[%s16167_s2 + $0x30] ss:$12 sps:$4 sm:$0xff]   ;;  %v11849_v30 = vld [vmem:[%s16167_s2 + $0x4c] ss:$12 sps:$4 sm:$0xff]   ;;  %v11864_v36 = vld [vmem:[%s16167_s2 + $0x94] ss:$12 sps:$4 sm:$0xff]  }
  0x1f   :  { %651 = vmatpush1.bf16.msra.mxu0 %v11803_v51  ;;  %9322 = vmatmul.mubr.msk.bf16.gmra.mrb[4].mxu1 %vm23_vm0, %v12796_v58  ;;  %v241_v51 = vor.u32 %v240_v37, %v236_v33  ;;  %v285_v57 = vrot.slane %v283_v49, 1  ;;  %v11852_v33 = vld [vmem:[%s16167_s2 + $0x60] ss:$12 sps:$4 sm:$0xff]   ;;  %v11857_v35 = vld [vmem:[%s16167_s2 + $0x78] ss:$12 sps:$4 sm:$0xff]  }
  0x20   :  { %652 = vmatprep.subr.bf16.mxu0 %v11805_v53  ;;  %10753 = vmatpush3.bf16.msra.mxu1 %v11797_v52  ;;  %v245_v52 = vrot.slane %v243_v38, 1  ;;  %v12916_v53 = vpack.c.bf16 %v9192_v44, %v9189_v43  ;;  %v11851_v37 = vld [vmem:[%s16167_s2 + $0x8] ss:$12 sps:$4 sm:$0xff]   ;;  %v11862_v38 = vld [vmem:[%s16167_s2 + $0x90] ss:$12 sps:$4 sm:$0xff]  }
  0x21   :  { %757 = vmatprep.mubr.bf16.mxu1 %v12633_v1  ;;  %10754 = vmatprep.subr.bf16.mxu1 %v11799_v55  ;;  %v11830_v55 = vld [vmem:[%s16167_s2 + $0x2e8] ss:$12 sps:$4 sm:$0xff]   ;;  %v11856_v42 = vld [vmem:[%s16167_s2 + $0x20] ss:$12 sps:$4 sm:$0xff]   ;;  %v11860_v43 = vld [vmem:[%s16167_s2 + $0xf8] ss:$12 sps:$4 sm:$0xff]  }
  0x22   :  { %v275_v62 = vshll.u32 %v12916_v53, 16  ;;  %v295_v18 = vshrl.u32 %v12916_v53, 16  ;;  %v11867_v44 = vld [vmem:[%s16167_s2 + $0xa8] ss:$12 sps:$4 sm:$0xff]  }
  0x23   :  { %653 = vmatpush1.bf16.msra.mxu0 %v11808_v59  ;;  %v11831_v59 = vld [vmem:[%s16167_s2 + $0x304] ss:$12 sps:$4 sm:$0xff]   ;;  %v11879_v49 = vld [vmem:[%s16167_s2 + $0xdc] ss:$12 sps:$4 sm:$0xff]  }
  0x24   :  { %654 = vmatprep.subr.bf16.mxu0 %v11810_v60  ;;  %10755 = vmatpush3.bf16.msra.mxu1 %v11802_v61  ;;  %v246_v60 = vsel %vm234_vm1, %v241_v51, %v245_v52  ;;  %v271_v61 = vshrl.u32 %v12869_v23, 16  ;;  %v11870_v51 = vld [vmem:[%s16167_s2 + $0x128] ss:$12 sps:$4 sm:$0xff]  }
  0x25   :  { %10756 = vmatprep.subr.bf16.mxu1 %v11804_v0  ;;  %v286_v0 = vsel %vm234_vm1, %v281_v56, %v285_v57  ;;  %v11882_v56 = vld [vmem:[%s16167_s2 + $0xf0] ss:$12 sps:$4 sm:$0xff]  }
  0x27   :  { %655 = vmatpush1.bf16.msra.mxu0 %v11813_v3  ;;  %9323 = vmatmul.mubr.msk.bf16.gmra.mrb[8].mxu1 %vm23_vm0, %v12826_v7  ;;  %v303_v3 = vshrl.u32 %v12897_v40, 16 }
  0x28   :  { %656 = vmatprep.subr.bf16.mxu0 %v11815_v5  ;;  %10757 = vmatpush3.bf16.msra.mxu1 %v11807_v4  ;;  %v11837_v4 = vld [vmem:[%s16167_s2 + $0x350] ss:$12 sps:$4 sm:$0xff]  }
  0x29   :  { %767 = vmatprep.mubr.bf16.mxu1 %v12633_v1  ;;  %10758 = vmatprep.subr.bf16.mxu1 %v11809_v6  ;;  %v11834_v5 = vld [vmem:[%s16167_s2 + $0x31c] ss:$12 sps:$4 sm:$0xff]   ;;  %v273_v6 = vor.u32 %v271_v61, %v245_v52  ;;  %v305_v11 = vor.u32 %v303_v3, %v285_v57  ;;  %v11877_v52 = vld [vmem:[%s16167_s2 + $0xd8] ss:$12 sps:$4 sm:$0xff]   ;;  %v11891_v3 = vld [vmem:[%s16167_s2 + $0x120] ss:$12 sps:$4 sm:$0xff]  }
  0x2a   :  { %v11889_v57 = vld [vmem:[%s16167_s2 + $0x10c] ss:$12 sps:$4 sm:$0xff]   ;;  %v11887_v61 = vld [vmem:[%s16167_s2 + $0x108] ss:$12 sps:$4 sm:$0xff]  }
  0x2b   :  { %657 = vmatpush1.bf16.msra.mxu0 %v11818_v8  ;;  %v277_v8 = vrot.slane %v275_v62, 1  ;;  %v11893_v62 = vld [vmem:[%s16167_s2 + $0x124] ss:$12 sps:$4 sm:$0xff]  }
  0x2c   :  { %658 = vmatprep.subr.bf16.mxu0 %v11820_v9  ;;  %10759 = vmatpush3.bf16.msra.mxu1 %v11812_v17  ;;  %v11836_v9 = vld [vmem:[%s16167_s2 + $0x318] ss:$12 sps:$4 sm:$0xff]  }
  0x2d   :  { %10760 = vmatprep.subr.bf16.mxu1 %v11814_v19  ;;  %v278_v17 = vsel %vm234_vm1, %v273_v6, %v277_v8  ;;  %v310_v19 = vsel %vm234_vm1, %v305_v11, %v12945_v10  ;;  %v297_v22 = vor.u32 %v295_v18, %v277_v8  ;;  %v11890_v6 = vld [vmem:[%s16167_s2 + $0x188] ss:$12 sps:$4 sm:$0xff]   ;;  %v11894_v8 = vld [vmem:[%s16167_s2 + $0x138] ss:$12 sps:$4 sm:$0xff]   ;;  %v11903_v11 = vld [vmem:[%s16167_s2 + $0x1a0] ss:$12 sps:$4 sm:$0xff]  }
  0x2e   :  { %v11912_v18 = vld [vmem:[%s16167_s2 + $0x184] ss:$12 sps:$4 sm:$0xff]  }
  0x2f   :  { %659 = vmatpush1.bf16.msra.mxu0 %v11823_v24  ;;  %9324 = vmatmul.mubr.msk.bf16.gmra.mrb[12].mxu1 %vm23_vm0, %v12881_v31  ;;  %v11841_v24 = vld [vmem:[%s16167_s2 + $0x18] ss:$12 sps:$4 sm:$0xff]  }
  0x30   :  { %660 = vmatprep.subr.bf16.mxu0 %v11825_v2  ;;  %10761 = vmatpush3.bf16.msra.mxu1 %v11817_v28  ;;  %v302_v28 = vsel %vm234_vm1, %v297_v22, %v12945_v10  ;;  %v11847_v2 = vld [vmem:[%s16167_s2 + $0x48] ss:$12 sps:$4 sm:$0xff]   ;;  %v11922_v22 = vld [vmem:[%s16167_s2 + $0x364] ss:$12 sps:$4 sm:$0xff]  }
  0x31   :  { %806 = vmatprep.mubr.bf16.mxu1 %v258_v45  ;;  %10762 = vmatprep.subr.bf16.mxu1 %v11819_v32  ;;  %v11854_v32 = vld [vmem:[%s16167_s2 + $0x64] ss:$12 sps:$4 sm:$0xff]  }
  0x32   :  { %v11865_v45 = vld [vmem:[%s16167_s2 + $0x110] ss:$12 sps:$4 sm:$0xff]  }
  0x33   :  { %661 = vmatpush1.bf16.msra.mxu0 %v11827_v39  ;;  %v11869_v39 = vld [vmem:[%s16167_s2 + $0xac] ss:$12 sps:$4 sm:$0xff]  }
  0x34   :  { %662 = vmatprep.subr.bf16.mxu0 %v11828_v47  ;;  %10763 = vmatpush3.bf16.msra.mxu1 %v11822_v50  ;;  %v11872_v47 = vld [vmem:[%s16167_s2 + $0xc0] ss:$12 sps:$4 sm:$0xff]   ;;  %v11866_v50 = vld [vmem:[%s16167_s2 + $0x50] ss:$12 sps:$4 sm:$0xff]  }
  0x35   :  { %11300 = vmatprep.subr.bf16.mxu1 %v11824_v54 }
  0x37   :  { %663 = vmatpush1.bf16.msra.mxu0 %v11830_v55  ;;  %807 = vmatmul.mubr.bf16.vlgmr.msra.gmra.mrb[16].mxu1 %v246_v60  ;;  %v11875_v55 = vld [vmem:[%s16167_s2 + $0x140] ss:$12 sps:$4 sm:$0xff]  }
  0x38   :  { %664 = vmatprep.subr.bf16.mxu0 %v11831_v59  ;;  %11301 = vmatpush3.bf16.msra.mxu1 %v11824_v54  ;;  %v11871_v54 = vld [vmem:[%s16167_s2 + $0x68] ss:$12 sps:$4 sm:$0xff]   ;;  %v11876_v59 = vld [vmem:[%s16167_s2 + $0x80] ss:$12 sps:$4 sm:$0xff]  }
  0x39   :  { %814 = vmatprep.mubr.bf16.mxu1 %v286_v0  ;;  %11302 = vmatprep.subr.bf16.mxu1 %v11837_v4 }
  0x3b   :  { %665 = vmatpush1.bf16.msra.mxu0 %v11833_v63  ;;  %v11881_v63 = vld [vmem:[%s16167_s2 + $0x98] ss:$12 sps:$4 sm:$0xff]  }
  0x3c   :  { %666 = vmatprep.subr.bf16.mxu0 %v11834_v5  ;;  %11303 = vmatpush3.bf16.msra.mxu1 %v11837_v4  ;;  %v11896_v4 = vld [vmem:[%s16167_s2 + $0x13c] ss:$12 sps:$4 sm:$0xff]  }
  0x3d   :  { %10794 = vmatprep.subr.bf16.mxu1 %v11850_v12  ;;  %v11886_v5 = vld [vmem:[%s16167_s2 + $0xb0] ss:$12 sps:$4 sm:$0xff]   ;;  %v11902_v12 = vld [vmem:[%s16167_s2 + $0x16c] ss:$12 sps:$4 sm:$0xff]  }
  0x3f   :  { %667 = vmatpush1.bf16.msra.mxu0 %v11836_v9  ;;  %815 = vmatmul.mubr.bf16.gmra.mrb[20].mxu1 %v278_v17  ;;  %v11899_v9 = vld [vmem:[%s16167_s2 + $0x154] ss:$12 sps:$4 sm:$0xff]  }
  0x40   :  { %1196 = vmatprep.subr.bf16.mxu0 %v11840_v15  ;;  %822 = vmatprep.mubr.bf16.mxu1 %v310_v19  ;;  %v11900_v15 = vld [vmem:[%s16167_s2 + $0x168] ss:$12 sps:$4 sm:$0xff]  }
  0x42   :  { %669 = vmatmul.mubr.bf16.vlgmr.msra.gmra.mrb[0].mxu0 %v246_v60  ;;  %v11880_v60 = vld [vmem:[%s16167_s2 + $0x158] ss:$12 sps:$4 sm:$0xff]  }
  0x43   :  { %1197 = vmatpush1.bf16.msra.mxu0 %v11838_v20  ;;  %678 = vmatprep.mubr.bf16.mxu0 %v286_v0  ;;  %v11885_v0 = vld [vmem:[%s16167_s2 + $0x170] ss:$12 sps:$4 sm:$0xff]  }
  0x44   :  { %1198 = vmatprep.subr.bf16.mxu0 %v11843_v21  ;;  %v11917_v20 = vld [vmem:[%s16167_s2 + $0x19c] ss:$12 sps:$4 sm:$0xff]   ;;  %v11915_v21 = vld [vmem:[%s16167_s2 + $0x198] ss:$12 sps:$4 sm:$0xff]  }
  0x47   :  { %1199 = vmatpush1.bf16.msra.mxu0 %v11841_v24  ;;  %823 = vmatmul.mubr.bf16.gmra.mrb[24].mxu1 %v302_v28  ;;  %v12635_v24 = vmov 0.0|0.0  }
  0x48   :  { %1200 = vmatprep.subr.bf16.mxu0 %v11846_v27  ;;  %830 = vmatprep.mubr.bf16.mxu1 %v12945_v10  ;;  %v11905_v27 = vld [vmem:[%s16167_s2 + $0x368] ss:$12 sps:$4 sm:$0xff]  }
  0x4a   :  { %679 = vmatmul.mubr.bf16.gmra.mrb[4].mxu0 %v278_v17  ;;  %v11904_v17 = vld [vmem:[%s16167_s2 + $0x428] ss:$12 sps:$4 sm:$0xff]  }
  0x4b   :  { %1201 = vmatpush1.bf16.msra.mxu0 %v11844_v29  ;;  %688 = vmatprep.mubr.bf16.mxu0 %v310_v19  ;;  %v11910_v19 = vld [vmem:[%s16167_s2 + $0x180] ss:$12 sps:$4 sm:$0xff]  }
  0x4c   :  { %1202 = vmatprep.subr.bf16.mxu0 %v11849_v30  ;;  %v11907_v29 = vld [vmem:[%s16167_s2 + $0x380] ss:$12 sps:$4 sm:$0xff]   ;;  %v11908_v30 = vld [vmem:[%s16167_s2 + $0x458] ss:$12 sps:$4 sm:$0xff]  }
  0x4f   :  { %1203 = vmatpush1.bf16.msra.mxu0 %v11847_v2  ;;  %831 = vmatmul.mubr.bf16.gmra.mrb[28].mxu1 %v12945_v10  ;;  %v1549_v2 = vrot.slane %v12844_v13, 1 }
  0x50   :  { %1204 = vmatprep.subr.bf16.mxu0 %v11854_v32  ;;  %11304 = vmatprep.mubr.msk.bf16.mxu1 %vm23_vm0, %v12762_v41  ;;  %v11855_v41 = vld [vmem:[%s16167_s2 + $0xe0] ss:$12 sps:$4 sm:$0xff]   ;;  %v1550_v32 = vrot.slane %v12847_v14, 1 }
  0x52   :  { %689 = vmatmul.mubr.bf16.gmra.mrb[8].mxu0 %v302_v28  ;;  %v11906_v28 = vld [vmem:[%s16167_s2 + $0x440] ss:$12 sps:$4 sm:$0xff]  }
  0x53   :  { %1205 = vmatpush1.bf16.msra.mxu0 %v11852_v33  ;;  %698 = vmatprep.mubr.bf16.mxu0 %v12945_v10  ;;  %v11909_v33 = vld [vmem:[%s16167_s2 + $0x398] ss:$12 sps:$4 sm:$0xff]  }
  0x54   :  { %1206 = vmatprep.subr.bf16.mxu0 %v11859_v34  ;;  %v11913_v34 = vld [vmem:[%s16167_s2 + $0x470] ss:$12 sps:$4 sm:$0xff]  }
  0x57   :  { %1207 = vmatpush1.bf16.msra.mxu0 %v11857_v35  ;;  %11305 = vmatmul.mubr.msk.bf16.vlgmr.msra.gmra.mrb[32].mxu1 %vm23_vm0, %v12796_v58  ;;  %v11874_v58 = vld [vmem:[%s16167_s2 + $0xc4] ss:$12 sps:$4 sm:$0xff]   ;;  %v11927_v35 = vld [vmem:[%s16167_s2 + $0x37c] ss:$12 sps:$4 sm:$0xff]  }
  0x58   :  { %1208 = vmatprep.subr.bf16.mxu0 %v11864_v36  ;;  %10795 = vmatpush3.bf16.msra.mxu1 %v11851_v37  ;;  %v13185_v36 = vsel %vm1545_vm2, %v1549_v2, %v1550_v32  ;;  %v11914_v37 = vld [vmem:[%s16167_s2 + $0x3b0] ss:$12 sps:$4 sm:$0xff]   ;;  %v11973_v2 = vld [vmem:[%s16167_s2 + $0x4c8] ss:$12 sps:$4 sm:$0xff]  }
  0x59   :  { %11308 = vmatprep.mubr.msk.bf16.mxu1 %vm23_vm0, %v12826_v7  ;;  %10796 = vmatprep.subr.bf16.mxu1 %v11855_v41  ;;  %v11861_v7 = vld [vmem:[%s16167_s2 + $0x38] ss:$12 sps:$4 sm:$0xff]   ;;  %v11918_v41 = vld [vmem:[%s16167_s2 + $0x488] ss:$12 sps:$4 sm:$0xff]  }
  0x5a   :  { %699 = vmatmul.mubr.bf16.gmra.mrb[12].mxu0 %v12945_v10  ;;  %v11897_v10 = vld [vmem:[%s16167_s2 + $0x150] ss:$12 sps:$4 sm:$0xff]  }
  0x5b   :  { %1209 = vmatpush1.bf16.msra.mxu0 %v11862_v38  ;;  %1228 = vmatprep.mubr.bf16.mxu0 %v12844_v13  ;;  %v11925_v38 = vld [vmem:[%s16167_s2 + $0x378] ss:$12 sps:$4 sm:$0xff]  }
  0x5c   :  { %1210 = vmatprep.subr.bf16.mxu0 %v11869_v39  ;;  %10797 = vmatpush3.bf16.msra.mxu1 %v11856_v42  ;;  %v11932_v39 = vld [vmem:[%s16167_s2 + $0x394] ss:$12 sps:$4 sm:$0xff]  }
  0x5d   :  { %10798 = vmatprep.subr.bf16.mxu1 %v11860_v43  ;;  %v11919_v42 = vld [vmem:[%s16167_s2 + $0x3c8] ss:$12 sps:$4 sm:$0xff]   ;;  %v11923_v43 = vld [vmem:[%s16167_s2 + $0x4a0] ss:$12 sps:$4 sm:$0xff]  }
  0x5f   :  { %1211 = vmatpush1.bf16.msra.mxu0 %v11867_v44  ;;  %11309 = vmatmul.mubr.msk.bf16.gmra.mrb[36].mxu1 %vm23_vm0, %v12881_v31  ;;  %v11884_v31 = vld [vmem:[%s16167_s2 + $0xf4] ss:$12 sps:$4 sm:$0xff]   ;;  %v11930_v44 = vld [vmem:[%s16167_s2 + $0x390] ss:$12 sps:$4 sm:$0xff]  }
  0x60   :  { %1212 = vmatprep.subr.bf16.mxu0 %v11874_v58  ;;  %10799 = vmatpush3.bf16.msra.mxu1 %v11861_v7  ;;  %v11937_v58 = vld [vmem:[%s16167_s2 + $0x3ac] ss:$12 sps:$4 sm:$0xff]  }
  0x61   :  { %1366 = vmatprep.mubr.bf16.mxu1 %v12844_v13  ;;  %10800 = vmatprep.subr.bf16.mxu1 %v11865_v45  ;;  %v11920_v13 = vld [vmem:[%s16167_s2 + $0x360] ss:$12 sps:$4 sm:$0xff]   ;;  %v11928_v45 = vld [vmem:[%s16167_s2 + $0x4b8] ss:$12 sps:$4 sm:$0xff]  }
  0x62   :  { %v11924_v7 = vld [vmem:[%s16167_s2 + $0x3e0] ss:$12 sps:$4 sm:$0xff]  }
  0x63   :  { %1213 = vmatpush1.bf16.msra.mxu0 %v11872_v47  ;;  %v11935_v47 = vld [vmem:[%s16167_s2 + $0x3a8] ss:$12 sps:$4 sm:$0xff]  }
  0x64   :  { %1214 = vmatprep.subr.bf16.mxu0 %v11879_v49  ;;  %10801 = vmatpush3.bf16.msra.mxu1 %v11866_v50  ;;  %v1546_v49 = vrot.slane %v12853_v16, 1  ;;  %v1547_v50 = vrot.slane %v12869_v23, 1 }
  0x65   :  { %10802 = vmatprep.subr.bf16.mxu1 %v11870_v51  ;;  %v11941_v51 = vld [vmem:[%s16167_s2 + $0x3c4] ss:$12 sps:$4 sm:$0xff]  }
  0x67   :  { %1215 = vmatpush1.bf16.msra.mxu0 %v11877_v52  ;;  %v11929_v52 = vld [vmem:[%s16167_s2 + $0x3f8] ss:$12 sps:$4 sm:$0xff]  }
  0x68   :  { %1216 = vmatprep.subr.bf16.mxu0 %v11884_v31  ;;  %10803 = vmatpush3.bf16.msra.mxu1 %v11871_v54  ;;  %v1557_v31 = vrot.slane %v12897_v40, 1  ;;  %v11944_v54 = vld [vmem:[%s16167_s2 + $0x3dc] ss:$12 sps:$4 sm:$0xff]  }
  0x69   :  { %10804 = vmatprep.subr.bf16.mxu1 %v11875_v55  ;;  %v11938_v55 = vld [vmem:[%s16167_s2 + $0x4e8] ss:$12 sps:$4 sm:$0xff]  }
  0x6b   :  { %1217 = vmatpush1.bf16.msra.mxu0 %v11882_v56  ;;  %v1555_v56 = vrot.slane %v12916_v53, 1 }
  0x6c   :  { %1218 = vmatprep.subr.bf16.mxu0 %v11889_v57  ;;  %10805 = vmatpush3.bf16.msra.mxu1 %v11876_v59  ;;  %v11942_v57 = vld [vmem:[%s16167_s2 + $0x3d8] ss:$12 sps:$4 sm:$0xff]   ;;  %v13258_v59 = vrot.slane %v12635_v24, 1 }
  0x6d   :  { %10806 = vmatprep.subr.bf16.mxu1 %v11880_v60  ;;  %v11947_v60 = vld [vmem:[%s16167_s2 + $0x3f4] ss:$12 sps:$4 sm:$0xff]  }
  0x6f   :  { %1219 = vmatpush1.bf16.msra.mxu0 %v11887_v61  ;;  %v13270_v61 = vsel %vm1545_vm2, %v1546_v49, %v1547_v50 }
  0x70   :  { %1220 = vmatprep.subr.bf16.mxu0 %v11893_v62  ;;  %10807 = vmatpush3.bf16.msra.mxu1 %v11881_v63  ;;  %v11945_v62 = vld [vmem:[%s16167_s2 + $0x3f0] ss:$12 sps:$4 sm:$0xff]   ;;  %v13278_v63 = vsel %vm1545_vm2, %v1550_v32, %v1557_v31 }
  0x71   :  { %10808 = vmatprep.subr.bf16.mxu1 %v11885_v0  ;;  %v11950_v0 = vld [vmem:[%s16167_s2 + $0x40c] ss:$12 sps:$4 sm:$0xff]   ;;  %v11978_v32 = vld [vmem:[%s16167_s2 + $0x4e4] ss:$12 sps:$4 sm:$0xff]  }
  0x73   :  { %1221 = vmatpush1.bf16.msra.mxu0 %v11891_v3  ;;  %v11948_v3 = vld [vmem:[%s16167_s2 + $0x408] ss:$12 sps:$4 sm:$0xff]  }
  0x74   :  { %1222 = vmatprep.subr.bf16.mxu0 %v11896_v4  ;;  %10809 = vmatpush3.bf16.msra.mxu1 %v11886_v5  ;;  %v1556_v4 = vsel %vm1545_vm2, %v1547_v50, %v1555_v56  ;;  %v11952_v5 = vld [vmem:[%s16167_s2 + $0x420] ss:$12 sps:$4 sm:$0xff]  }
  0x75   :  { %11312 = vmatprep.subr.bf16.mxu1 %v11890_v6 }
  0x77   :  { %1223 = vmatpush1.bf16.msra.mxu0 %v11894_v8  ;;  %1367 = vmatmul.mubr.bf16.vlgmr.msra.gmra.mrb[40].mxu1 %v12853_v16  ;;  %v11957_v8 = vld [vmem:[%s16167_s2 + $0x43c] ss:$12 sps:$4 sm:$0xff]  }
  0x78   :  { %1224 = vmatprep.subr.bf16.mxu0 %v11899_v9  ;;  %11313 = vmatpush3.bf16.msra.mxu1 %v11890_v6  ;;  %v1564_v6 = vsel %vm1545_vm2, %v1557_v31, %v13258_v59  ;;  %v11955_v9 = vld [vmem:[%s16167_s2 + $0x438] ss:$12 sps:$4 sm:$0xff]  }
  0x79   :  { %1374 = vmatprep.mubr.bf16.mxu1 %v12847_v14  ;;  %11314 = vmatprep.subr.bf16.mxu1 %v11903_v11 }
  0x7b   :  { %1225 = vmatpush1.bf16.msra.mxu0 %v11897_v10  ;;  %v11960_v10 = vld [vmem:[%s16167_s2 + $0x454] ss:$12 sps:$4 sm:$0xff]  }
  0x7c   :  { %1226 = vmatprep.subr.bf16.mxu0 %v11902_v12  ;;  %11315 = vmatpush3.bf16.msra.mxu1 %v11903_v11  ;;  %v1562_v11 = vsel %vm1545_vm2, %v1555_v56, %v13258_v59  ;;  %v11958_v12 = vld [vmem:[%s16167_s2 + $0x450] ss:$12 sps:$4 sm:$0xff]  }
  0x7d   :  { %10840 = vmatprep.subr.bf16.mxu1 %v11904_v17  ;;  %v11961_v17 = vld [vmem:[%s16167_s2 + $0x468] ss:$12 sps:$4 sm:$0xff]  }
  0x7f   :  { %1227 = vmatpush1.bf16.msra.mxu0 %v11900_v15  ;;  %1375 = vmatmul.mubr.bf16.gmra.mrb[44].mxu1 %v12869_v23  ;;  %v11963_v15 = vld [vmem:[%s16167_s2 + $0x46c] ss:$12 sps:$4 sm:$0xff]  }
  0x80   :  { %1265 = vmatprep.subr.bf16.mxu0 %v11912_v18  ;;  %1382 = vmatprep.mubr.bf16.mxu1 %v12897_v40  ;;  %v1552_v18 = vrot.slane %v12733_v25, 1 }
  0x82   :  { %1229 = vmatmul.mubr.bf16.vlgmr.msra.gmra.mrb[16].mxu0 %v12853_v16  ;;  %v11933_v16 = vld [vmem:[%s16167_s2 + $0x4d0] ss:$12 sps:$4 sm:$0xff]  }
  0x83   :  { %1238 = vmatprep.mubr.bf16.mxu0 %v12847_v14  ;;  %1266 = vmatpush1.bf16.msra.mxu0 %v11910_v19  ;;  %v11954_v14 = vld [vmem:[%s16167_s2 + $0x424] ss:$12 sps:$4 sm:$0xff]   ;;  %v1553_v19 = vrot.slane %v12735_v26, 1 }
  0x84   :  { %1267 = vmatprep.subr.bf16.mxu0 %v11917_v20  ;;  %v11966_v20 = vld [vmem:[%s16167_s2 + $0x484] ss:$12 sps:$4 sm:$0xff]  }
  0x87   :  { %1268 = vmatpush1.bf16.msra.mxu0 %v11915_v21  ;;  %1383 = vmatmul.mubr.bf16.gmra.mrb[48].mxu1 %v12916_v53  ;;  %v11964_v21 = vld [vmem:[%s16167_s2 + $0x480] ss:$12 sps:$4 sm:$0xff]  }
  0x88   :  { %1875 = vmatprep.subr.bf16.mxu0 %v11922_v22  ;;  %1390 = vmatprep.mubr.bf16.mxu1 %v12635_v24  ;;  %v1554_v22 = vsel %vm1545_vm2, %v1552_v18, %v1553_v19 }
  0x8a   :  { %1239 = vmatmul.mubr.bf16.gmra.mrb[20].mxu0 %v12869_v23  ;;  %v11939_v23 = vld [vmem:[%s16167_s2 + $0x3c0] ss:$12 sps:$4 sm:$0xff]  }
  0x8b   :  { %1248 = vmatprep.mubr.bf16.mxu0 %v12897_v40  ;;  %v11934_v40 = vld [vmem:[%s16167_s2 + $0x410] ss:$12 sps:$4 sm:$0xff]  }
  0x8f   :  { %1391 = vmatmul.mubr.bf16.gmra.mrb[52].mxu1 %v12635_v24 }
  0x90   :  { %11316 = vmatprep.mubr.msk.bf16.mxu1 %vm23_vm0, %v12733_v25 }
  0x92   :  { %1249 = vmatmul.mubr.bf16.gmra.mrb[24].mxu0 %v12916_v53  ;;  %v11951_v53 = vld [vmem:[%s16167_s2 + $0x500] ss:$12 sps:$4 sm:$0xff]  }
  0x93   :  { %1258 = vmatprep.mubr.bf16.mxu0 %v12635_v24 }
  0x97   :  { %11317 = vmatmul.mubr.msk.bf16.vlgmr.msra.gmra.mrb[32].mxu1 %vm23_vm0, %v12735_v26 }
  0x98   :  { %10841 = vmatpush3.bf16.msra.mxu1 %v11905_v27  ;;  %11320 = vmatprep.mubr.msk.bf16.mxu1 %vm23_vm0, %v12772_v46  ;;  %v13340_v27 = vrot.slane %v12778_v48, 1 }
  0x99   :  { %10842 = vmatprep.subr.bf16.mxu1 %v11906_v28  ;;  %v11972_v28 = vld [vmem:[%s16167_s2 + $0x4b4] ss:$12 sps:$4 sm:$0xff]  }
  0x9a   :  { %1259 = vmatmul.mubr.bf16.gmra.mrb[28].mxu0 %v12635_v24  ;;  %v11969_v24 = vld [vmem:[%s16167_s2 + $0x49c] ss:$12 sps:$4 sm:$0xff]  }
  0x9b   :  { %1297 = vmatprep.mubr.bf16.mxu0 %v12633_v1 }
  0x9c   :  { %10843 = vmatpush3.bf16.msra.mxu1 %v11907_v29 }
  0x9d   :  { %10844 = vmatprep.subr.bf16.mxu1 %v11908_v30  ;;  %v11970_v30 = vld [vmem:[%s16167_s2 + $0x4b0] ss:$12 sps:$4 sm:$0xff]  }
  0x9f   :  { %11321 = vmatmul.mubr.msk.bf16.gmra.mrb[56].mxu1 %vm23_vm0, %v12778_v48 }
  0xa0   :  { %10845 = vmatpush3.bf16.msra.mxu1 %v11909_v33  ;;  %2045 = vmatprep.mubr.bf16.mxu1 %v13185_v36  ;;  %v11976_v33 = vld [vmem:[%s16167_s2 + $0x4e0] ss:$12 sps:$4 sm:$0xff]  }
  0xa1   :  { %10846 = vmatprep.subr.bf16.mxu1 %v11913_v34  ;;  %v11981_v34 = vld [vmem:[%s16167_s2 + $0x4fc] ss:$12 sps:$4 sm:$0xff]  }
  0xa2   :  { %9383 = vmatmul.mubr.msk.bf16.vlgmr.msra.gmra.mrb[16].mxu0 %vm23_vm0, %v12733_v25  ;;  %v1559_v25 = vrot.slane %v12772_v46, 1 }
  0xa3   :  { %1876 = vmatpush1.bf16.msra.mxu0 %v11920_v13  ;;  %1307 = vmatprep.mubr.bf16.mxu0 %v12633_v1  ;;  %v11979_v13 = vld [vmem:[%s16167_s2 + $0x4f8] ss:$12 sps:$4 sm:$0xff]  }
  0xa4   :  { %1877 = vmatprep.subr.bf16.mxu0 %v11927_v35  ;;  %10847 = vmatpush3.bf16.msra.mxu1 %v11914_v37  ;;  %v1560_v29 = vsel %vm1545_vm2, %v1553_v19, %v1559_v25 }
  0xa5   :  { %10848 = vmatprep.subr.bf16.mxu1 %v11918_v41 }
  0xa7   :  { %1878 = vmatpush1.bf16.msra.mxu0 %v11925_v38 }
  0xa8   :  { %1879 = vmatprep.subr.bf16.mxu0 %v11932_v39  ;;  %10849 = vmatpush3.bf16.msra.mxu1 %v11919_v42 }
  0xa9   :  { %10850 = vmatprep.subr.bf16.mxu1 %v11923_v43 }
  0xaa   :  { %9384 = vmatmul.mubr.msk.bf16.gmra.mrb[20].mxu0 %vm23_vm0, %v12735_v26  ;;  %v11967_v26 = vld [vmem:[%s16167_s2 + $0x498] ss:$12 sps:$4 sm:$0xff]  }
  0xab   :  { %1880 = vmatpush1.bf16.msra.mxu0 %v11930_v44  ;;  %1317 = vmatprep.mubr.bf16.mxu0 %v12633_v1 }
  0xac   :  { %1881 = vmatprep.subr.bf16.mxu0 %v11937_v58  ;;  %10851 = vmatpush3.bf16.msra.mxu1 %v11924_v7 }
  0xad   :  { %10852 = vmatprep.subr.bf16.mxu1 %v11928_v45 }
  0xaf   :  { %1882 = vmatpush1.bf16.msra.mxu0 %v11935_v47 }
  0xb0   :  { %1883 = vmatprep.subr.bf16.mxu0 %v11941_v51  ;;  %10853 = vmatpush3.bf16.msra.mxu1 %v11929_v52 }
  0xb1   :  { %10854 = vmatprep.subr.bf16.mxu1 %v11933_v16 }
  0xb2   :  { %9385 = vmatmul.mubr.msk.bf16.gmra.mrb[24].mxu0 %vm23_vm0, %v12772_v46  ;;  %v1566_v46 = vsel %vm1545_vm2, %v1559_v25, %v13340_v27 }
  0xb3   :  { %1884 = vmatpush1.bf16.msra.mxu0 %v11939_v23  ;;  %1327 = vmatprep.mubr.bf16.mxu0 %v12633_v1 }
  0xb4   :  { %1885 = vmatprep.subr.bf16.mxu0 %v11944_v54  ;;  %10855 = vmatpush3.bf16.msra.mxu1 %v11934_v40 }
  0xb5   :  { %11324 = vmatprep.subr.bf16.mxu1 %v11938_v55 }
  0xb7   :  { %1886 = vmatpush1.bf16.msra.mxu0 %v11942_v57  ;;  %2046 = vmatmul.mubr.bf16.vlgmr.msra.gmra.mrb[60].mxu1 %v13270_v61 }
  0xb8   :  { %1887 = vmatprep.subr.bf16.mxu0 %v11947_v60  ;;  %11325 = vmatpush3.bf16.msra.mxu1 %v11938_v55 }
  0xb9   :  { %2053 = vmatprep.mubr.bf16.mxu1 %v13278_v63  ;;  %11326 = vmatprep.subr.bf16.mxu1 %v11951_v53 }
  0xba   :  { %9386 = vmatmul.mubr.msk.bf16.gmra.mrb[32].mxu0 %vm23_vm0, %v12778_v48  ;;  %v11975_v48 = vld [vmem:[%s16167_s2 + $0x4cc] ss:$12 sps:$4 sm:$0xff]  }
  0xbb   :  { %1888 = vmatpush1.bf16.msra.mxu0 %v11945_v62  ;;  %1907 = vmatprep.mubr.bf16.mxu0 %v13185_v36 }
  0xbc   :  { %1889 = vmatprep.subr.bf16.mxu0 %v11950_v0  ;;  %11327 = vmatpush3.bf16.msra.mxu1 %v11951_v53 }
  0xbf   :  { %1890 = vmatpush1.bf16.msra.mxu0 %v11948_v3  ;;  %2054 = vmatmul.mubr.bf16.gmra.mrb[64].mxu1 %v1556_v4 }
  0xc0   :  { %1891 = vmatprep.subr.bf16.mxu0 %v11954_v14  ;;  %2061 = vmatprep.mubr.bf16.mxu1 %v1564_v6 }
  0xc3   :  { %1892 = vmatpush1.bf16.msra.mxu0 %v11952_v5 }
  0xc4   :  { %1893 = vmatprep.subr.bf16.mxu0 %v11957_v8 }
  0xc7   :  { %1894 = vmatpush1.bf16.msra.mxu0 %v11955_v9  ;;  %2062 = vmatmul.mubr.bf16.gmra.mrb[68].mxu1 %v1562_v11 }
  0xc8   :  { %1895 = vmatprep.subr.bf16.mxu0 %v11960_v10  ;;  %2069 = vmatprep.mubr.bf16.mxu1 %v13258_v59 }
  0xcb   :  { %1896 = vmatpush1.bf16.msra.mxu0 %v11958_v12 }
  0xcc   :  { %1897 = vmatprep.subr.bf16.mxu0 %v11963_v15 }
  0xcf   :  { %1898 = vmatpush1.bf16.msra.mxu0 %v11961_v17  ;;  %2070 = vmatmul.mubr.bf16.gmra.mrb[72].mxu1 %v13258_v59 }
  0xd0   :  { %1899 = vmatprep.subr.bf16.mxu0 %v11966_v20  ;;  %11328 = vmatprep.mubr.msk.bf16.mxu1 %vm23_vm0, %v1554_v22 }
  0xd3   :  { %1900 = vmatpush1.bf16.msra.mxu0 %v11964_v21 }
  0xd4   :  { %1901 = vmatprep.subr.bf16.mxu0 %v11969_v24 }
  0xd7   :  { %1902 = vmatpush1.bf16.msra.mxu0 %v11967_v26  ;;  %11329 = vmatmul.mubr.msk.bf16.vlgmr.msra.gmra.mrb[32].mxu1 %vm23_vm0, %v1560_v29 }
  0xd8   :  { %1903 = vmatprep.subr.bf16.mxu0 %v11972_v28  ;;  %11332 = vmatprep.mubr.msk.bf16.mxu1 %vm23_vm0, %v1566_v46 }
  0xdb   :  { %1904 = vmatpush1.bf16.msra.mxu0 %v11970_v30 }
  0xdc   :  { %1905 = vmatprep.subr.bf16.mxu0 %v11975_v48 }
  0xdf   :  { %1906 = vmatpush1.bf16.msra.mxu0 %v11973_v2  ;;  %11333 = vmatmul.mubr.msk.bf16.gmra.mrb[76].mxu1 %vm23_vm0, %v13340_v27 }
  0xe0   :  { %1944 = vmatprep.subr.bf16.mxu0 %v11978_v32  ;;  %3017 = vmatprep.mubr.bf16.mxu1 %v12633_v1 }
  0xe2   :  { %1908 = vmatmul.mubr.bf16.vlgmr.msra.gmra.mrb[16].mxu0 %v13270_v61 }
  0xe3   :  { %1917 = vmatprep.mubr.bf16.mxu0 %v13278_v63  ;;  %1945 = vmatpush1.bf16.msra.mxu0 %v11976_v33 }
  0xe4   :  { %1946 = vmatprep.subr.bf16.mxu0 %v11981_v34 }
  0xe7   :  { %1947 = vmatpush1.bf16.msra.mxu0 %v11979_v13 }
  0xea   :  { %1918 = vmatmul.mubr.bf16.gmra.mrb[20].mxu0 %v1556_v4  ;;  %v739_v35 = vpop.f32.mrb[0].mxu1 }
  0xeb   :  { %1927 = vmatprep.mubr.bf16.mxu0 %v1564_v6  ;;  %v741_v36 = vpop.f32.mrb[1].mxu1 }
  0xec   :  { %v743_v37 = vpop.f32.mrb[2].mxu1 }
  0xed   :  { %v745_v41 = vpop.f32.mrb[3].mxu1 }
  0xf2   :  { %1928 = vmatmul.mubr.bf16.gmra.mrb[24].mxu0 %v1562_v11  ;;  %v749_v38 = vpop.f32.mrb[4].mxu1 }
  0xf3   :  { %1937 = vmatprep.mubr.bf16.mxu0 %v13258_v59  ;;  %v751_v39 = vpop.f32.mrb[5].mxu1 }
  0xf4   :  { %v753_v42 = vpop.f32.mrb[6].mxu1 }
  0xf5   :  { %v755_v43 = vpop.f32.mrb[7].mxu1 }
  0xfa   :  { %1938 = vmatmul.mubr.bf16.gmra.mrb[36].mxu0 %v13258_v59  ;;  %v759_v44 = vpop.f32.mrb[8].mxu1 }
  0xfb   :  { %1976 = vmatprep.mubr.bf16.mxu0 %v12633_v1  ;;  %v761_v58 = vpop.f32.mrb[9].mxu1 }
  0xfc   :  { %v763_v7 = vpop.f32.mrb[10].mxu1 }
  0xfd   :  { %v765_v45 = vpop.f32.mrb[11].mxu1 }
 0x102   :  { %9517 = vmatmul.mubr.msk.bf16.vlgmr.msra.gmra.mrb[16].mxu0 %vm23_vm0, %v1554_v22  ;;  %v769_v47 = vpop.f32.mrb[12].mxu1 }
 0x103   :  { %1986 = vmatprep.mubr.bf16.mxu0 %v12633_v1  ;;  %v770_v49 = vpop.f32.mrb[13].mxu1  ;;  %v11991_v47 = vld [vmem:[%s16167_s2 + $0x6d8] ss:$12 sps:$4 sm:$0xff]  }
 0x104   :  { %v771_v50 = vpop.f32.mrb[14].mxu1  ;;  %v11996_v49 = vld [vmem:[%s16167_s2 + $0x6f4] ss:$12 sps:$4 sm:$0xff]  }
 0x105   :  { %v772_v51 = vpop.f32.mrb[15].mxu1  ;;  %v11994_v50 = vld [vmem:[%s16167_s2 + $0x6f0] ss:$12 sps:$4 sm:$0xff]  }
 0x106   :  { %v11984_v51 = vld [vmem:[%s16167_s2 + $0x844] ss:$12 sps:$4 sm:$0xff]  }
 0x107   :  { %2985 = vmatprep.subr.bf16.mxu1 %v11984_v51 }
 0x10a   :  { %9518 = vmatmul.mubr.msk.bf16.gmra.mrb[20].mxu0 %vm23_vm0, %v1560_v29  ;;  %v10764_v52 = vpop.f32.mrb[16].mxu1 }
 0x10b   :  { %1996 = vmatprep.mubr.bf16.mxu0 %v12633_v1  ;;  %v10765_v31 = vpop.f32.mrb[17].mxu1 }
 0x10c   :  { %v13383_v16 = vadd.f32 %v10765_v31, %v10764_v52  ;;  %v10767_v23 = vpop.f32.mrb[18].mxu1  ;;  %v11982_v52 = vld [vmem:[%s16167_s2 + $0x840] ss:$12 sps:$4 sm:$0xff]  }
 0x10d   :  { %v10768_v54 = vpop.f32.mrb[19].mxu1  ;;  %v12000_v31 = vld [vmem:[%s16167_s2 + $0x70c] ss:$12 sps:$4 sm:$0xff]   ;;  %2986 = vmatpush1.bf16.msra.mxu1 %v11982_v52  ;;  %v12034_v52 = vld [vmem:[%s16167_s2 + $0x7e4] ss:$12 sps:$4 sm:$0xff]  }
 0x10e   :  { %v13385_v40 = vadd.f32 %v10768_v54, %v10767_v23  ;;  %v11988_v23 = vld [vmem:[%s16167_s2 + $0x858] ss:$12 sps:$4 sm:$0xff]   ;;  %v11990_v54 = vld [vmem:[%s16167_s2 + $0x85c] ss:$12 sps:$4 sm:$0xff]  }
 0x10f   :  { %2987 = vmatprep.subr.bf16.mxu1 %v11990_v54 }
 0x111   :  { %2988 = vmatpush1.bf16.msra.mxu1 %v11988_v23  ;;  %v12038_v23 = vld [vmem:[%s16167_s2 + $0x7f8] ss:$12 sps:$4 sm:$0xff]  }
 0x112   :  { %9519 = vmatmul.mubr.msk.bf16.gmra.mrb[24].mxu0 %vm23_vm0, %v1566_v46  ;;  %v10770_v55 = vpop.f32.mrb[20].mxu1 }
 0x113   :  { %2006 = vmatprep.mubr.bf16.mxu0 %v12633_v1  ;;  %v10771_v56 = vpop.f32.mrb[21].mxu1 }
 0x114   :  { %v13389_v59 = vadd.f32 %v10771_v56, %v10770_v55  ;;  %v10773_v60 = vpop.f32.mrb[22].mxu1  ;;  %v11998_v55 = vld [vmem:[%s16167_s2 + $0x708] ss:$12 sps:$4 sm:$0xff]   ;;  %v12003_v56 = vld [vmem:[%s16167_s2 + $0x724] ss:$12 sps:$4 sm:$0xff]  }
 0x115   :  { %v670_v57 = vpop.f32.mrb[0].mxu0  ;;  %v10774_v62 = vpop.f32.mrb[23].mxu1 }
 0x116   :  { %v13391_v53 = vadd.f32 %v739_v35, %v670_v57  ;;  %v672_v61 = vpop.f32.mrb[1].mxu0  ;;  %v13395_v3 = vadd.f32 %v10774_v62, %v10773_v60  ;;  %v12001_v57 = vld [vmem:[%s16167_s2 + $0x720] ss:$12 sps:$4 sm:$0xff]   ;;  %v13468_v60 = vld [vmem:[%s16167_s2 + $0x848] ss:$12 sps:$4 sm:$0xff]  }
 0x117   :  { %v13393_v63 = vadd.f32 %v741_v36, %v672_v61  ;;  %v674_v0 = vpop.f32.mrb[2].mxu0  ;;  %v12006_v61 = vld [vmem:[%s16167_s2 + $0x73c] ss:$12 sps:$4 sm:$0xff]   ;;  %11336 = vmatprep.subr.bf16.mxu1 %v13468_v60 }
 0x118   :  { %v13397_v14 = vadd.f32 %v743_v37, %v674_v0  ;;  %v676_v4 = vpop.f32.mrb[3].mxu0  ;;  %v12004_v0 = vld [vmem:[%s16167_s2 + $0x738] ss:$12 sps:$4 sm:$0xff]  }
 0x119   :  { %v13399_v5 = vadd.f32 %v745_v41, %v676_v4 }
 0x11a   :  { %9520 = vmatmul.mubr.msk.bf16.gmra.mrb[40].mxu0 %vm23_vm0, %v13340_v27  ;;  %v10776_v6 = vpop.f32.mrb[24].mxu1 }
 0x11b   :  { %v10777_v8 = vpop.f32.mrb[25].mxu1 }
 0x11c   :  { %v10778_v10 = vadd.f32 %v10777_v8, %v10776_v6  ;;  %v10779_v11 = vpop.f32.mrb[26].mxu1 }
 0x11d   :  { %v680_v9 = vpop.f32.mrb[4].mxu0  ;;  %v10780_v17 = vpop.f32.mrb[27].mxu1 }
 0x11e   :  { %v13403_v12 = vadd.f32 %v749_v38, %v680_v9  ;;  %v682_v15 = vpop.f32.mrb[5].mxu0  ;;  %v10781_v20 = vadd.f32 %v10780_v17, %v10779_v11  ;;  %v12007_v17 = vld [vmem:[%s16167_s2 + $0x750] ss:$12 sps:$4 sm:$0xff]  }
 0x11f   :  { %v13405_v18 = vadd.f32 %v751_v39, %v682_v15  ;;  %v684_v19 = vpop.f32.mrb[6].mxu0 }
 0x120   :  { %v13407_v21 = vadd.f32 %v753_v42, %v684_v19  ;;  %v686_v22 = vpop.f32.mrb[7].mxu0 }
 0x121   :  { %v13409_v24 = vadd.f32 %v755_v43, %v686_v22 }
 0x122   :  { %v10782_v25 = vpop.f32.mrb[28].mxu1 }
 0x123   :  { %v10783_v26 = vpop.f32.mrb[29].mxu1 }
 0x124   :  { %v10785_v28 = vpop.f32.mrb[30].mxu1 }
 0x125   :  { %v690_v27 = vpop.f32.mrb[8].mxu0  ;;  %v10786_v46 = vpop.f32.mrb[31].mxu1 }
 0x126   :  { %v13411_v29 = vadd.f32 %v759_v44, %v690_v27  ;;  %v692_v30 = vpop.f32.mrb[9].mxu0  ;;  %v11987_v44 = vld [vmem:[%s16167_s2 + $0x6c4] ss:$12 sps:$4 sm:$0xff]  }
 0x127   :  { %v13413_v48 = vadd.f32 %v761_v58, %v692_v30  ;;  %v694_v2 = vpop.f32.mrb[10].mxu0  ;;  %2916 = vmatprep.subr.bf16.mxu0 %v11987_v44  ;;  %v12020_v44 = vld [vmem:[%s16167_s2 + $0x7b0] ss:$12 sps:$4 sm:$0xff]  }
 0x128   :  { %v13415_v32 = vadd.f32 %v763_v7, %v694_v2  ;;  %v696_v33 = vpop.f32.mrb[11].mxu0  ;;  %v11985_v7 = vld [vmem:[%s16167_s2 + $0x6c0] ss:$12 sps:$4 sm:$0xff]  }
 0x129   :  { %v13417_v34 = vadd.f32 %v765_v45, %v696_v33  ;;  %2917 = vmatpush1.bf16.msra.mxu0 %v11985_v7  ;;  %v11993_v45 = vld [vmem:[%s16167_s2 + $0x6dc] ss:$12 sps:$4 sm:$0xff]   ;;  %v12014_v2 = vld [vmem:[%s16167_s2 + $0x780] ss:$12 sps:$4 sm:$0xff]  }
 0x12a   :  { %2918 = vmatprep.subr.bf16.mxu0 %v11993_v45 }
 0x12d   :  { %v700_v13 = vpop.f32.mrb[12].mxu0  ;;  %2919 = vmatpush1.bf16.msra.mxu0 %v11991_v47  ;;  %v12028_v47 = vld [vmem:[%s16167_s2 + $0x7cc] ss:$12 sps:$4 sm:$0xff]  }
 0x12e   :  { %v701_v35 = vpop.f32.mrb[13].mxu0  ;;  %2920 = vmatprep.subr.bf16.mxu0 %v11996_v49  ;;  %v12019_v13 = vld [vmem:[%s16167_s2 + $0x79c] ss:$12 sps:$4 sm:$0xff]  }
 0x12f   :  { %v702_v36 = vpop.f32.mrb[14].mxu0 }
 0x130   :  { %v703_v37 = vpop.f32.mrb[15].mxu0 }
 0x131   :  { %2921 = vmatpush1.bf16.msra.mxu0 %v11994_v50  ;;  %v12026_v50 = vld [vmem:[%s16167_s2 + $0x7c8] ss:$12 sps:$4 sm:$0xff]  }
 0x132   :  { %v11310_v41 = vpop.f32.mrb[36].mxu1  ;;  %2922 = vmatprep.subr.bf16.mxu0 %v12000_v31  ;;  %v12040_v31 = vld [vmem:[%s16167_s2 + $0x7fc] ss:$12 sps:$4 sm:$0xff]  }
 0x133   :  { %v887_v38 = vpop.f32.mrb[37].mxu1 }
 0x134   :  { %v13419_v39 = vadd.f32 %v10778_v10, %v887_v38  ;;  %v11311_v42 = vpop.f32.mrb[38].mxu1  ;;  %v12009_v10 = vld [vmem:[%s16167_s2 + $0x754] ss:$12 sps:$4 sm:$0xff]  }
 0x135   :  { %v890_v43 = vpop.f32.mrb[39].mxu1  ;;  %2923 = vmatpush1.bf16.msra.mxu0 %v11998_v55 }
 0x136   :  { %v13424_v58 = vadd.f32 %v10781_v20, %v890_v43  ;;  %2924 = vmatprep.subr.bf16.mxu0 %v12003_v56  ;;  %v12013_v20 = vld [vmem:[%s16167_s2 + $0x76c] ss:$12 sps:$4 sm:$0xff]  }
 0x139   :  { %2925 = vmatpush1.bf16.msra.mxu0 %v12001_v57  ;;  %v12046_v57 = vld [vmem:[%s16167_s2 + $0x814] ss:$12 sps:$4 sm:$0xff]  }
 0x13a   :  { %2926 = vmatprep.subr.bf16.mxu0 %v12006_v61 }
 0x13d   :  { %2927 = vmatpush1.bf16.msra.mxu0 %v12004_v0 }
 0x13e   :  { %2928 = vmatprep.subr.bf16.mxu0 %v12009_v10 }
 0x141   :  { %2929 = vmatpush1.bf16.msra.mxu0 %v12007_v17 }
 0x142   :  { %2930 = vmatprep.subr.bf16.mxu0 %v12013_v20  ;;  %v12059_v20 = vld [vmem:[%s16167_s2 + $0x788] ss:$12 sps:$4 sm:$0xff]  }
 0x14a   :  { %v10810_v62 = vpop.f32.mrb[40].mxu1 }
 0x14b   :  { %v10811_v4 = vpop.f32.mrb[41].mxu1 }
 0x14c   :  { %v10812_v6 = vadd.f32 %v10811_v4, %v10810_v62  ;;  %v10813_v8 = vpop.f32.mrb[42].mxu1  ;;  %v12044_v62 = vld [vmem:[%s16167_s2 + $0x810] ss:$12 sps:$4 sm:$0xff]  }
 0x14d   :  { %v10814_v9 = vpop.f32.mrb[43].mxu1 }
 0x14e   :  { %v13481_v11 = vadd.f32 %v10812_v6, %v13383_v16  ;;  %v10815_v15 = vadd.f32 %v10814_v9, %v10813_v8  ;;  %v12011_v16 = vld [vmem:[%s16167_s2 + $0x768] ss:$12 sps:$4 sm:$0xff]   ;;  %v12052_v8 = vld [vmem:[%s16167_s2 + $0x82c] ss:$12 sps:$4 sm:$0xff]  }
 0x14f   :  { %2931 = vmatpush1.bf16.msra.mxu0 %v12011_v16  ;;  %v12050_v6 = vld [vmem:[%s16167_s2 + $0x828] ss:$12 sps:$4 sm:$0xff]  }
 0x150   :  { %v13487_v19 = vadd.f32 %v10815_v15, %v13385_v40  ;;  %v12016_v40 = vld [vmem:[%s16167_s2 + $0x784] ss:$12 sps:$4 sm:$0xff]  }
 0x151   :  { %2932 = vmatprep.subr.bf16.mxu0 %v12016_v40 }
 0x152   :  { %v10816_v22 = vpop.f32.mrb[44].mxu1 }
 0x153   :  { %v10817_v25 = vpop.f32.mrb[45].mxu1  ;;  %2933 = vmatpush1.bf16.msra.mxu0 %v12014_v2 }
 0x154   :  { %v10818_v26 = vadd.f32 %v10817_v25, %v10816_v22  ;;  %v10819_v27 = vpop.f32.mrb[46].mxu1  ;;  %2934 = vmatprep.subr.bf16.mxu0 %v12019_v13 }
 0x155   :  { %v10820_v28 = vpop.f32.mrb[47].mxu1 }
 0x156   :  { %v13499_v30 = vadd.f32 %v10818_v26, %v13389_v59  ;;  %v10821_v46 = vadd.f32 %v10820_v28, %v10819_v27  ;;  %v12017_v59 = vld [vmem:[%s16167_s2 + $0x798] ss:$12 sps:$4 sm:$0xff]  }
 0x157   :  { %2935 = vmatpush1.bf16.msra.mxu0 %v12017_v59 }
 0x158   :  { %v13505_v33 = vadd.f32 %v10821_v46, %v13395_v3  ;;  %v12022_v3 = vld [vmem:[%s16167_s2 + $0x7b4] ss:$12 sps:$4 sm:$0xff]  }
 0x159   :  { %2936 = vmatprep.subr.bf16.mxu0 %v12022_v3 }
 0x15a   :  { %v10822_v35 = vpop.f32.mrb[48].mxu1 }
 0x15b   :  { %v10823_v36 = vpop.f32.mrb[49].mxu1  ;;  %2937 = vmatpush1.bf16.msra.mxu0 %v12020_v44 }
 0x15c   :  { %v10824_v37 = vadd.f32 %v10823_v36, %v10822_v35  ;;  %v10825_v41 = vpop.f32.mrb[50].mxu1  ;;  %2938 = vmatprep.subr.bf16.mxu0 %v12028_v47 }
 0x15d   :  { %v10826_v38 = vpop.f32.mrb[51].mxu1 }
 0x15e   :  { %v10827_v42 = vadd.f32 %v10826_v38, %v10825_v41  ;;  %v1385_v43 = vadd.f32 %v10824_v37, %v13419_v39 }
 0x15f   :  { %2939 = vmatpush1.bf16.msra.mxu0 %v12026_v50 }
 0x160   :  { %v1388_v7 = vadd.f32 %v10827_v42, %v13424_v58  ;;  %v12032_v58 = vld [vmem:[%s16167_s2 + $0x7e0] ss:$12 sps:$4 sm:$0xff]   ;;  %2940 = vmatprep.subr.bf16.mxu0 %v12034_v52 }
 0x162   :  { %v10828_v45 = vpop.f32.mrb[52].mxu1 }
 0x163   :  { %v10829_v49 = vpop.f32.mrb[53].mxu1  ;;  %2941 = vmatpush1.bf16.msra.mxu0 %v12032_v58 }
 0x164   :  { %v10831_v51 = vpop.f32.mrb[54].mxu1  ;;  %2942 = vmatprep.subr.bf16.mxu0 %v12040_v31 }
 0x165   :  { %v10832_v39 = vpop.f32.mrb[55].mxu1 }
 0x167   :  { %2943 = vmatpush1.bf16.msra.mxu0 %v12038_v23 }
 0x168   :  { %2944 = vmatprep.subr.bf16.mxu0 %v12046_v57 }
 0x16b   :  { %2945 = vmatpush1.bf16.msra.mxu0 %v12044_v62 }
 0x16c   :  { %2946 = vmatprep.subr.bf16.mxu0 %v12052_v8 }
 0x16d   :  { %v1260_v54 = vpop.f32.mrb[28].mxu0 }
 0x16e   :  { %v1261_v55 = vpop.f32.mrb[29].mxu0 }
 0x16f   :  { %v1262_v56 = vpop.f32.mrb[30].mxu0  ;;  %2947 = vmatpush1.bf16.msra.mxu0 %v12050_v6 }
 0x170   :  { %v1263_v61 = vpop.f32.mrb[31].mxu0  ;;  %10886 = vmatprep.subr.bf16.mxu0 %v12059_v20 }
 0x172   :  { %v11322_v0 = vpop.f32.mrb[56].mxu1 }
 0x173   :  { %v1447_v4 = vpop.f32.mrb[57].mxu1 }
 0x174   :  { %v13551_v9 = vadd.f32 %v1447_v4, %v1385_v43  ;;  %v11323_v10 = vpop.f32.mrb[58].mxu1 }
 0x175   :  { %v1450_v15 = vpop.f32.mrb[59].mxu1 }
 0x176   :  { %v13553_v17 = vadd.f32 %v1450_v15, %v1388_v7 }
 0x18a   :  { %v10856_v22 = vpop.f32.mrb[60].mxu1 }
 0x18b   :  { %v10857_v16 = vpop.f32.mrb[61].mxu1 }
 0x18c   :  { %v10858_v25 = vadd.f32 %v10857_v16, %v10856_v22  ;;  %v10859_v26 = vpop.f32.mrb[62].mxu1 }
 0x18d   :  { %v1329_v27 = vpop.f32.mrb[32].mxu0  ;;  %v10860_v28 = vpop.f32.mrb[63].mxu1 }
 0x18e   :  { %v1330_v40 = vpop.f32.mrb[33].mxu0  ;;  %v10861_v46 = vadd.f32 %v10860_v28, %v10859_v26  ;;  %v11472_v2 = vadd.f32 %v13481_v11, %v10858_v25  ;;  %v2159_v11 = vlaneseq }
 0x18f   :  { %v1331_v13 = vpop.f32.mrb[34].mxu0 }
 0x190   :  { %v1332_v35 = vpop.f32.mrb[35].mxu0  ;;  %v11478_v59 = vadd.f32 %v13487_v19, %v10861_v46  ;;  %v13562_v39 = vshrl.u32 %v2159_v11, 7 }
 0x192   :  { %v10862_v36 = vpop.f32.mrb[64].mxu1  ;;  %v13565_v23 = vsub.s32 2, %v13562_v39 }
 0x193   :  { %v10863_v37 = vpop.f32.mrb[65].mxu1 }
 0x194   :  { %v10864_v41 = vadd.f32 %v10863_v37, %v10862_v36  ;;  %v10865_v38 = vpop.f32.mrb[66].mxu1 }
 0x195   :  { %v10866_v3 = vpop.f32.mrb[67].mxu1 }
 0x196   :  { %v10867_v42 = vadd.f32 %v10866_v3, %v10865_v38  ;;  %v11469_v43 = vadd.f32 %v13499_v30, %v10864_v41  ;;  %v13570_v30 = vld [vmem:[%s16169_s3] sm:$0x7] }
 0x197   :  { %v2170_v54 = vrot.slane %v13570_v30, %v13565_v23 }
 0x198   :  { %v11475_v44 = vadd.f32 %v13505_v33, %v10867_v42  ;;  %v13575_v33 = vld [vmem:[%s16170_s4] sm:$0x7] }
 0x199   :  { %v2223_v57 = vrot.slane %v13575_v33, %v13565_v23 }
 0x19a   :  { %v10868_v7 = vpop.f32.mrb[68].mxu1 }
 0x19b   :  { %v10869_v45 = vpop.f32.mrb[69].mxu1 }
 0x19c   :  { %v10870_v47 = vadd.f32 %v10869_v45, %v10868_v7  ;;  %v10871_v49 = vpop.f32.mrb[70].mxu1 }
 0x19d   :  { %v10872_v50 = vpop.f32.mrb[71].mxu1 }
 0x19e   :  { %v10873_v51 = vadd.f32 %v10872_v50, %v10871_v49 }
 0x1a2   :  { %v10874_v19 = vpop.f32.mrb[72].mxu1 }
 0x1a3   :  { %v10875_v52 = vpop.f32.mrb[73].mxu1 }
 0x1a4   :  { %v10877_v58 = vpop.f32.mrb[74].mxu1  ;;  %v2338_v52 = vld [vmem:[#allocation2 + $0x10] sm:$0xff] }
 0x1a5   :  { %v10878_v31 = vpop.f32.mrb[75].mxu1  ;;  %v2347_v58 = vld [vmem:[#allocation2 + $0x58] sm:$0xff] }
 0x1aa   :  { %v11330_v55 = vpop.f32.mrb[32].mxu1 }
 0x1ab   :  { %v11470_v56 = vadd.f32 %v11469_v43, %v11330_v55  ;;  %v2110_v61 = vpop.f32.mrb[33].mxu1 }
 0x1ac   :  { %v11473_v62 = vadd.f32 %v11472_v2, %v2110_v61  ;;  %v11331_v0 = vpop.f32.mrb[34].mxu1 }
 0x1ad   :  { %v2182_v4 = vadd.f32 %v11470_v56, %v2170_v54  ;;  %v11476_v6 = vadd.f32 %v11475_v44, %v11331_v0  ;;  %v2113_v8 = vpop.f32.mrb[35].mxu1 }
 0x1ae   :  { %v2176_v10 = vadd.f32 %v11473_v62, %v2170_v54  ;;  %v11479_v15 = vadd.f32 %v11478_v59, %v2113_v8 }
 0x1af   :  { %vm2200_vm3 = vcmp.gt.f32.partialorder %v2182_v4, 0.0  ;;  %v2235_v20 = vmul.f32 %v2223_v57, %v2182_v4  ;;  %v2185_v25 = vadd.f32 %v11476_v6, %v2170_v54 }
 0x1b0   :  { %vm2194_vm4 = vcmp.gt.f32.partialorder %v2176_v10, 0.0  ;;  %v2229_v22 = vmul.f32 %v2223_v57, %v2176_v10  ;;  %v2179_v16 = vadd.f32 %v11479_v15, %v2170_v54 }
 0x1b1   :  { %v2253_v26 = vsel %vm2200_vm3, %v2182_v4, %v2235_v20  ;;  %v2238_v38 = vmul.f32 %v2223_v57, %v2185_v25  ;;  %vm2203_vm7 = vcmp.gt.f32.partialorder %v2185_v25, 0.0  ;;  %v12010_v20 = vld [vmem:[%s16167_s2 + $0x860] ss:$12 sps:$4 sm:$0xff]  }
 0x1b2   :  { %v2247_v27 = vsel %vm2194_vm4, %v2176_v10, %v2229_v22  ;;  %vm2197_vm5 = vcmp.gt.f32.partialorder %v2179_v16, 0.0  ;;  %v2232_v28 = vmul.f32 %v2223_v57, %v2179_v16  ;;  %v11334_v40 = vpop.f32.mrb[76].mxu1  ;;  %v2286_v36 = vrot.slane %v2253_v26, 7 }
 0x1b3   :  { %v2126_v46 = vpop.f32.mrb[77].mxu1  ;;  %v2279_v37 = vrot.slane %v2247_v27, 7  ;;  %v2356_v27 = vld [vmem:[#allocation2 + $0xa0] sm:$0xff] }
 0x1b4   :  { %v2250_v13 = vsel %vm2197_vm5, %v2179_v16, %v2232_v28  ;;  %v2127_v2 = vadd.f32 %v10870_v47, %v2126_v46  ;;  %v11335_v35 = vpop.f32.mrb[78].mxu1  ;;  %v2256_v47 = vsel %vm2203_vm7, %v2185_v25, %v2238_v38  ;;  %v12025_v28 = vld [vmem:[%s16167_s2 + $0x514] ss:$12 sps:$4 sm:$0xff]  }
 0x1b5   :  { %v2280_v41 = vrot.slane %v2250_v13, 7  ;;  %v2129_v59 = vpop.f32.mrb[79].mxu1 }
 0x1b6   :  { %v2153_v3 = vadd.f32 %v2127_v2, %v13551_v9  ;;  %v2130_v42 = vadd.f32 %v10873_v51, %v2129_v59  ;;  %v2315_v51 = vrot.slane %v2256_v47, 7  ;;  %v13618_v59 = vsub.s32 0, %v13562_v39 }
 0x1b7   :  { %v2281_v43 = vsel %vm2272_vm6, %v2279_v37, %v2280_v41  ;;  %v2287_v44 = vsel %vm2272_vm6, %v2280_v41, %v2286_v36  ;;  %v13615_v37 = vpack.c.bf16 %v2356_v27, %v2356_v27 }
 0x1b8   :  { %2296 = vst.msk [vmem:[#allocation2 + $0x28] sm:$0xff] %vm23_vm0, %v2281_v43  ;;  %2299 = vst.msk [vmem:[#allocation2 + $0x40] sm:$0xff] %vm23_vm0, %v2287_v44  ;;  %v2188_v7 = vadd.f32 %v2170_v54, %v2153_v3  ;;  %v2156_v45 = vadd.f32 %v2130_v42, %v13553_v17  ;;  %v13625_v42 = vsub.s32 1, %v13562_v39  ;;  %v13633_v44 = vrot.slane %v13570_v30, %v13618_v59 }
 0x1b9   :  { %v2595_v3 = vshll.u32 %v13615_v37, 16 }
 0x1ba   :  { %vm2206_vm8 = vcmp.gt.f32.partialorder %v2188_v7, 0.0  ;;  %v2241_v49 = vmul.f32 %v2223_v57, %v2188_v7  ;;  %v2191_v50 = vadd.f32 %v2170_v54, %v2156_v45 }
 0x1bb   :  { %v2597_v45 = vrot.slane %v2595_v3, 1 }
 0x1bc   :  { %v2259_v11 = vsel %vm2206_vm8, %v2188_v7, %v2241_v49  ;;  %vm2209_vm9 = vcmp.gt.f32.partialorder %v2191_v50, 0.0  ;;  %v2244_v9 = vmul.f32 %v2223_v57, %v2191_v50  ;;  %v13637_v49 = vrot.slane %v13570_v30, %v13625_v42 }
 0x1bd   :  { %v2316_v19 = vrot.slane %v2259_v11, 7 }
 0x1be   :  { %v2262_v31 = vsel %vm2209_vm9, %v2191_v50, %v2244_v9  ;;  %v13642_v50 = vrot.slane %v13575_v33, %v13618_v59 }
 0x1bf   :  { %v2317_v55 = vsel %vm2272_vm6, %v2315_v51, %v2316_v19  ;;  %v2322_v56 = vrot.slane %v2262_v31, 7  ;;  %v2341_v61 = vld [vmem:[#allocation2 + $0x28] sm:$0xff]  ;;  %v2344_v62 = vld [vmem:[#allocation2 + $0x40] sm:$0xff]  ;;  %v13647_v51 = vrot.slane %v13575_v33, %v13625_v42 }
 0x1c0   :  { %2332 = vst.msk [vmem:[#allocation2 + $0x70] sm:$0xff] %vm23_vm0, %v2317_v55  ;;  %v13589_v17 = vpack.c.bf16 %v2341_v61, %v2338_v52  ;;  %v13591_v0 = vpack.c.bf16 %v2347_v58, %v2344_v62 }
 0x1c1   :  { %v2323_v54 = vsel %vm2272_vm6, %v2316_v19, %v2322_v56  ;;  %v2605_v56 = vshrl.u32 %v13615_v37, 16 }
 0x1c2   :  { %2335 = vst.msk [vmem:[#allocation2 + $0x88] sm:$0xff] %vm23_vm0, %v2323_v54  ;;  %v2542_v57 = vshll.u32 %v13589_v17, 16  ;;  %v2547_v4 = vshll.u32 %v13591_v0, 16  ;;  %v2540_v6 = vshrl.u32 %v13589_v17, 16  ;;  %v2567_v40 = vshrl.u32 %v13591_v0, 16 }
 0x1c4   :  { %v2544_v8 = vrot.slane %v2542_v57, 1  ;;  %v2549_v15 = vrot.slane %v2547_v4, 1 }
 0x1c6   :  { %v2545_v10 = vor.u32 %v2544_v8, %v2540_v6  ;;  %v2569_v35 = vor.u32 %v2567_v40, %v2549_v15  ;;  %v13666_v8 = vor.u32 %v2605_v56, %v2597_v45 }
 0x1c7   :  { %v2350_v16 = vld [vmem:[#allocation2 + $0x70] sm:$0xff] }
 0x1c8   :  { %v13602_v22 = vsel %vm234_vm1, %v2545_v10, %v2549_v15 }
 0x1c9   :  { %9723 = vmatmul.mubr.msk.bf16.vlgmr.msra.gmra.mrb[80].mxu1 %vm23_vm0, %v13602_v22  ;;  %v2353_v25 = vld [vmem:[#allocation2 + $0x88] sm:$0xff] }
 0x1ca   :  { %11337 = vmatpush3.bf16.msra.mxu1 %v13468_v60  ;;  %3027 = vmatprep.mubr.bf16.mxu1 %v12633_v1  ;;  %v13608_v26 = vpack.c.bf16 %v2353_v25, %v2350_v16 }
 0x1cb   :  { %11338 = vmatprep.subr.bf16.mxu1 %v12010_v20 }
 0x1cc   :  { %v2571_v46 = vshll.u32 %v13608_v26, 16  ;;  %v2591_v43 = vshrl.u32 %v13608_v26, 16 }
 0x1cd   :  { %v1939_v13 = vpop.f32.mrb[36].mxu0 }
 0x1ce   :  { %v1940_v2 = vpop.f32.mrb[37].mxu0  ;;  %v2573_v36 = vrot.slane %v2571_v46, 1  ;;  %11339 = vmatpush3.bf16.msra.mxu1 %v12010_v20 }
 0x1cf   :  { %v1941_v60 = vpop.f32.mrb[38].mxu0  ;;  %3476 = vmatprep.subr.bf16.mxu1 %v12025_v28 }
 0x1d0   :  { %v1942_v41 = vpop.f32.mrb[39].mxu0  ;;  %v13621_v38 = vsel %vm234_vm1, %v2569_v35, %v2573_v36  ;;  %v2593_v7 = vor.u32 %v2591_v43, %v2573_v36 }
 0x1d1   :  { %9724 = vmatmul.mubr.msk.bf16.gmra.mrb[84].mxu1 %vm23_vm0, %v13621_v38 }
 0x1d2   :  { %3037 = vmatprep.mubr.bf16.mxu1 %v12633_v1  ;;  %v13652_v31 = vsel %vm234_vm1, %v2593_v7, %v2597_v45  ;;  %v13684_v7 = vld [vmem:[#allocation2] sm:$0xff] }
 0x1d5   :  { %v1978_v47 = vpop.f32.mrb[16].mxu0 }
 0x1d6   :  { %v11445_v39 = vadd.f32 %v1978_v47, %v13391_v53  ;;  %v1980_v11 = vpop.f32.mrb[17].mxu0 }
 0x1d7   :  { %v11447_v9 = vadd.f32 %v1980_v11, %v13393_v63  ;;  %v1982_v19 = vpop.f32.mrb[18].mxu0 }
 0x1d8   :  { %v2174_v52 = vadd.f32 %v11445_v39, %v13633_v44  ;;  %v11449_v58 = vadd.f32 %v1982_v19, %v13397_v14  ;;  %v1984_v30 = vpop.f32.mrb[19].mxu0 }
 0x1d9   :  { %v2175_v53 = vadd.f32 %v11447_v9, %v13637_v49  ;;  %v11451_v55 = vadd.f32 %v1984_v30, %v13399_v5  ;;  %9725 = vmatmul.mubr.msk.bf16.gmra.mrb[88].mxu1 %vm23_vm0, %v13652_v31 }
 0x1da   :  { %vm2192_vm10 = vcmp.gt.f32.partialorder %v2174_v52, 0.0  ;;  %v2227_v63 = vmul.f32 %v13642_v50, %v2174_v52  ;;  %v2177_v33 = vadd.f32 %v11449_v58, %v13633_v44  ;;  %3047 = vmatprep.mubr.bf16.mxu1 %v12633_v1 }
 0x1db   :  { %vm2193_vm11 = vcmp.gt.f32.partialorder %v2175_v53, 0.0  ;;  %v2228_v14 = vmul.f32 %v13647_v51, %v2175_v53  ;;  %v2178_v61 = vadd.f32 %v11451_v55, %v13637_v49 }
 0x1dc   :  { %v2245_v62 = vsel %vm2192_vm10, %v2174_v52, %v2227_v63  ;;  %vm2195_vm12 = vcmp.gt.f32.partialorder %v2177_v33, 0.0  ;;  %v2230_v5 = vmul.f32 %v13642_v50, %v2177_v33 }
 0x1dd   :  { %v2246_v54 = vsel %vm2193_vm11, %v2175_v53, %v2228_v14  ;;  %vm2196_vm13 = vcmp.gt.f32.partialorder %v2178_v61, 0.0  ;;  %v2231_v57 = vmul.f32 %v13647_v51, %v2178_v61  ;;  %v1988_v4 = vpop.f32.mrb[20].mxu0  ;;  %v2273_v20 = vrot.slane %v2245_v62, 7  ;;  %v12023_v14 = vld [vmem:[%s16167_s2 + $0x510] ss:$12 sps:$4 sm:$0xff]  }
 0x1de   :  { %v2248_v6 = vsel %vm2195_vm12, %v2177_v33, %v2230_v5  ;;  %v11453_v10 = vadd.f32 %v1988_v4, %v13403_v12  ;;  %v1990_v15 = vpop.f32.mrb[21].mxu0  ;;  %v2276_v40 = vrot.slane %v2246_v54, 7 }
 0x1df   :  { %v2274_v16 = vrot.slane %v2248_v6, 7  ;;  %v2249_v25 = vsel %vm2196_vm13, %v2178_v61, %v2231_v57  ;;  %v11455_v27 = vadd.f32 %v1990_v15, %v13405_v18  ;;  %v1992_v28 = vpop.f32.mrb[22].mxu0 }
 0x1e0   :  { %v2277_v46 = vrot.slane %v2249_v25, 7  ;;  %v2180_v13 = vadd.f32 %v11453_v10, %v13633_v44  ;;  %v11457_v2 = vadd.f32 %v1992_v28, %v13407_v21  ;;  %v1994_v35 = vpop.f32.mrb[23].mxu0 }
 0x1e1   :  { %v2275_v36 = vsel %vm2272_vm6, %v2273_v20, %v2274_v16  ;;  %v2181_v60 = vadd.f32 %v11455_v27, %v13637_v49  ;;  %v11459_v12 = vadd.f32 %v1994_v35, %v13409_v24  ;;  %9726 = vmatmul.mubr.msk.bf16.gmra.mrb[92].mxu1 %vm23_vm0, %v13666_v8 }
 0x1e2   :  { %v2278_v41 = vsel %vm2272_vm6, %v2276_v40, %v2277_v46  ;;  %vm2198_vm14 = vcmp.gt.f32.partialorder %v2180_v13, 0.0  ;;  %v2233_v18 = vmul.f32 %v13642_v50, %v2180_v13  ;;  %v2183_v3 = vadd.f32 %v11457_v2, %v13633_v44  ;;  %11340 = vmatprep.mubr.msk.bf16.mxu1 %vm23_vm0, %v13602_v22 }
 0x1e3   :  { %vm2199_vm15 = vcmp.gt.f32.partialorder %v2181_v60, 0.0  ;;  %v2234_v21 = vmul.f32 %v13647_v51, %v2181_v60  ;;  %v2184_v43 = vadd.f32 %v11459_v12, %v13637_v49  ;;  %v13687_v24 = vpack.c.bf16 %v2278_v41, %v13684_v7 }
 0x1e4   :  { %v2251_v45 = vsel %vm2198_vm14, %v2180_v13, %v2233_v18  ;;  %vm2201_vm3 = vcmp.gt.f32.partialorder %v2183_v3, 0.0  ;;  %v2236_v47 = vmul.f32 %v13642_v50, %v2183_v3  ;;  %v13691_v39 = vpack.c.bf16 %v2275_v36, %v13684_v7 }
 0x1e5   :  { %v2282_v11 = vrot.slane %v2251_v45, 7  ;;  %v2252_v9 = vsel %vm2199_vm15, %v2181_v60, %v2234_v21  ;;  %vm2202_vm4 = vcmp.gt.f32.partialorder %v2184_v43, 0.0  ;;  %v2237_v22 = vmul.f32 %v13647_v51, %v2184_v43  ;;  %v1998_v19 = vpop.f32.mrb[24].mxu0 }
 0x1e6   :  { %v2284_v52 = vrot.slane %v2252_v9, 7  ;;  %v2254_v58 = vsel %vm2201_vm3, %v2183_v3, %v2236_v47  ;;  %v11461_v30 = vadd.f32 %v1998_v19, %v13411_v29  ;;  %v2000_v53 = vpop.f32.mrb[25].mxu0  ;;  %v2528_v55 = vshrl.u32 %v13687_v24, 16  ;;  %v12031_v29 = vld [vmem:[%s16167_s2 + $0x52c] ss:$12 sps:$4 sm:$0xff]  }
 0x1e7   :  { %v2283_v63 = vsel %vm2272_vm6, %v2274_v16, %v2282_v11  ;;  %v2309_v33 = vrot.slane %v2254_v58, 7  ;;  %v2255_v56 = vsel %vm2202_vm4, %v2184_v43, %v2237_v22  ;;  %v11463_v61 = vadd.f32 %v2000_v53, %v13413_v48  ;;  %v2002_v62 = vpop.f32.mrb[26].mxu0  ;;  %v12035_v43 = vld [vmem:[%s16167_s2 + $0x540] ss:$12 sps:$4 sm:$0xff]  }
 0x1e8   :  { %v2285_v5 = vsel %vm2272_vm6, %v2277_v46, %v2284_v52  ;;  %v2312_v54 = vrot.slane %v2255_v56, 7  ;;  %v2186_v57 = vadd.f32 %v11461_v30, %v13633_v44  ;;  %v11465_v4 = vadd.f32 %v2002_v62, %v13415_v32  ;;  %v2004_v6 = vpop.f32.mrb[27].mxu0  ;;  %v12037_v46 = vld [vmem:[%s16167_s2 + $0x544] ss:$12 sps:$4 sm:$0xff]  }
 0x1e9   :  { %v2187_v10 = vadd.f32 %v11463_v61, %v13637_v49  ;;  %v11467_v15 = vadd.f32 %v2004_v6, %v13417_v34  ;;  %v13710_v20 = vpack.c.bf16 %v13684_v7, %v2285_v5  ;;  %v2530_v48 = vshll.u32 %v13687_v24, 16  ;;  %11341 = vmatmul.mubr.msk.bf16.vlgmr.msra.gmra.mrb[96].mxu1 %vm23_vm0, %v13621_v38  ;;  %v12029_v34 = vld [vmem:[%s16167_s2 + $0x528] ss:$12 sps:$4 sm:$0xff]  }
 0x1ea   :  { %vm2204_vm5 = vcmp.gt.f32.partialorder %v2186_v57, 0.0  ;;  %v2239_v16 = vmul.f32 %v13642_v50, %v2186_v57  ;;  %v2189_v25 = vadd.f32 %v11465_v4, %v13633_v44  ;;  %v13718_v32 = vpack.c.bf16 %v13684_v7, %v2283_v63  ;;  %3477 = vmatpush1.bf16.msra.mxu1 %v12023_v14  ;;  %11344 = vmatprep.mubr.msk.bf16.mxu1 %vm23_vm0, %v13652_v31  ;;  %v12060_v5 = vld [vmem:[%s16167_s2 + $0x6c8] ss:$12 sps:$4 sm:$0xff]  }
 0x1eb   :  { %vm2205_vm7 = vcmp.gt.f32.partialorder %v2187_v10, 0.0  ;;  %v2240_v27 = vmul.f32 %v13647_v51, %v2187_v10  ;;  %v2190_v38 = vadd.f32 %v11467_v15, %v13637_v49  ;;  %v2532_v28 = vrot.slane %v2530_v48, 1  ;;  %3478 = vmatprep.subr.bf16.mxu1 %v12031_v29 }
 0x1ec   :  { %v2257_v40 = vsel %vm2204_vm5, %v2186_v57, %v2239_v16  ;;  %vm2207_vm8 = vcmp.gt.f32.partialorder %v2189_v25, 0.0  ;;  %v2242_v44 = vmul.f32 %v13642_v50, %v2189_v25  ;;  %v2535_v31 = vshll.u32 %v13710_v20, 16 }
 0x1ed   :  { %v2310_v13 = vrot.slane %v2257_v40, 7  ;;  %v2258_v2 = vsel %vm2205_vm7, %v2187_v10, %v2240_v27  ;;  %vm2208_vm9 = vcmp.gt.f32.partialorder %v2190_v38, 0.0  ;;  %v2243_v35 = vmul.f32 %v13647_v51, %v2190_v38  ;;  %v2008_v36 = vpop.f32.mrb[40].mxu0  ;;  %v12043_v51 = vld [vmem:[%s16167_s2 + $0x55c] ss:$12 sps:$4 sm:$0xff]  }
 0x1ee   :  { %v2313_v60 = vrot.slane %v2258_v2, 7  ;;  %v2260_v49 = vsel %vm2207_vm8, %v2189_v25, %v2242_v44  ;;  %v2533_v12 = vor.u32 %v2532_v28, %v2528_v55  ;;  %v2537_v41 = vrot.slane %v2535_v31, 1  ;;  %v2009_v18 = vpop.f32.mrb[41].mxu0  ;;  %3479 = vmatpush1.bf16.msra.mxu1 %v12029_v34  ;;  %v12047_v10 = vld [vmem:[%s16167_s2 + $0x570] ss:$12 sps:$4 sm:$0xff]  }
 0x1ef   :  { %v2311_v3 = vsel %vm2272_vm6, %v2309_v33, %v2310_v13  ;;  %v2318_v50 = vrot.slane %v2260_v49, 7  ;;  %v2261_v21 = vsel %vm2208_vm9, %v2190_v38, %v2243_v35  ;;  %3480 = vmatprep.subr.bf16.mxu1 %v12037_v46  ;;  %v2518_v9 = vshll.u32 %v13691_v39, 16  ;;  %v2010_v22 = vpop.f32.mrb[42].mxu0  ;;  %v12041_v33 = vld [vmem:[%s16167_s2 + $0x558] ss:$12 sps:$4 sm:$0xff]  }
 0x1f0   :  { %v2314_v45 = vsel %vm2272_vm6, %v2312_v54, %v2313_v60  ;;  %v2320_v47 = vrot.slane %v2261_v21, 7  ;;  %v13742_v11 = vsel %vm234_vm1, %v2533_v12, %v2537_v41  ;;  %v2523_v52 = vshll.u32 %v13718_v32, 16  ;;  %v2011_v58 = vpop.f32.mrb[43].mxu0  ;;  %v12064_v54 = vld [vmem:[%s16167_s2 + $0x7a0] ss:$12 sps:$4 sm:$0xff]  }
 0x1f1   :  { %v2319_v19 = vsel %vm2272_vm6, %v2310_v13, %v2318_v50  ;;  %2948 = vmatprep.mubr.bf16.mxu0 %v13742_v11  ;;  %11345 = vmatmul.mubr.msk.bf16.gmra.mrb[100].mxu1 %vm23_vm0, %v13666_v8  ;;  %v2516_v53 = vshrl.u32 %v13691_v39, 16  ;;  %v2520_v55 = vrot.slane %v2518_v9, 1  ;;  %v13762_v61 = vpack.c.bf16 %v13684_v7, %v13684_v7  ;;  %v12049_v8 = vld [vmem:[%s16167_s2 + $0x574] ss:$12 sps:$4 sm:$0xff]   ;;  %v12055_v25 = vld [vmem:[%s16167_s2 + $0x58c] ss:$12 sps:$4 sm:$0xff]  }
 0x1f2   :  { %v2321_v30 = vsel %vm2272_vm6, %v2313_v60, %v2320_v47  ;;  %v13752_v63 = vpack.c.bf16 %v2319_v19, %v2311_v3  ;;  %3481 = vmatpush1.bf16.msra.mxu1 %v12035_v43  ;;  %3508 = vmatprep.mubr.bf16.mxu1 %v13687_v24  ;;  %v2525_v56 = vrot.slane %v2523_v52, 1  ;;  %v2559_v57 = vshrl.u32 %v13710_v20, 16  ;;  %v12065_v34 = vld [vmem:[%s16167_s2 + $0x6e0] ss:$12 sps:$4 sm:$0xff]   ;;  %v12069_v38 = vld [vmem:[%s16167_s2 + $0x7b8] ss:$12 sps:$4 sm:$0xff]  }
 0x1f3   :  { %v13758_v14 = vpack.c.bf16 %v2321_v30, %v2314_v45  ;;  %3482 = vmatprep.subr.bf16.mxu1 %v12043_v51  ;;  %v2521_v62 = vor.u32 %v2520_v55, %v2516_v53  ;;  %v2587_v7 = vshll.u32 %v13762_v61, 16  ;;  %v2551_v44 = vshrl.u32 %v13718_v32, 16  ;;  %v12053_v31 = vld [vmem:[%s16167_s2 + $0x588] ss:$12 sps:$4 sm:$0xff]   ;;  %v12058_v13 = vld [vmem:[%s16167_s2 + $0x5a4] ss:$12 sps:$4 sm:$0xff]  }
 0x1f4   :  { %v2555_v6 = vshll.u32 %v13752_v63, 16  ;;  %v2561_v15 = vor.u32 %v2559_v57, %v2537_v41  ;;  %v12070_v36 = vld [vmem:[%s16167_s2 + $0x6f8] ss:$12 sps:$4 sm:$0xff]   ;;  %v12074_v49 = vld [vmem:[%s16167_s2 + $0x7d0] ss:$12 sps:$4 sm:$0xff]   ;;  %v2575_v18 = vshrl.u32 %v13752_v63, 16 }
 0x1f5   :  { %v2563_v29 = vshll.u32 %v13758_v14, 16  ;;  %v13777_v4 = vsel %vm234_vm1, %v2521_v62, %v2525_v56  ;;  %v2583_v16 = vshrl.u32 %v13758_v14, 16  ;;  %v2589_v40 = vrot.slane %v2587_v7, 1  ;;  %v12056_v12 = vld [vmem:[%s16167_s2 + $0x5a0] ss:$12 sps:$4 sm:$0xff]  }
 0x1f6   :  { %3483 = vmatpush1.bf16.msra.mxu1 %v12041_v33  ;;  %2949 = vmatmul.mubr.bf16.vlgmr.msra.gmra.mrb[44].mxu0 %v13777_v4  ;;  %v2557_v46 = vrot.slane %v2555_v6, 1  ;;  %v2553_v2 = vor.u32 %v2551_v44, %v2525_v56  ;;  %v12063_v41 = vld [vmem:[%s16167_s2 + $0x5bc] ss:$12 sps:$4 sm:$0xff]   ;;  %v2602_v3 = vshrl.u32 %v13762_v61, 16  ;;  %v12061_v45 = vld [vmem:[%s16167_s2 + $0x5b8] ss:$12 sps:$4 sm:$0xff]  }
 0x1f7   :  { %v2565_v48 = vrot.slane %v2563_v29, 1  ;;  %3484 = vmatprep.subr.bf16.mxu1 %v12049_v8  ;;  %10887 = vmatpush3.bf16.msra.mxu0 %v12060_v5  ;;  %v12075_v50 = vld [vmem:[%s16167_s2 + $0x710] ss:$12 sps:$4 sm:$0xff]   ;;  %v12079_v43 = vld [vmem:[%s16167_s2 + $0x7e8] ss:$12 sps:$4 sm:$0xff]  }
 0x1f8   :  { %10888 = vmatprep.subr.bf16.mxu0 %v12064_v54  ;;  %v13812_v60 = vsel %vm234_vm1, %v2553_v2, %v2557_v46  ;;  %v2577_v21 = vor.u32 %v2575_v18, %v2557_v46  ;;  %v12068_v47 = vld [vmem:[%s16167_s2 + $0x5d4] ss:$12 sps:$4 sm:$0xff]   ;;  %v13839_v51 = vor.u32 %v2602_v3, %v2589_v40  ;;  %v12066_v52 = vld [vmem:[%s16167_s2 + $0x5d0] ss:$12 sps:$4 sm:$0xff]   ;;  %v12073_v58 = vld [vmem:[%s16167_s2 + $0x5ec] ss:$12 sps:$4 sm:$0xff]  }
 0x1f9   :  { %v13792_v27 = vsel %vm234_vm1, %v2561_v15, %v2565_v48  ;;  %v2585_v28 = vor.u32 %v2583_v16, %v2565_v48  ;;  %v12080_v9 = vld [vmem:[%s16167_s2 + $0x728] ss:$12 sps:$4 sm:$0xff]   ;;  %v12084_v19 = vld [vmem:[%s16167_s2 + $0x800] ss:$12 sps:$4 sm:$0xff]   ;;  %v12089_v53 = vld [vmem:[%s16167_s2 + $0x818] ss:$12 sps:$4 sm:$0xff]  }
 0x1fa   :  { %2958 = vmatprep.mubr.bf16.mxu0 %v13792_v27  ;;  %3485 = vmatpush1.bf16.msra.mxu1 %v12047_v10  ;;  %v13845_v22 = vsel %vm234_vm1, %v2577_v21, %v2589_v40  ;;  %v12085_v30 = vld [vmem:[%s16167_s2 + $0x740] ss:$12 sps:$4 sm:$0xff]   ;;  %v12071_v55 = vld [vmem:[%s16167_s2 + $0x5e8] ss:$12 sps:$4 sm:$0xff]   ;;  %v12078_v33 = vld [vmem:[%s16167_s2 + $0x604] ss:$12 sps:$4 sm:$0xff]  }
 0x1fb   :  { %3486 = vmatprep.subr.bf16.mxu1 %v12055_v25  ;;  %10889 = vmatpush3.bf16.msra.mxu0 %v12065_v34  ;;  %v13806_v35 = vsel %vm234_vm1, %v2585_v28, %v2589_v40  ;;  %v12090_v56 = vld [vmem:[%s16167_s2 + $0x758] ss:$12 sps:$4 sm:$0xff]   ;;  %v12094_v8 = vld [vmem:[%s16167_s2 + $0x830] ss:$12 sps:$4 sm:$0xff]   ;;  %v12076_v62 = vld [vmem:[%s16167_s2 + $0x600] ss:$12 sps:$4 sm:$0xff]  }
 0x1fc   :  { %10890 = vmatprep.subr.bf16.mxu0 %v12069_v38  ;;  %v12083_v5 = vld [vmem:[%s16167_s2 + $0x61c] ss:$12 sps:$4 sm:$0xff]   ;;  %v12099_v57 = vld [vmem:[%s16167_s2 + $0x5d8] ss:$12 sps:$4 sm:$0xff]   ;;  %v12096_v38 = vld [vmem:[%s16167_s2 + $0x660] ss:$12 sps:$4 sm:$0xff]  }
 0x1fd   :  { %v12095_v54 = vld [vmem:[%s16167_s2 + $0x770] ss:$12 sps:$4 sm:$0xff]   ;;  %v12081_v29 = vld [vmem:[%s16167_s2 + $0x618] ss:$12 sps:$4 sm:$0xff]   ;;  %v12109_v16 = vld [vmem:[%s16167_s2 + $0x608] ss:$12 sps:$4 sm:$0xff]  }
 0x1fe   :  { %3487 = vmatpush1.bf16.msra.mxu1 %v12053_v31  ;;  %2959 = vmatmul.mubr.bf16.gmra.mrb[48].mxu0 %v13812_v60  ;;  %v12100_v7 = vld [vmem:[%s16167_s2 + $0x518] ss:$12 sps:$4 sm:$0xff]   ;;  %v12104_v6 = vld [vmem:[%s16167_s2 + $0x5f0] ss:$12 sps:$4 sm:$0xff]   ;;  %v12091_v25 = vld [vmem:[%s16167_s2 + $0x648] ss:$12 sps:$4 sm:$0xff]  }
 0x1ff   :  { %3488 = vmatprep.subr.bf16.mxu1 %v12058_v13  ;;  %2968 = vmatprep.mubr.bf16.mxu0 %v13806_v35  ;;  %v12086_v10 = vld [vmem:[%s16167_s2 + $0x630] ss:$12 sps:$4 sm:$0xff]   ;;  %v12093_v15 = vld [vmem:[%s16167_s2 + $0x64c] ss:$12 sps:$4 sm:$0xff]   ;;  %v12110_v34 = vld [vmem:[%s16167_s2 + $0x548] ss:$12 sps:$4 sm:$0xff]  }
 0x200   :  { %10891 = vmatpush3.bf16.msra.mxu0 %v12070_v36  ;;  %v12105_v48 = vld [vmem:[%s16167_s2 + $0x530] ss:$12 sps:$4 sm:$0xff]   ;;  %v12112_v40 = vld [vmem:[%s16167_s2 + $0x560] ss:$12 sps:$4 sm:$0xff]   ;;  %v12113_v44 = vld [vmem:[%s16167_s2 + $0x638] ss:$12 sps:$4 sm:$0xff]  }
 0x201   :  { %10892 = vmatprep.subr.bf16.mxu0 %v12074_v49  ;;  %v12103_v28 = vld [vmem:[%s16167_s2 + $0x67c] ss:$12 sps:$4 sm:$0xff]   ;;  %v12101_v46 = vld [vmem:[%s16167_s2 + $0x678] ss:$12 sps:$4 sm:$0xff]   ;;  %v12108_v31 = vld [vmem:[%s16167_s2 + $0x694] ss:$12 sps:$4 sm:$0xff]  }
 0x202   :  { %3489 = vmatpush1.bf16.msra.mxu1 %v12056_v12  ;;  %v12114_v13 = vld [vmem:[%s16167_s2 + $0x578] ss:$12 sps:$4 sm:$0xff]   ;;  %v12115_v2 = vld [vmem:[%s16167_s2 + $0x650] ss:$12 sps:$4 sm:$0xff]   ;;  %v12120_v49 = vld [vmem:[%s16167_s2 + $0x668] ss:$12 sps:$4 sm:$0xff]  }
 0x203   :  { %3490 = vmatprep.subr.bf16.mxu1 %v12063_v41  ;;  %v12119_v36 = vld [vmem:[%s16167_s2 + $0x6ac] ss:$12 sps:$4 sm:$0xff]   ;;  %v12117_v12 = vld [vmem:[%s16167_s2 + $0x6a8] ss:$12 sps:$4 sm:$0xff]  }
 0x204   :  { %10893 = vmatpush3.bf16.msra.mxu0 %v12075_v50  ;;  %v12128_v41 = vld [vmem:[%s16167_s2 + $0x698] ss:$12 sps:$4 sm:$0xff]   ;;  %v12121_v18 = vld [vmem:[%s16167_s2 + $0x5a8] ss:$12 sps:$4 sm:$0xff]   ;;  %v12122_v3 = vld [vmem:[%s16167_s2 + $0x680] ss:$12 sps:$4 sm:$0xff]  }
 0x205   :  { %10894 = vmatprep.subr.bf16.mxu0 %v12079_v43  ;;  %v12123_v50 = vld [vmem:[%s16167_s2 + $0x5c0] ss:$12 sps:$4 sm:$0xff]   ;;  %v12124_v21 = vld [vmem:[%s16167_s2 + $0x938] ss:$12 sps:$4 sm:$0xff]  }
 0x206   :  { %3491 = vmatpush1.bf16.msra.mxu1 %v12061_v45  ;;  %2969 = vmatmul.mubr.bf16.gmra.mrb[52].mxu0 %v13845_v22  ;;  %v12125_v43 = vld [vmem:[%s16167_s2 + $0x878] ss:$12 sps:$4 sm:$0xff]   ;;  %v12126_v45 = vld [vmem:[%s16167_s2 + $0x950] ss:$12 sps:$4 sm:$0xff]  }
 0x207   :  { %3492 = vmatprep.subr.bf16.mxu1 %v12068_v47  ;;  %2978 = vmatprep.mubr.bf16.mxu0 %v13839_v51  ;;  %v12127_v47 = vld [vmem:[%s16167_s2 + $0x890] ss:$12 sps:$4 sm:$0xff]  }
 0x208   :  { %10895 = vmatpush3.bf16.msra.mxu0 %v12080_v9  ;;  %v12130_v9 = vld [vmem:[%s16167_s2 + $0x8a8] ss:$12 sps:$4 sm:$0xff]  }
 0x209   :  { %10896 = vmatprep.subr.bf16.mxu0 %v12084_v19  ;;  %v12132_v19 = vld [vmem:[%s16167_s2 + $0x8c0] ss:$12 sps:$4 sm:$0xff]  }
 0x20a   :  { %3493 = vmatpush1.bf16.msra.mxu1 %v12066_v52  ;;  %v12133_v52 = vld [vmem:[%s16167_s2 + $0x998] ss:$12 sps:$4 sm:$0xff]  }
 0x20b   :  { %3494 = vmatprep.subr.bf16.mxu1 %v12073_v58  ;;  %v12134_v58 = vld [vmem:[%s16167_s2 + $0x8d8] ss:$12 sps:$4 sm:$0xff]  }
 0x20c   :  { %10897 = vmatpush3.bf16.msra.mxu0 %v12085_v30  ;;  %v12135_v30 = vld [vmem:[%s16167_s2 + $0x9b0] ss:$12 sps:$4 sm:$0xff]  }
 0x20d   :  { %10898 = vmatprep.subr.bf16.mxu0 %v12089_v53  ;;  %v12137_v53 = vld [vmem:[%s16167_s2 + $0x6b0] ss:$12 sps:$4 sm:$0xff]  }
 0x20e   :  { %3495 = vmatpush1.bf16.msra.mxu1 %v12071_v55  ;;  %2979 = vmatmul.mubr.bf16.gmra.mrb[56].mxu0 %v13839_v51  ;;  %v12136_v55 = vld [vmem:[%s16167_s2 + $0x8f0] ss:$12 sps:$4 sm:$0xff]  }
 0x20f   :  { %3496 = vmatprep.subr.bf16.mxu1 %v12078_v33  ;;  %3086 = vmatprep.mubr.bf16.mxu0 %v13742_v11  ;;  %v12088_v11 = vld [vmem:[%s16167_s2 + $0x634] ss:$12 sps:$4 sm:$0xff]  }
 0x210   :  { %10899 = vmatpush3.bf16.msra.mxu0 %v12090_v56  ;;  %v12138_v33 = vld [vmem:[%s16167_s2 + $0x9c8] ss:$12 sps:$4 sm:$0xff]   ;;  %v3829_v56 = vrot.slane %v13710_v20, 1 }
 0x211   :  { %10900 = vmatprep.subr.bf16.mxu0 %v12094_v8  ;;  %v12144_v8 = vld [vmem:[%s16167_s2 + $0x874] ss:$12 sps:$4 sm:$0xff]  }
 0x212   :  { %3497 = vmatpush1.bf16.msra.mxu1 %v12076_v62  ;;  %v12139_v62 = vld [vmem:[%s16167_s2 + $0x908] ss:$12 sps:$4 sm:$0xff]  }
 0x213   :  { %3498 = vmatprep.subr.bf16.mxu1 %v12083_v5  ;;  %v3828_v5 = vrot.slane %v13687_v24, 1 }
 0x214   :  { %10901 = vmatpush3.bf16.msra.mxu0 %v12095_v54  ;;  %v12140_v54 = vld [vmem:[%s16167_s2 + $0x9e0] ss:$12 sps:$4 sm:$0xff]  }
 0x215   :  { %10932 = vmatprep.subr.bf16.mxu0 %v12099_v57  ;;  %v12141_v57 = vld [vmem:[%s16167_s2 + $0x920] ss:$12 sps:$4 sm:$0xff]  }
 0x216   :  { %3499 = vmatpush1.bf16.msra.mxu1 %v12081_v29  ;;  %v3836_v29 = vrot.slane %v13758_v14, 1 }
 0x217   :  { %3500 = vmatprep.subr.bf16.mxu1 %v12088_v11  ;;  %3087 = vmatmul.mubr.bf16.vlgmr.msra.gmra.mrb[60].mxu0 %v13777_v4  ;;  %v12098_v4 = vld [vmem:[%s16167_s2 + $0x664] ss:$12 sps:$4 sm:$0xff]   ;;  %v3825_v11 = vrot.slane %v13691_v39, 1 }
 0x218   :  { %3094 = vmatprep.mubr.bf16.mxu0 %v13792_v27  ;;  %10933 = vmatpush3.bf16.msra.mxu0 %v12100_v7  ;;  %v12111_v27 = vld [vmem:[%s16167_s2 + $0x620] ss:$12 sps:$4 sm:$0xff]  }
 0x219   :  { %10934 = vmatprep.subr.bf16.mxu0 %v12104_v6  ;;  %v14071_v6 = vsel %vm1545_vm2, %v3829_v56, %v3836_v29 }
 0x21a   :  { %3501 = vmatpush1.bf16.msra.mxu1 %v12086_v10 }
 0x21b   :  { %3502 = vmatprep.subr.bf16.mxu1 %v12093_v15  ;;  %v12147_v15 = vld [vmem:[%s16167_s2 + $0x88c] ss:$12 sps:$4 sm:$0xff]  }
 0x21c   :  { %10935 = vmatpush3.bf16.msra.mxu0 %v12105_v48  ;;  %v12145_v48 = vld [vmem:[%s16167_s2 + $0x888] ss:$12 sps:$4 sm:$0xff]  }
 0x21d   :  { %10936 = vmatprep.subr.bf16.mxu0 %v12109_v16  ;;  %v12150_v16 = vld [vmem:[%s16167_s2 + $0x8a4] ss:$12 sps:$4 sm:$0xff]  }
 0x21e   :  { %3503 = vmatpush1.bf16.msra.mxu1 %v12091_v25  ;;  %v12148_v25 = vld [vmem:[%s16167_s2 + $0x8a0] ss:$12 sps:$4 sm:$0xff]  }
 0x21f   :  { %3504 = vmatprep.subr.bf16.mxu1 %v12098_v4  ;;  %3095 = vmatmul.mubr.bf16.gmra.mrb[64].mxu0 %v13812_v60  ;;  %v12116_v60 = vld [vmem:[%s16167_s2 + $0x590] ss:$12 sps:$4 sm:$0xff]  }
 0x220   :  { %3102 = vmatprep.mubr.bf16.mxu0 %v13806_v35  ;;  %10937 = vmatpush3.bf16.msra.mxu0 %v12110_v34  ;;  %v12106_v35 = vld [vmem:[%s16167_s2 + $0x690] ss:$12 sps:$4 sm:$0xff]   ;;  %v12151_v34 = vld [vmem:[%s16167_s2 + $0x8b8] ss:$12 sps:$4 sm:$0xff]  }
 0x221   :  { %10938 = vmatprep.subr.bf16.mxu0 %v12111_v27  ;;  %v12153_v4 = vld [vmem:[%s16167_s2 + $0x8bc] ss:$12 sps:$4 sm:$0xff]   ;;  %v12156_v27 = vld [vmem:[%s16167_s2 + $0x8d4] ss:$12 sps:$4 sm:$0xff]  }
 0x222   :  { %3505 = vmatpush1.bf16.msra.mxu1 %v12096_v38  ;;  %v12154_v38 = vld [vmem:[%s16167_s2 + $0x8d0] ss:$12 sps:$4 sm:$0xff]  }
 0x223   :  { %3506 = vmatprep.subr.bf16.mxu1 %v12103_v28  ;;  %v12159_v28 = vld [vmem:[%s16167_s2 + $0x8ec] ss:$12 sps:$4 sm:$0xff]  }
 0x224   :  { %10939 = vmatpush3.bf16.msra.mxu0 %v12112_v40  ;;  %v12157_v40 = vld [vmem:[%s16167_s2 + $0x8e8] ss:$12 sps:$4 sm:$0xff]  }
 0x225   :  { %10940 = vmatprep.subr.bf16.mxu0 %v12113_v44  ;;  %v12162_v44 = vld [vmem:[%s16167_s2 + $0x904] ss:$12 sps:$4 sm:$0xff]  }
 0x226   :  { %3507 = vmatpush1.bf16.msra.mxu1 %v12101_v46  ;;  %v12160_v46 = vld [vmem:[%s16167_s2 + $0x900] ss:$12 sps:$4 sm:$0xff]  }
 0x227   :  { %3545 = vmatprep.subr.bf16.mxu1 %v12108_v31  ;;  %3103 = vmatmul.mubr.bf16.gmra.mrb[68].mxu0 %v13845_v22  ;;  %v12131_v22 = vld [vmem:[%s16167_s2 + $0x980] ss:$12 sps:$4 sm:$0xff]   ;;  %v12165_v31 = vld [vmem:[%s16167_s2 + $0x91c] ss:$12 sps:$4 sm:$0xff]  }
 0x228   :  { %10941 = vmatpush3.bf16.msra.mxu0 %v12114_v13  ;;  %3110 = vmatprep.mubr.bf16.mxu0 %v13839_v51  ;;  %v12163_v13 = vld [vmem:[%s16167_s2 + $0x918] ss:$12 sps:$4 sm:$0xff]  }
 0x229   :  { %3509 = vmatmul.mubr.bf16.vlgmr.msra.gmra.mrb[80].mxu1 %v13691_v39  ;;  %10942 = vmatprep.subr.bf16.mxu0 %v12115_v2  ;;  %v12168_v2 = vld [vmem:[%s16167_s2 + $0x934] ss:$12 sps:$4 sm:$0xff]  }
 0x22a   :  { %3518 = vmatprep.mubr.bf16.mxu1 %v13710_v20  ;;  %3546 = vmatpush1.bf16.msra.mxu1 %v12106_v35  ;;  %v12166_v35 = vld [vmem:[%s16167_s2 + $0x930] ss:$12 sps:$4 sm:$0xff]  }
 0x22b   :  { %3547 = vmatprep.subr.bf16.mxu1 %v12119_v36  ;;  %v12171_v36 = vld [vmem:[%s16167_s2 + $0x94c] ss:$12 sps:$4 sm:$0xff]  }
 0x22c   :  { %10943 = vmatpush3.bf16.msra.mxu0 %v12116_v60  ;;  %v12169_v60 = vld [vmem:[%s16167_s2 + $0x948] ss:$12 sps:$4 sm:$0xff]  }
 0x22d   :  { %10944 = vmatprep.subr.bf16.mxu0 %v12120_v49  ;;  %v12174_v49 = vld [vmem:[%s16167_s2 + $0x964] ss:$12 sps:$4 sm:$0xff]  }
 0x22e   :  { %3548 = vmatpush1.bf16.msra.mxu1 %v12117_v12  ;;  %v12172_v12 = vld [vmem:[%s16167_s2 + $0x960] ss:$12 sps:$4 sm:$0xff]  }
 0x22f   :  { %3111 = vmatmul.mubr.bf16.gmra.mrb[72].mxu0 %v13839_v51  ;;  %11348 = vmatprep.subr.bf16.mxu1 %v12128_v41  ;;  %v12129_v51 = vld [vmem:[%s16167_s2 + $0x968] ss:$12 sps:$4 sm:$0xff]  }
 0x230   :  { %10945 = vmatpush3.bf16.msra.mxu0 %v12121_v18  ;;  %3646 = vmatprep.mubr.bf16.mxu0 %v13687_v24  ;;  %v3826_v24 = vrot.slane %v13718_v32, 1  ;;  %v12175_v18 = vld [vmem:[%s16167_s2 + $0x978] ss:$12 sps:$4 sm:$0xff]  }
 0x231   :  { %3519 = vmatmul.mubr.bf16.gmra.mrb[84].mxu1 %v13718_v32  ;;  %10946 = vmatprep.subr.bf16.mxu0 %v12122_v3  ;;  %v12180_v3 = vld [vmem:[%s16167_s2 + $0x994] ss:$12 sps:$4 sm:$0xff]  }
 0x232   :  { %3528 = vmatprep.mubr.bf16.mxu1 %v13758_v14  ;;  %v14067_v7 = vsel %vm1545_vm2, %v3825_v11, %v3826_v24  ;;  %v12198_v11 = vld [vmem:[%s16167_s2 + $0xbd0] ss:$12 sps:$4 sm:$0xff]  }
 0x234   :  { %10947 = vmatpush3.bf16.msra.mxu0 %v12123_v50  ;;  %v12178_v50 = vld [vmem:[%s16167_s2 + $0x990] ss:$12 sps:$4 sm:$0xff]  }
 0x235   :  { %10978 = vmatprep.subr.bf16.mxu0 %v12124_v21  ;;  %v12183_v21 = vld [vmem:[%s16167_s2 + $0x9ac] ss:$12 sps:$4 sm:$0xff]  }
 0x237   :  { %3647 = vmatmul.mubr.bf16.vlgmr.msra.gmra.mrb[76].mxu0 %v13691_v39 }
 0x238   :  { %3654 = vmatprep.mubr.bf16.mxu0 %v13710_v20  ;;  %10979 = vmatpush3.bf16.msra.mxu0 %v12125_v43  ;;  %v3830_v20 = vsel %vm1545_vm2, %v3828_v5, %v3829_v56  ;;  %v12181_v43 = vld [vmem:[%s16167_s2 + $0x9a8] ss:$12 sps:$4 sm:$0xff]  }
 0x239   :  { %3529 = vmatmul.mubr.bf16.gmra.mrb[88].mxu1 %v13752_v63  ;;  %10980 = vmatprep.subr.bf16.mxu0 %v12126_v45  ;;  %v12186_v45 = vld [vmem:[%s16167_s2 + $0x9c4] ss:$12 sps:$4 sm:$0xff]  }
 0x23a   :  { %3538 = vmatprep.mubr.bf16.mxu1 %v13762_v61 }
 0x23c   :  { %10981 = vmatpush3.bf16.msra.mxu0 %v12127_v47  ;;  %v12184_v47 = vld [vmem:[%s16167_s2 + $0x9c0] ss:$12 sps:$4 sm:$0xff]  }
 0x23d   :  { %10982 = vmatprep.subr.bf16.mxu0 %v12129_v51  ;;  %v12189_v51 = vld [vmem:[%s16167_s2 + $0x9dc] ss:$12 sps:$4 sm:$0xff]  }
 0x23f   :  { %3655 = vmatmul.mubr.bf16.gmra.mrb[80].mxu0 %v13718_v32  ;;  %v3834_v32 = vrot.slane %v13752_v63, 1 }
 0x240   :  { %3662 = vmatprep.mubr.bf16.mxu0 %v13758_v14  ;;  %10983 = vmatpush3.bf16.msra.mxu0 %v12130_v9  ;;  %v14079_v14 = vrot.slane %v13762_v61, 1  ;;  %v12187_v9 = vld [vmem:[%s16167_s2 + $0x9d8] ss:$12 sps:$4 sm:$0xff]  }
 0x241   :  { %3539 = vmatmul.mubr.bf16.gmra.mrb[104].mxu1 %v13762_v61  ;;  %10984 = vmatprep.subr.bf16.mxu0 %v12131_v22  ;;  %v14082_v39 = vsel %vm1545_vm2, %v3826_v24, %v3834_v32  ;;  %v12192_v22 = vld [vmem:[%s16167_s2 + $0x9f4] ss:$12 sps:$4 sm:$0xff]  }
 0x242   :  { %3577 = vmatprep.mubr.bf16.mxu1 %v12633_v1  ;;  %v14087_v10 = vsel %vm1545_vm2, %v3836_v29, %v14079_v14 }
 0x244   :  { %10985 = vmatpush3.bf16.msra.mxu0 %v12132_v19  ;;  %v12190_v19 = vld [vmem:[%s16167_s2 + $0x9f0] ss:$12 sps:$4 sm:$0xff]  }
 0x245   :  { %10986 = vmatprep.subr.bf16.mxu0 %v12133_v52  ;;  %v12195_v52 = vld [vmem:[%s16167_s2 + $0xa0c] ss:$12 sps:$4 sm:$0xff]  }
 0x247   :  { %3663 = vmatmul.mubr.bf16.gmra.mrb[84].mxu0 %v13752_v63  ;;  %v12142_v63 = vld [vmem:[%s16167_s2 + $0x870] ss:$12 sps:$4 sm:$0xff]  }
 0x248   :  { %10987 = vmatpush3.bf16.msra.mxu0 %v12134_v58  ;;  %3670 = vmatprep.mubr.bf16.mxu0 %v13762_v61  ;;  %v12193_v58 = vld [vmem:[%s16167_s2 + $0xa08] ss:$12 sps:$4 sm:$0xff]  }
 0x249   :  { %9785 = vmatmul.mubr.msk.bf16.vlgmr.msra.gmra.mrb[80].mxu1 %vm23_vm0, %v13589_v17  ;;  %10988 = vmatprep.subr.bf16.mxu0 %v12135_v30  ;;  %v12196_v30 = vld [vmem:[%s16167_s2 + $0x9f8] ss:$12 sps:$4 sm:$0xff]  }
 0x24a   :  { %11349 = vmatpush3.bf16.msra.mxu1 %v12128_v41  ;;  %3587 = vmatprep.mubr.bf16.mxu1 %v12633_v1  ;;  %v12177_v41 = vld [vmem:[%s16167_s2 + $0x97c] ss:$12 sps:$4 sm:$0xff]  }
 0x24b   :  { %11350 = vmatprep.subr.bf16.mxu1 %v12137_v53 }
 0x24c   :  { %10989 = vmatpush3.bf16.msra.mxu0 %v12136_v55 }
 0x24d   :  { %10990 = vmatprep.subr.bf16.mxu0 %v12138_v33 }
 0x24e   :  { %11351 = vmatpush3.bf16.msra.mxu1 %v12137_v53 }
 0x24f   :  { %3671 = vmatmul.mubr.bf16.gmra.mrb[88].mxu0 %v13762_v61  ;;  %4154 = vmatprep.subr.bf16.mxu1 %v12144_v8  ;;  %v14099_v61 = vsel %vm1545_vm2, %v3834_v32, %v14079_v14  ;;  %v3831_v8 = vrot.slane %v13589_v17, 1 }
 0x250   :  { %10991 = vmatpush3.bf16.msra.mxu0 %v12139_v62  ;;  %4324 = vmatprep.mubr.bf16.mxu0 %v3830_v20  ;;  %v3832_v62 = vrot.slane %v13591_v0, 1 }
 0x251   :  { %9786 = vmatmul.mubr.msk.bf16.gmra.mrb[84].mxu1 %vm23_vm0, %v13591_v0  ;;  %10992 = vmatprep.subr.bf16.mxu0 %v12140_v54 }
 0x252   :  { %3597 = vmatprep.mubr.bf16.mxu1 %v12633_v1  ;;  %v3833_v29 = vsel %vm1545_vm2, %v3831_v8, %v3832_v62 }
 0x254   :  { %10993 = vmatpush3.bf16.msra.mxu0 %v12141_v57  ;;  %v12197_v57 = vld [vmem:[%s16167_s2 + $0xa10] ss:$12 sps:$4 sm:$0xff]  }
 0x257   :  { %4325 = vmatmul.mubr.bf16.vlgmr.msra.gmra.mrb[92].mxu0 %v14067_v7 }
 0x258   :  { %4332 = vmatprep.mubr.bf16.mxu0 %v14071_v6 }
 0x259   :  { %9787 = vmatmul.mubr.msk.bf16.gmra.mrb[88].mxu1 %vm23_vm0, %v13608_v26 }
 0x25a   :  { %3607 = vmatprep.mubr.bf16.mxu1 %v12633_v1 }
 0x25f   :  { %4333 = vmatmul.mubr.bf16.gmra.mrb[96].mxu0 %v14082_v39 }
 0x260   :  { %4340 = vmatprep.mubr.bf16.mxu0 %v14087_v10 }
 0x261   :  { %9788 = vmatmul.mubr.msk.bf16.gmra.mrb[108].mxu1 %vm23_vm0, %v13615_v37 }
 0x262   :  { %11352 = vmatprep.mubr.msk.bf16.mxu1 %vm23_vm0, %v13589_v17  ;;  %v12200_v17 = vld [vmem:[%s16167_s2 + $0xbd4] ss:$12 sps:$4 sm:$0xff]  }
 0x263   :  { %5196 = vmatprep.subr.bf16.mxu0 %v12200_v17 }
 0x264   :  { %5197 = vmatpush1.bf16.msra.mxu0 %v12198_v11 }
 0x267   :  { %4341 = vmatmul.mubr.bf16.gmra.mrb[100].mxu0 %v14099_v61 }
 0x268   :  { %4348 = vmatprep.mubr.bf16.mxu0 %v14079_v14 }
 0x269   :  { %11353 = vmatmul.mubr.msk.bf16.vlgmr.msra.gmra.mrb[96].mxu1 %vm23_vm0, %v13591_v0 }
 0x26a   :  { %4155 = vmatpush1.bf16.msra.mxu1 %v12142_v63  ;;  %11356 = vmatprep.mubr.msk.bf16.mxu1 %vm23_vm0, %v13608_v26  ;;  %v12206_v63 = vld [vmem:[%s16167_s2 + $0xc04] ss:$12 sps:$4 sm:$0xff]  }
 0x26b   :  { %4156 = vmatprep.subr.bf16.mxu1 %v12147_v15 }
 0x26e   :  { %4157 = vmatpush1.bf16.msra.mxu1 %v12145_v48  ;;  %v12209_v48 = vld [vmem:[%s16167_s2 + $0xc1c] ss:$12 sps:$4 sm:$0xff]  }
 0x26f   :  { %4158 = vmatprep.subr.bf16.mxu1 %v12150_v16  ;;  %4349 = vmatmul.mubr.bf16.gmra.mrb[104].mxu0 %v14079_v14 }
 0x271   :  { %11357 = vmatmul.mubr.msk.bf16.gmra.mrb[112].mxu1 %vm23_vm0, %v13615_v37 }
 0x272   :  { %4159 = vmatpush1.bf16.msra.mxu1 %v12148_v25  ;;  %4186 = vmatprep.mubr.bf16.mxu1 %v3830_v20 }
 0x273   :  { %4160 = vmatprep.subr.bf16.mxu1 %v12153_v4  ;;  %v3844_v4 = vrot.slane %v13615_v37, 1 }
 0x276   :  { %4161 = vmatpush1.bf16.msra.mxu1 %v12151_v34 }
 0x277   :  { %4162 = vmatprep.subr.bf16.mxu1 %v12156_v27  ;;  %v12207_v27 = vld [vmem:[%s16167_s2 + $0xc18] ss:$12 sps:$4 sm:$0xff]  }
 0x27a   :  { %4163 = vmatpush1.bf16.msra.mxu1 %v12154_v38  ;;  %v12212_v38 = vld [vmem:[%s16167_s2 + $0xc34] ss:$12 sps:$4 sm:$0xff]  }
 0x27b   :  { %4164 = vmatprep.subr.bf16.mxu1 %v12159_v28 }
 0x27e   :  { %4165 = vmatpush1.bf16.msra.mxu1 %v12157_v40  ;;  %v12210_v40 = vld [vmem:[%s16167_s2 + $0xc30] ss:$12 sps:$4 sm:$0xff]  }
 0x27f   :  { %4166 = vmatprep.subr.bf16.mxu1 %v12162_v44 }
 0x282   :  { %4167 = vmatpush1.bf16.msra.mxu1 %v12160_v46 }
 0x283   :  { %4168 = vmatprep.subr.bf16.mxu1 %v12165_v31 }
 0x286   :  { %4169 = vmatpush1.bf16.msra.mxu1 %v12163_v13 }
 0x287   :  { %4170 = vmatprep.subr.bf16.mxu1 %v12168_v2 }
 0x28a   :  { %4171 = vmatpush1.bf16.msra.mxu1 %v12166_v35 }
 0x28b   :  { %4172 = vmatprep.subr.bf16.mxu1 %v12171_v36 }
 0x28e   :  { %4173 = vmatpush1.bf16.msra.mxu1 %v12169_v60 }
 0x28f   :  { %4174 = vmatprep.subr.bf16.mxu1 %v12174_v49 }
 0x292   :  { %4175 = vmatpush1.bf16.msra.mxu1 %v12172_v12 }
 0x293   :  { %4176 = vmatprep.subr.bf16.mxu1 %v12177_v41 }
 0x296   :  { %4177 = vmatpush1.bf16.msra.mxu1 %v12175_v18 }
 0x297   :  { %4178 = vmatprep.subr.bf16.mxu1 %v12180_v3 }
 0x29a   :  { %4179 = vmatpush1.bf16.msra.mxu1 %v12178_v50 }
 0x29b   :  { %4180 = vmatprep.subr.bf16.mxu1 %v12183_v21 }
 0x29e   :  { %4181 = vmatpush1.bf16.msra.mxu1 %v12181_v43 }
 0x29f   :  { %4182 = vmatprep.subr.bf16.mxu1 %v12186_v45 }
 0x2a2   :  { %4183 = vmatpush1.bf16.msra.mxu1 %v12184_v47 }
 0x2a3   :  { %4184 = vmatprep.subr.bf16.mxu1 %v12189_v51 }
 0x2a6   :  { %4185 = vmatpush1.bf16.msra.mxu1 %v12187_v9 }
 0x2a7   :  { %4223 = vmatprep.subr.bf16.mxu1 %v12192_v22 }
 0x2a9   :  { %4187 = vmatmul.mubr.bf16.vlgmr.msra.gmra.mrb[80].mxu1 %v14067_v7  ;;  %v12203_v7 = vld [vmem:[%s16167_s2 + $0xbec] ss:$12 sps:$4 sm:$0xff]  }
 0x2aa   :  { %4196 = vmatprep.mubr.bf16.mxu1 %v14071_v6  ;;  %4224 = vmatpush1.bf16.msra.mxu1 %v12190_v19 }
 0x2ab   :  { %4225 = vmatprep.subr.bf16.mxu1 %v12195_v52  ;;  %5198 = vmatprep.subr.bf16.mxu0 %v12203_v7 }
 0x2ae   :  { %4226 = vmatpush1.bf16.msra.mxu1 %v12193_v58 }
 0x2af   :  { %11360 = vmatprep.subr.bf16.mxu1 %v12196_v30 }
 0x2b1   :  { %4197 = vmatmul.mubr.bf16.gmra.mrb[84].mxu1 %v14082_v39 }
 0x2b2   :  { %4206 = vmatprep.mubr.bf16.mxu1 %v14087_v10  ;;  %v12201_v10 = vld [vmem:[%s16167_s2 + $0xbe8] ss:$12 sps:$4 sm:$0xff]  }
 0x2b3   :  { %5199 = vmatpush1.bf16.msra.mxu0 %v12201_v10 }
 0x2b4   :  { %v3049_v53 = vpop.f32.mrb[92].mxu1  ;;  %5200 = vmatprep.subr.bf16.mxu0 %v12206_v63  ;;  %v12216_v63 = vld [vmem:[%s16167_s2 + $0xae8] ss:$12 sps:$4 sm:$0xff]  }
 0x2b5   :  { %v3050_v55 = vpop.f32.mrb[93].mxu1 }
 0x2b6   :  { %v3051_v33 = vpop.f32.mrb[94].mxu1 }
 0x2b7   :  { %v3052_v56 = vpop.f32.mrb[95].mxu1 }
 0x2b9   :  { %4207 = vmatmul.mubr.bf16.gmra.mrb[88].mxu1 %v14099_v61 }
 0x2ba   :  { %4216 = vmatprep.mubr.bf16.mxu1 %v14079_v14 }
 0x2c1   :  { %4217 = vmatmul.mubr.bf16.gmra.mrb[116].mxu1 %v14079_v14  ;;  %v3838_v14 = vrot.slane %v13608_v26, 1  ;;  %v12204_v26 = vld [vmem:[%s16167_s2 + $0xc00] ss:$12 sps:$4 sm:$0xff]  }
 0x2c2   :  { %4255 = vmatprep.mubr.bf16.mxu1 %v12633_v1  ;;  %5201 = vmatpush1.bf16.msra.mxu0 %v12204_v26  ;;  %v12217_v26 = vld [vmem:[%s16167_s2 + $0xa28] ss:$12 sps:$4 sm:$0xff]  }
 0x2c3   :  { %v3839_v61 = vsel %vm1545_vm2, %v3832_v62, %v3838_v14  ;;  %5202 = vmatprep.subr.bf16.mxu0 %v12209_v48  ;;  %v3845_v28 = vsel %vm1545_vm2, %v3838_v14, %v3844_v4 }
 0x2c4   :  { %v11346_v5 = vpop.f32.mrb[100].mxu1 }
 0x2c5   :  { %v14225_v54 = vpop.f32.mrb[101].mxu1 }
 0x2c6   :  { %v11347_v20 = vpop.f32.mrb[102].mxu1  ;;  %5203 = vmatpush1.bf16.msra.mxu0 %v12207_v27 }
 0x2c7   :  { %v14230_v24 = vpop.f32.mrb[103].mxu1  ;;  %5204 = vmatprep.subr.bf16.mxu0 %v12212_v38 }
 0x2c9   :  { %9919 = vmatmul.mubr.msk.bf16.vlgmr.msra.gmra.mrb[80].mxu1 %vm23_vm0, %v3833_v29  ;;  %v14240_v0 = vpop.f32.mrb[44].mxu0 }
 0x2ca   :  { %4265 = vmatprep.mubr.bf16.mxu1 %v12633_v1  ;;  %11361 = vmatpush3.bf16.msra.mxu1 %v12196_v30  ;;  %v14246_v6 = vpop.f32.mrb[45].mxu0 }
 0x2cb   :  { %v14248_v32 = vpop.f32.mrb[46].mxu0  ;;  %11362 = vmatprep.subr.bf16.mxu1 %v12197_v57  ;;  %5205 = vmatpush1.bf16.msra.mxu0 %v12210_v40  ;;  %v12220_v40 = vld [vmem:[%s16167_s2 + $0xc64] ss:$12 sps:$4 sm:$0xff]  }
 0x2cc   :  { %v14251_v39 = vpop.f32.mrb[47].mxu0 }
 0x2ce   :  { %11363 = vmatpush3.bf16.msra.mxu1 %v12197_v57 }
 0x2cf   :  { %11070 = vmatprep.subr.bf16.mxu1 %v12216_v63 }
 0x2d1   :  { %9920 = vmatmul.mubr.msk.bf16.gmra.mrb[84].mxu1 %vm23_vm0, %v3839_v61  ;;  %v14264_v15 = vpop.f32.mrb[48].mxu0 }
 0x2d2   :  { %4275 = vmatprep.mubr.bf16.mxu1 %v12633_v1  ;;  %v14270_v16 = vpop.f32.mrb[49].mxu0 }
 0x2d3   :  { %v14272_v25 = vpop.f32.mrb[50].mxu0 }
 0x2d4   :  { %v14275_v34 = vpop.f32.mrb[51].mxu0 }
 0x2d9   :  { %9921 = vmatmul.mubr.msk.bf16.gmra.mrb[88].mxu1 %vm23_vm0, %v3845_v28  ;;  %v14288_v37 = vpop.f32.mrb[52].mxu0 }
 0x2da   :  { %4285 = vmatprep.mubr.bf16.mxu1 %v12633_v1  ;;  %v14291_v44 = vpop.f32.mrb[53].mxu0 }
 0x2db   :  { %v14293_v46 = vpop.f32.mrb[54].mxu0 }
 0x2dc   :  { %v14295_v31 = vpop.f32.mrb[55].mxu0 }
 0x2e1   :  { %9922 = vmatmul.mubr.msk.bf16.gmra.mrb[120].mxu1 %vm23_vm0, %v3844_v4  ;;  %v2980_v13 = vpop.f32.mrb[56].mxu0 }
 0x2e2   :  { %11364 = vmatprep.mubr.msk.bf16.mxu1 %vm23_vm0, %v3833_v29  ;;  %v2981_v2 = vpop.f32.mrb[57].mxu0 }
 0x2e3   :  { %v2982_v35 = vpop.f32.mrb[58].mxu0 }
 0x2e4   :  { %v2983_v36 = vpop.f32.mrb[59].mxu0 }
 0x2e5   :  { %v12218_v36 = vld [vmem:[%s16167_s2 + $0xc60] ss:$12 sps:$4 sm:$0xff]  }
 0x2e9   :  { %11365 = vmatmul.mubr.msk.bf16.vlgmr.msra.gmra.mrb[96].mxu1 %vm23_vm0, %v3839_v61 }
 0x2ea   :  { %11368 = vmatprep.mubr.msk.bf16.mxu1 %vm23_vm0, %v3845_v28  ;;  %v10902_v60 = vpop.f32.mrb[60].mxu0  ;;  %11071 = vmatpush3.bf16.msra.mxu1 %v12217_v26  ;;  %v12246_v26 = vld [vmem:[%s16167_s2 + $0xb78] ss:$12 sps:$4 sm:$0xff]  }
 0x2eb   :  { %v10903_v49 = vpop.f32.mrb[61].mxu0 }
 0x2ec   :  { %v10904_v12 = vadd.f32 %v10903_v49, %v10902_v60  ;;  %v10905_v41 = vpop.f32.mrb[62].mxu0  ;;  %v12221_v60 = vld [vmem:[%s16167_s2 + $0xb00] ss:$12 sps:$4 sm:$0xff]  }
 0x2ed   :  { %v10906_v18 = vpop.f32.mrb[63].mxu0  ;;  %11072 = vmatprep.subr.bf16.mxu1 %v12221_v60 }
 0x2ee   :  { %v10907_v3 = vadd.f32 %v10906_v18, %v10905_v41  ;;  %v12225_v18 = vld [vmem:[%s16167_s2 + $0xc7c] ss:$12 sps:$4 sm:$0xff]  }
 0x2f1   :  { %11369 = vmatmul.mubr.msk.bf16.gmra.mrb[124].mxu1 %vm23_vm0, %v3844_v4 }
 0x2f2   :  { %v10908_v50 = vpop.f32.mrb[64].mxu0 }
 0x2f3   :  { %v10909_v21 = vpop.f32.mrb[65].mxu0 }
 0x2f4   :  { %v10910_v43 = vadd.f32 %v10909_v21, %v10908_v50  ;;  %v10911_v45 = vpop.f32.mrb[66].mxu0  ;;  %v12223_v50 = vld [vmem:[%s16167_s2 + $0xc78] ss:$12 sps:$4 sm:$0xff]  }
 0x2f5   :  { %v10912_v47 = vpop.f32.mrb[67].mxu0  ;;  %v12226_v21 = vld [vmem:[%s16167_s2 + $0xb18] ss:$12 sps:$4 sm:$0xff]  }
 0x2f6   :  { %v10913_v51 = vadd.f32 %v10912_v47, %v10911_v45  ;;  %v12227_v45 = vld [vmem:[%s16167_s2 + $0xa58] ss:$12 sps:$4 sm:$0xff]  }
 0x2fa   :  { %v10914_v9 = vpop.f32.mrb[68].mxu0 }
 0x2fb   :  { %v10915_v22 = vpop.f32.mrb[69].mxu0 }
 0x2fc   :  { %v10916_v19 = vadd.f32 %v10915_v22, %v10914_v9  ;;  %v10917_v52 = vpop.f32.mrb[70].mxu0  ;;  %v12230_v22 = vld [vmem:[%s16167_s2 + $0xc94] ss:$12 sps:$4 sm:$0xff]  }
 0x2fd   :  { %v10918_v58 = vpop.f32.mrb[71].mxu0 }
 0x2fe   :  { %v3168_v30 = vadd.f32 %v10916_v19, %v14225_v54  ;;  %v10919_v53 = vadd.f32 %v10918_v58, %v10917_v52  ;;  %v12215_v54 = vld [vmem:[%s16167_s2 + $0xc4c] ss:$12 sps:$4 sm:$0xff]   ;;  %v12228_v58 = vld [vmem:[%s16167_s2 + $0xc90] ss:$12 sps:$4 sm:$0xff]  }
 0x2ff   :  { %5206 = vmatprep.subr.bf16.mxu0 %v12215_v54  ;;  %v12241_v54 = vld [vmem:[%s16167_s2 + $0xb60] ss:$12 sps:$4 sm:$0xff]  }
 0x300   :  { %v3171_v55 = vadd.f32 %v10919_v53, %v14230_v24  ;;  %v12213_v24 = vld [vmem:[%s16167_s2 + $0xc48] ss:$12 sps:$4 sm:$0xff]   ;;  %v12231_v53 = vld [vmem:[%s16167_s2 + $0xb30] ss:$12 sps:$4 sm:$0xff]  }
 0x301   :  { %5207 = vmatpush1.bf16.msra.mxu0 %v12213_v24  ;;  %v12245_v24 = vld [vmem:[%s16167_s2 + $0xcdc] ss:$12 sps:$4 sm:$0xff]  }
 0x302   :  { %v10920_v33 = vpop.f32.mrb[72].mxu0  ;;  %5208 = vmatprep.subr.bf16.mxu0 %v12220_v40  ;;  %v12250_v40 = vld [vmem:[%s16167_s2 + $0xcf4] ss:$12 sps:$4 sm:$0xff]  }
 0x303   :  { %v10921_v56 = vpop.f32.mrb[73].mxu0  ;;  %v12232_v33 = vld [vmem:[%s16167_s2 + $0xa70] ss:$12 sps:$4 sm:$0xff]  }
 0x304   :  { %v10923_v8 = vpop.f32.mrb[74].mxu0 }
 0x305   :  { %v10924_v62 = vpop.f32.mrb[75].mxu0  ;;  %5209 = vmatpush1.bf16.msra.mxu0 %v12218_v36  ;;  %v12251_v36 = vld [vmem:[%s16167_s2 + $0xb90] ss:$12 sps:$4 sm:$0xff]  }
 0x306   :  { %5210 = vmatprep.subr.bf16.mxu0 %v12225_v18  ;;  %v12233_v62 = vld [vmem:[%s16167_s2 + $0xca8] ss:$12 sps:$4 sm:$0xff]   ;;  %v12255_v18 = vld [vmem:[%s16167_s2 + $0xd0c] ss:$12 sps:$4 sm:$0xff]  }
 0x309   :  { %5211 = vmatpush1.bf16.msra.mxu0 %v12223_v50  ;;  %v12256_v50 = vld [vmem:[%s16167_s2 + $0xe48] ss:$12 sps:$4 sm:$0xff]  }
 0x30a   :  { %v10948_v5 = vpop.f32.mrb[76].mxu0  ;;  %5212 = vmatprep.subr.bf16.mxu0 %v12230_v22 }
 0x30b   :  { %v10949_v20 = vpop.f32.mrb[77].mxu0 }
 0x30c   :  { %v10950_v57 = vadd.f32 %v10949_v20, %v10948_v5  ;;  %v10951_v29 = vpop.f32.mrb[78].mxu0  ;;  %v12236_v5 = vld [vmem:[%s16167_s2 + $0xb48] ss:$12 sps:$4 sm:$0xff]  }
 0x30d   :  { %v10952_v11 = vpop.f32.mrb[79].mxu0  ;;  %5213 = vmatpush1.bf16.msra.mxu0 %v12228_v58  ;;  %v12258_v58 = vld [vmem:[%s16167_s2 + $0xd20] ss:$12 sps:$4 sm:$0xff]  }
 0x30e   :  { %v14304_v17 = vadd.f32 %v10950_v57, %v10904_v12  ;;  %v10953_v7 = vadd.f32 %v10952_v11, %v10951_v29  ;;  %v12222_v12 = vld [vmem:[%s16167_s2 + $0xa40] ss:$12 sps:$4 sm:$0xff]   ;;  %v12240_v11 = vld [vmem:[%s16167_s2 + $0xcc4] ss:$12 sps:$4 sm:$0xff]  }
 0x30f   :  { %11073 = vmatpush3.bf16.msra.mxu1 %v12222_v12 }
 0x310   :  { %v14306_v14 = vadd.f32 %v10953_v7, %v10907_v3  ;;  %11074 = vmatprep.subr.bf16.mxu1 %v12226_v21  ;;  %v12238_v7 = vld [vmem:[%s16167_s2 + $0xcc0] ss:$12 sps:$4 sm:$0xff]  }
 0x312   :  { %v10954_v10 = vpop.f32.mrb[80].mxu0 }
 0x313   :  { %v10955_v61 = vpop.f32.mrb[81].mxu0  ;;  %11075 = vmatpush3.bf16.msra.mxu1 %v12227_v45 }
 0x314   :  { %v3540_v48 = vpop.f32.mrb[104].mxu1  ;;  %v10956_v4 = vadd.f32 %v10955_v61, %v10954_v10  ;;  %v10957_v27 = vpop.f32.mrb[82].mxu0  ;;  %11076 = vmatprep.subr.bf16.mxu1 %v12231_v53  ;;  %v12242_v10 = vld [vmem:[%s16167_s2 + $0xaa0] ss:$12 sps:$4 sm:$0xff]   ;;  %v12243_v61 = vld [vmem:[%s16167_s2 + $0xcd8] ss:$12 sps:$4 sm:$0xff]  }
 0x315   :  { %v3541_v38 = vpop.f32.mrb[105].mxu1  ;;  %v10958_v28 = vpop.f32.mrb[83].mxu0 }
 0x316   :  { %v3542_v13 = vpop.f32.mrb[106].mxu1  ;;  %v14323_v2 = vadd.f32 %v10956_v4, %v10910_v43  ;;  %v10959_v35 = vadd.f32 %v10958_v28, %v10957_v27  ;;  %v12247_v4 = vld [vmem:[%s16167_s2 + $0xab8] ss:$12 sps:$4 sm:$0xff]  }
 0x317   :  { %v3543_v49 = vpop.f32.mrb[107].mxu1  ;;  %11077 = vmatpush3.bf16.msra.mxu1 %v12232_v33 }
 0x318   :  { %v14334_v41 = vadd.f32 %v10959_v35, %v10913_v51  ;;  %11078 = vmatprep.subr.bf16.mxu1 %v12236_v5  ;;  %v12248_v35 = vld [vmem:[%s16167_s2 + $0xcf0] ss:$12 sps:$4 sm:$0xff]   ;;  %v12263_v5 = vld [vmem:[%s16167_s2 + $0xd38] ss:$12 sps:$4 sm:$0xff]  }
 0x319   :  { %v12252_v49 = vld [vmem:[%s16167_s2 + $0xad0] ss:$12 sps:$4 sm:$0xff]  }
 0x31a   :  { %v10960_v3 = vpop.f32.mrb[84].mxu0 }
 0x31b   :  { %v10961_v43 = vpop.f32.mrb[85].mxu0 }
 0x31c   :  { %v10962_v47 = vadd.f32 %v10961_v43, %v10960_v3  ;;  %v10963_v51 = vpop.f32.mrb[86].mxu0 }
 0x31d   :  { %v10964_v9 = vpop.f32.mrb[87].mxu0 }
 0x31e   :  { %v10965_v19 = vadd.f32 %v10964_v9, %v10963_v51  ;;  %v14351_v52 = vadd.f32 %v10962_v47, %v3168_v30  ;;  %v12235_v30 = vld [vmem:[%s16167_s2 + $0xcac] ss:$12 sps:$4 sm:$0xff]   ;;  %v12260_v9 = vld [vmem:[%s16167_s2 + $0xd24] ss:$12 sps:$4 sm:$0xff]  }
 0x31f   :  { %5214 = vmatprep.subr.bf16.mxu0 %v12235_v30 }
 0x320   :  { %v14362_v56 = vadd.f32 %v10965_v19, %v3171_v55  ;;  %v12237_v55 = vld [vmem:[%s16167_s2 + $0xa88] ss:$12 sps:$4 sm:$0xff]   ;;  %5215 = vmatpush1.bf16.msra.mxu0 %v12233_v62 }
 0x321   :  { %11079 = vmatpush3.bf16.msra.mxu1 %v12237_v55  ;;  %5216 = vmatprep.subr.bf16.mxu0 %v12240_v11 }
 0x322   :  { %v10966_v8 = vpop.f32.mrb[88].mxu0  ;;  %11080 = vmatprep.subr.bf16.mxu1 %v12241_v54 }
 0x323   :  { %v10967_v20 = vpop.f32.mrb[89].mxu0  ;;  %v12265_v8 = vld [vmem:[%s16167_s2 + $0xd3c] ss:$12 sps:$4 sm:$0xff]  }
 0x324   :  { %v10969_v57 = vpop.f32.mrb[90].mxu0  ;;  %5217 = vmatpush1.bf16.msra.mxu0 %v12238_v7 }
 0x325   :  { %v10970_v29 = vpop.f32.mrb[91].mxu0  ;;  %11081 = vmatpush3.bf16.msra.mxu1 %v12242_v10  ;;  %5218 = vmatprep.subr.bf16.mxu0 %v12245_v24 }
 0x326   :  { %11082 = vmatprep.subr.bf16.mxu1 %v12246_v26 }
 0x328   :  { %5219 = vmatpush1.bf16.msra.mxu0 %v12243_v61 }
 0x329   :  { %11083 = vmatpush3.bf16.msra.mxu1 %v12247_v4  ;;  %5220 = vmatprep.subr.bf16.mxu0 %v12250_v40  ;;  %v12271_v4 = vld [vmem:[%s16167_s2 + $0xd54] ss:$12 sps:$4 sm:$0xff]  }
 0x32a   :  { %v10994_v63 = vpop.f32.mrb[92].mxu0  ;;  %11084 = vmatprep.subr.bf16.mxu1 %v12251_v36 }
 0x32b   :  { %v10995_v48 = vpop.f32.mrb[93].mxu0 }
 0x32c   :  { %v10996_v27 = vadd.f32 %v10995_v48, %v10994_v63  ;;  %v10997_v38 = vpop.f32.mrb[94].mxu0  ;;  %5221 = vmatpush1.bf16.msra.mxu0 %v12248_v35 }
 0x32d   :  { %v10998_v28 = vpop.f32.mrb[95].mxu0  ;;  %11085 = vmatpush3.bf16.msra.mxu1 %v12252_v49  ;;  %5222 = vmatprep.subr.bf16.mxu0 %v12255_v18 }
 0x32e   :  { %v10999_v13 = vadd.f32 %v10998_v28, %v10997_v38  ;;  %v14410_v60 = vadd.f32 %v14304_v17, %v10996_v27  ;;  %v12253_v17 = vld [vmem:[%s16167_s2 + $0xd08] ss:$12 sps:$4 sm:$0xff]   ;;  %11116 = vmatprep.subr.bf16.mxu1 %v12256_v50 }
 0x330   :  { %v14416_v12 = vadd.f32 %v14306_v14, %v10999_v13  ;;  %5223 = vmatpush1.bf16.msra.mxu0 %v12253_v17  ;;  %v14461_v13 = vld [vmem:[%s16169_s3 + $0x3] sm:$0x7] }
 0x331   :  { %5224 = vmatprep.subr.bf16.mxu0 %v12260_v9  ;;  %v14474_v36 = vrot.slane %v14461_v13, %v13625_v42 }
 0x332   :  { %v11000_v3 = vpop.f32.mrb[96].mxu0 }
 0x333   :  { %v11001_v21 = vpop.f32.mrb[97].mxu0 }
 0x334   :  { %v3609_v43 = vpop.f32.mrb[108].mxu1  ;;  %v11002_v45 = vadd.f32 %v11001_v21, %v11000_v3  ;;  %v11003_v14 = vpop.f32.mrb[98].mxu0  ;;  %5225 = vmatpush1.bf16.msra.mxu0 %v12258_v58 }
 0x335   :  { %v3610_v47 = vpop.f32.mrb[109].mxu1  ;;  %v11004_v51 = vpop.f32.mrb[99].mxu0  ;;  %5226 = vmatprep.subr.bf16.mxu0 %v12265_v8 }
 0x336   :  { %v3611_v22 = vpop.f32.mrb[110].mxu1  ;;  %v11005_v19 = vadd.f32 %v11004_v51, %v11003_v14  ;;  %v14434_v53 = vadd.f32 %v14323_v2, %v11002_v45 }
 0x337   :  { %v3612_v33 = vpop.f32.mrb[111].mxu1 }
 0x338   :  { %v14437_v30 = vadd.f32 %v14334_v41, %v11005_v19  ;;  %5227 = vmatpush1.bf16.msra.mxu0 %v12263_v5 }
 0x339   :  { %5265 = vmatprep.subr.bf16.mxu0 %v12271_v4 }
 0x33a   :  { %v11006_v62 = vpop.f32.mrb[100].mxu0 }
 0x33b   :  { %v11007_v20 = vpop.f32.mrb[101].mxu0 }
 0x33c   :  { %v14445_v55 = vadd.f32 %v11007_v20, %v11006_v62  ;;  %v11009_v2 = vpop.f32.mrb[102].mxu0 }
 0x33d   :  { %v11010_v57 = vpop.f32.mrb[103].mxu0 }
 0x33e   :  { %v14447_v29 = vadd.f32 %v11010_v57, %v11009_v2 }
 0x342   :  { %v11012_v41 = vpop.f32.mrb[104].mxu0 }
 0x343   :  { %v11013_v11 = vpop.f32.mrb[105].mxu0 }
 0x344   :  { %v11358_v7 = vpop.f32.mrb[112].mxu1  ;;  %v11015_v54 = vpop.f32.mrb[106].mxu0 }
 0x345   :  { %v3727_v10 = vpop.f32.mrb[113].mxu1  ;;  %v11016_v24 = vpop.f32.mrb[107].mxu0 }
 0x346   :  { %v14450_v63 = vadd.f32 %v3727_v10, %v14351_v52  ;;  %v11359_v61 = vpop.f32.mrb[114].mxu1  ;;  %v14466_v52 = vld [vmem:[%s16170_s4 + $0x3] sm:$0x7] }
 0x347   :  { %v3730_v26 = vpop.f32.mrb[115].mxu1  ;;  %v14479_v18 = vrot.slane %v14466_v52, %v13618_v59  ;;  %v14484_v50 = vrot.slane %v14466_v52, %v13625_v42 }
 0x348   :  { %v14453_v48 = vadd.f32 %v3730_v26, %v14362_v56  ;;  %v14470_v56 = vrot.slane %v14461_v13, %v13618_v59 }
 0x394   :  { %v4218_v27 = vpop.f32.mrb[116].mxu1 }
 0x395   :  { %v4219_v38 = vpop.f32.mrb[117].mxu1 }
 0x396   :  { %v4220_v28 = vpop.f32.mrb[118].mxu1 }
 0x397   :  { %v4221_v40 = vpop.f32.mrb[119].mxu1 }
 0x39c   :  { %v4257_v35 = vpop.f32.mrb[80].mxu1 }
 0x39d   :  { %v11480_v49 = vadd.f32 %v4257_v35, %v14240_v0  ;;  %v4259_v3 = vpop.f32.mrb[81].mxu1 }
 0x39e   :  { %v11481_v17 = vadd.f32 %v4259_v3, %v14246_v6  ;;  %v4261_v21 = vpop.f32.mrb[82].mxu1 }
 0x39f   :  { %v4454_v43 = vadd.f32 %v11480_v49, %v14470_v56  ;;  %v11482_v45 = vadd.f32 %v4261_v21, %v14248_v32  ;;  %v4263_v14 = vpop.f32.mrb[83].mxu1  ;;  %v12261_v21 = vld [vmem:[%s16167_s2 + $0xe60] ss:$12 sps:$4 sm:$0xff]  }
 0x3a0   :  { %v4455_v47 = vadd.f32 %v11481_v17, %v14474_v36  ;;  %v11483_v0 = vadd.f32 %v4263_v14, %v14251_v39 }
 0x3a1   :  { %vm4472_vm10 = vcmp.gt.f32.partialorder %v4454_v43, 0.0  ;;  %v4508_v51 = vmul.f32 %v14479_v18, %v4454_v43  ;;  %v4457_v9 = vadd.f32 %v11482_v45, %v14470_v56 }
 0x3a2   :  { %vm4473_vm11 = vcmp.gt.f32.partialorder %v4455_v47, 0.0  ;;  %v4509_v6 = vmul.f32 %v14484_v50, %v4455_v47  ;;  %v4458_v22 = vadd.f32 %v11483_v0, %v14474_v36 }
 0x3a3   :  { %v4526_v19 = vsel %vm4472_vm10, %v4454_v43, %v4508_v51  ;;  %vm4475_vm12 = vcmp.gt.f32.partialorder %v4457_v9, 0.0  ;;  %v4511_v58 = vmul.f32 %v14479_v18, %v4457_v9 }
 0x3a4   :  { %v4527_v32 = vsel %vm4473_vm11, %v4455_v47, %v4509_v6  ;;  %vm4476_vm13 = vcmp.gt.f32.partialorder %v4458_v22, 0.0  ;;  %v4512_v33 = vmul.f32 %v14484_v50, %v4458_v22  ;;  %v4267_v8 = vpop.f32.mrb[84].mxu1  ;;  %v4553_v20 = vrot.slane %v4526_v19, 7 }
 0x3a5   :  { %v4529_v39 = vsel %vm4475_vm12, %v4457_v9, %v4511_v58  ;;  %v11484_v62 = vadd.f32 %v4267_v8, %v14264_v15  ;;  %v4269_v5 = vpop.f32.mrb[85].mxu1  ;;  %v4556_v7 = vrot.slane %v4527_v32, 7 }
 0x3a6   :  { %v4554_v2 = vrot.slane %v4529_v39, 7  ;;  %v4530_v57 = vsel %vm4476_vm13, %v4458_v22, %v4512_v33  ;;  %v11485_v41 = vadd.f32 %v4269_v5, %v14270_v16  ;;  %v4271_v11 = vpop.f32.mrb[86].mxu1  ;;  %v12262_v39 = vld [vmem:[%s16167_s2 + $0xda0] ss:$12 sps:$4 sm:$0xff]  }
 0x3a7   :  { %v4557_v54 = vrot.slane %v4530_v57, 7  ;;  %v4460_v10 = vadd.f32 %v11484_v62, %v14470_v56  ;;  %v11486_v24 = vadd.f32 %v4271_v11, %v14272_v25  ;;  %v4273_v61 = vpop.f32.mrb[87].mxu1  ;;  %v14508_v25 = vld [vmem:[#allocation2] sm:$0xff] }
 0x3a8   :  { %v4555_v26 = vsel %vm2272_vm6, %v4553_v20, %v4554_v2  ;;  %v4461_v4 = vadd.f32 %v11485_v41, %v14474_v36  ;;  %v11487_v15 = vadd.f32 %v4273_v61, %v14275_v34  ;;  %v12257_v34 = vld [vmem:[%s16167_s2 + $0xd88] ss:$12 sps:$4 sm:$0xff]  }
 0x3a9   :  { %v4558_v27 = vsel %vm2272_vm6, %v4556_v7, %v4557_v54  ;;  %vm4478_vm14 = vcmp.gt.f32.partialorder %v4460_v10, 0.0  ;;  %v4514_v38 = vmul.f32 %v14479_v18, %v4460_v10  ;;  %v4463_v16 = vadd.f32 %v11486_v24, %v14470_v56 }
 0x3aa   :  { %vm4479_vm15 = vcmp.gt.f32.partialorder %v4461_v4, 0.0  ;;  %v4515_v28 = vmul.f32 %v14484_v50, %v4461_v4  ;;  %v4464_v40 = vadd.f32 %v11487_v15, %v14474_v36  ;;  %v14511_v35 = vpack.c.bf16 %v4558_v27, %v14508_v25  ;;  %v12268_v27 = vld [vmem:[%s16167_s2 + $0xe90] ss:$12 sps:$4 sm:$0xff]  }
 0x3ab   :  { %v4532_v49 = vsel %vm4478_vm14, %v4460_v10, %v4514_v38  ;;  %vm4481_vm3 = vcmp.gt.f32.partialorder %v4463_v16, 0.0  ;;  %v4517_v3 = vmul.f32 %v14479_v18, %v4463_v16  ;;  %v14518_v17 = vpack.c.bf16 %v4555_v26, %v14508_v25 }
 0x3ac   :  { %v4562_v43 = vrot.slane %v4532_v49, 7  ;;  %v4533_v45 = vsel %vm4479_vm15, %v4461_v4, %v4515_v28  ;;  %vm4482_vm4 = vcmp.gt.f32.partialorder %v4464_v40, 0.0  ;;  %v4518_v14 = vmul.f32 %v14484_v50, %v4464_v40  ;;  %v4277_v47 = vpop.f32.mrb[88].mxu1  ;;  %5926 = vmatprep.mubr.bf16.mxu1 %v14511_v35 }
 0x3ad   :  { %v4564_v0 = vrot.slane %v4533_v45, 7  ;;  %v4535_v51 = vsel %vm4481_vm3, %v4463_v16, %v4517_v3  ;;  %v11488_v9 = vadd.f32 %v4277_v47, %v14288_v37  ;;  %v4279_v6 = vpop.f32.mrb[89].mxu1  ;;  %5927 = vmatmul.mubr.bf16.vlgmr.msra.gmra.mrb[128].mxu1 %v14518_v17  ;;  %v4808_v22 = vshrl.u32 %v14511_v35, 16  ;;  %v12272_v47 = vld [vmem:[%s16167_s2 + $0xdd0] ss:$12 sps:$4 sm:$0xff]  }
 0x3ae   :  { %v4563_v19 = vsel %vm2272_vm6, %v4554_v2, %v4562_v43  ;;  %v4589_v58 = vrot.slane %v4535_v51, 7  ;;  %v4536_v32 = vsel %vm4482_vm4, %v4464_v40, %v4518_v14  ;;  %v11489_v33 = vadd.f32 %v4279_v6, %v14291_v44  ;;  %v4281_v8 = vpop.f32.mrb[90].mxu1  ;;  %11117 = vmatpush3.bf16.msra.mxu1 %v12257_v34  ;;  %v12266_v2 = vld [vmem:[%s16167_s2 + $0xe78] ss:$12 sps:$4 sm:$0xff]  }
 0x3af   :  { %v4565_v62 = vsel %vm2272_vm6, %v4557_v54, %v4564_v0  ;;  %v4592_v37 = vrot.slane %v4536_v32, 7  ;;  %v4466_v5 = vadd.f32 %v11488_v9, %v14470_v56  ;;  %v11490_v20 = vadd.f32 %v4281_v8, %v14293_v46  ;;  %v4283_v57 = vpop.f32.mrb[91].mxu1  ;;  %11118 = vmatprep.subr.bf16.mxu1 %v12261_v21 }
 0x3b0   :  { %v4467_v44 = vadd.f32 %v11489_v33, %v14474_v36  ;;  %v11491_v41 = vadd.f32 %v4283_v57, %v14295_v31  ;;  %v14542_v11 = vpack.c.bf16 %v14508_v25, %v4565_v62  ;;  %v14545_v7 = vpack.c.bf16 %v14508_v25, %v4563_v19  ;;  %v12267_v31 = vld [vmem:[%s16167_s2 + $0xdb8] ss:$12 sps:$4 sm:$0xff]  }
 0x3b1   :  { %vm4484_vm5 = vcmp.gt.f32.partialorder %v4466_v5, 0.0  ;;  %v4520_v54 = vmul.f32 %v14479_v18, %v4466_v5  ;;  %v4469_v46 = vadd.f32 %v11490_v20, %v14470_v56  ;;  %v4810_v10 = vshll.u32 %v14511_v35, 16  ;;  %v12274_v20 = vld [vmem:[%s16167_s2 + $0xde8] ss:$12 sps:$4 sm:$0xff]  }
 0x3b2   :  { %vm4485_vm7 = vcmp.gt.f32.partialorder %v4467_v44, 0.0  ;;  %v4521_v24 = vmul.f32 %v14484_v50, %v4467_v44  ;;  %v4470_v61 = vadd.f32 %v11491_v41, %v14474_v36  ;;  %5934 = vmatprep.mubr.bf16.mxu1 %v14542_v11  ;;  %11119 = vmatpush3.bf16.msra.mxu1 %v12262_v39  ;;  %v4815_v26 = vshll.u32 %v14542_v11, 16 }
 0x3b3   :  { %v4538_v4 = vsel %vm4484_vm5, %v4466_v5, %v4520_v54  ;;  %vm4487_vm8 = vcmp.gt.f32.partialorder %v4469_v46, 0.0  ;;  %v4523_v56 = vmul.f32 %v14479_v18, %v4469_v46  ;;  %11120 = vmatprep.subr.bf16.mxu1 %v12266_v2  ;;  %v4812_v15 = vrot.slane %v4810_v10, 1  ;;  %v12269_v2 = vld [vmem:[%s16167_s2 + $0xd50] ss:$12 sps:$4 sm:$0xff]  }
 0x3b4   :  { %v4590_v36 = vrot.slane %v4538_v4, 7  ;;  %v4539_v38 = vsel %vm4485_vm7, %v4467_v44, %v4521_v24  ;;  %vm4488_vm9 = vcmp.gt.f32.partialorder %v4470_v61, 0.0  ;;  %v4524_v16 = vmul.f32 %v14484_v50, %v4470_v61  ;;  %v4287_v28 = vpop.f32.mrb[120].mxu1  ;;  %v12275_v44 = vld [vmem:[%s16167_s2 + $0xec0] ss:$12 sps:$4 sm:$0xff]  }
 0x3b5   :  { %v4593_v40 = vrot.slane %v4539_v38, 7  ;;  %v4541_v34 = vsel %vm4487_vm8, %v4469_v46, %v4523_v56  ;;  %v4288_v49 = vpop.f32.mrb[121].mxu1  ;;  %5935 = vmatmul.mubr.bf16.gmra.mrb[132].mxu1 %v14545_v7  ;;  %v4813_v3 = vor.u32 %v4812_v15, %v4808_v22  ;;  %v4817_v21 = vrot.slane %v4815_v26, 1  ;;  %v12273_v22 = vld [vmem:[%s16167_s2 + $0xea8] ss:$12 sps:$4 sm:$0xff]  }
 0x3b6   :  { %v4591_v18 = vsel %vm2272_vm6, %v4589_v58, %v4590_v36  ;;  %v4598_v43 = vrot.slane %v4541_v34, 7  ;;  %v4542_v45 = vsel %vm4488_vm9, %v4470_v61, %v4524_v16  ;;  %v4289_v14 = vpop.f32.mrb[122].mxu1  ;;  %11121 = vmatpush3.bf16.msra.mxu1 %v12267_v31  ;;  %v4798_v6 = vshll.u32 %v14518_v17, 16  ;;  %v12282_v4 = vld [vmem:[%s16167_s2 + $0xd6c] ss:$12 sps:$4 sm:$0xff]  }
 0x3b7   :  { %v4594_v50 = vsel %vm2272_vm6, %v4592_v37, %v4593_v40  ;;  %v4600_v0 = vrot.slane %v4542_v45, 7  ;;  %v4290_v51 = vpop.f32.mrb[123].mxu1  ;;  %v14569_v9 = vsel %vm234_vm1, %v4813_v3, %v4817_v21  ;;  %11122 = vmatprep.subr.bf16.mxu1 %v12268_v27  ;;  %v4803_v58 = vshll.u32 %v14545_v7, 16  ;;  %v12276_v27 = vld [vmem:[%s16167_s2 + $0xe00] ss:$12 sps:$4 sm:$0xff]  }
 0x3b8   :  { %v4599_v19 = vsel %vm2272_vm6, %v4590_v36, %v4598_v43  ;;  %5228 = vmatprep.mubr.bf16.mxu0 %v14569_v9  ;;  %v14580_v32 = vpack.c.bf16 %v14508_v25, %v14508_v25  ;;  %v4796_v8 = vshrl.u32 %v14518_v17, 16  ;;  %v4800_v39 = vrot.slane %v4798_v6, 1  ;;  %v12280_v34 = vld [vmem:[%s16167_s2 + $0xd68] ss:$12 sps:$4 sm:$0xff]  }
 0x3b9   :  { %v4601_v33 = vsel %vm2272_vm6, %v4593_v40, %v4600_v0  ;;  %v14584_v62 = vpack.c.bf16 %v4599_v19, %v4591_v18  ;;  %v4805_v37 = vrot.slane %v4803_v58, 1  ;;  %v14593_v57 = vrot.slane %v14461_v13, %v13565_v23  ;;  %v12277_v40 = vld [vmem:[%s16167_s2 + $0xed8] ss:$12 sps:$4 sm:$0xff]  }
 0x3ba   :  { %11123 = vmatpush3.bf16.msra.mxu1 %v12272_v47  ;;  %v14586_v5 = vpack.c.bf16 %v4601_v33, %v4594_v50  ;;  %v4801_v25 = vor.u32 %v4800_v39, %v4796_v8  ;;  %v4867_v41 = vshll.u32 %v14580_v32, 16  ;;  %v4839_v46 = vshrl.u32 %v14542_v11, 16  ;;  %v12284_v18 = vld [vmem:[%s16167_s2 + $0xc98] ss:$12 sps:$4 sm:$0xff]  }
 0x3bb   :  { %11124 = vmatprep.subr.bf16.mxu1 %v12273_v22  ;;  %v14608_v24 = vrot.slane %v14466_v52, %v13565_v23  ;;  %v4835_v26 = vshll.u32 %v14584_v62, 16  ;;  %v4831_v45 = vshrl.u32 %v14545_v7, 16  ;;  %v12278_v50 = vld [vmem:[%s16167_s2 + $0xe18] ss:$12 sps:$4 sm:$0xff]   ;;  %v6109_v0 = vrot.slane %v14542_v11, 1 }
 0x3bc   :  { %v11366_v54 = vpop.f32.mrb[96].mxu1  ;;  %5942 = vmatprep.mubr.bf16.mxu1 %v14586_v5  ;;  %v4843_v13 = vshll.u32 %v14586_v5, 16  ;;  %v14611_v31 = vsel %vm234_vm1, %v4801_v25, %v4805_v37  ;;  %v4863_v36 = vshrl.u32 %v14586_v5, 16  ;;  %v6108_v19 = vrot.slane %v14511_v35, 1 }
 0x3bd   :  { %v11494_v10 = vadd.f32 %v14434_v53, %v11366_v54  ;;  %v4389_v61 = vpop.f32.mrb[97].mxu1  ;;  %5943 = vmatmul.mubr.bf16.gmra.mrb[136].mxu1 %v14584_v62  ;;  %5229 = vmatmul.mubr.bf16.vlgmr.msra.gmra.mrb[108].mxu0 %v14611_v31  ;;  %v4841_v53 = vor.u32 %v4839_v46, %v4817_v21  ;;  %v4837_v14 = vrot.slane %v4835_v26, 1  ;;  %v4833_v6 = vor.u32 %v4831_v45, %v4805_v37 }
 0x3be   :  { %v11497_v56 = vadd.f32 %v14410_v60, %v4389_v61  ;;  %v11367_v15 = vpop.f32.mrb[98].mxu1  ;;  %11125 = vmatpush3.bf16.msra.mxu1 %v12274_v20  ;;  %v4845_v52 = vrot.slane %v4843_v13, 1  ;;  %5266 = vmatpush1.bf16.msra.mxu0 %v12269_v2  ;;  %v14626_v60 = vrot.slane %v4867_v41, 1  ;;  %v12279_v20 = vld [vmem:[%s16167_s2 + $0xef0] ss:$12 sps:$4 sm:$0xff]   ;;  %v4882_v2 = vshrl.u32 %v14580_v32, 16 }
 0x3bf   :  { %v4462_v38 = vadd.f32 %v11494_v10, %v14593_v57  ;;  %v11500_v16 = vadd.f32 %v14437_v30, %v11367_v15  ;;  %v4392_v28 = vpop.f32.mrb[99].mxu1  ;;  %11126 = vmatprep.subr.bf16.mxu1 %v12275_v44  ;;  %5950 = vmatprep.mubr.bf16.mxu1 %v14580_v32  ;;  %v14664_v25 = vsel %vm234_vm1, %v4833_v6, %v4837_v14  ;;  %v4855_v13 = vshrl.u32 %v14584_v62, 16  ;;  %v12283_v10 = vld [vmem:[%s16167_s2 + $0xe30] ss:$12 sps:$4 sm:$0xff]  }
 0x3c0   :  { %v4456_v49 = vadd.f32 %v11497_v56, %v14593_v57  ;;  %v11503_v3 = vadd.f32 %v14416_v12, %v4392_v28  ;;  %v14637_v21 = vsel %vm234_vm1, %v4841_v53, %v4845_v52  ;;  %v4865_v30 = vor.u32 %v4863_v36, %v4845_v52  ;;  %5267 = vmatprep.subr.bf16.mxu0 %v12282_v4 }
 0x3c1   :  { %vm4480_vm10 = vcmp.gt.f32.partialorder %v4462_v38, 0.0  ;;  %v4516_v43 = vmul.f32 %v14608_v24, %v4462_v38  ;;  %5238 = vmatprep.mubr.bf16.mxu0 %v14637_v21  ;;  %v4465_v51 = vadd.f32 %v11500_v16, %v14593_v57  ;;  %v14671_v46 = vsel %vm1545_vm2, %v6108_v19, %v6109_v0 }
 0x3c2   :  { %vm4474_vm11 = vcmp.gt.f32.partialorder %v4456_v49, 0.0  ;;  %v4510_v12 = vmul.f32 %v14608_v24, %v4456_v49  ;;  %v4459_v47 = vadd.f32 %v11503_v3, %v14593_v57  ;;  %11127 = vmatpush3.bf16.msra.mxu1 %v12276_v27  ;;  %v14655_v22 = vsel %vm234_vm1, %v4865_v30, %v14626_v60  ;;  %5268 = vmatpush1.bf16.msra.mxu0 %v12280_v34 }
 0x3c3   :  { %11128 = vmatprep.subr.bf16.mxu1 %v12277_v40  ;;  %v4534_v58 = vsel %vm4480_vm10, %v4462_v38, %v4516_v43  ;;  %11024 = vmatprep.subr.bf16.mxu0 %v12284_v18  ;;  %v4519_v4 = vmul.f32 %v14608_v24, %v4465_v51  ;;  %vm4483_vm13 = vcmp.gt.f32.partialorder %v4465_v51, 0.0  ;;  %v6106_v52 = vrot.slane %v14545_v7, 1 }
 0x3c4   :  { %v4528_v33 = vsel %vm4474_vm11, %v4456_v49, %v4510_v12  ;;  %vm4477_vm12 = vcmp.gt.f32.partialorder %v4459_v47, 0.0  ;;  %v4513_v8 = vmul.f32 %v14608_v24, %v4459_v47  ;;  %v11370_v39 = vpop.f32.mrb[124].mxu1  ;;  %v4566_v61 = vrot.slane %v4534_v58, 7  ;;  %v4618_v12 = vld [vmem:[#allocation2 + $0x10] sm:$0xff] }
 0x3c5   :  { %v4405_v37 = vpop.f32.mrb[125].mxu1  ;;  %5951 = vmatmul.mubr.bf16.gmra.mrb[140].mxu1 %v14580_v32  ;;  %5239 = vmatmul.mubr.bf16.gmra.mrb[112].mxu0 %v14664_v25  ;;  %v4559_v26 = vrot.slane %v4528_v33, 7  ;;  %v4857_v38 = vor.u32 %v4855_v13, %v4837_v14  ;;  %v6116_v16 = vrot.slane %v14586_v5, 1  ;;  %v4537_v40 = vsel %vm4483_vm13, %v4465_v51, %v4519_v4 }
 0x3c6   :  { %v4531_v44 = vsel %vm4477_vm12, %v4459_v47, %v4513_v8  ;;  %v4406_v41 = vadd.f32 %v14445_v55, %v4405_v37  ;;  %v11371_v54 = vpop.f32.mrb[126].mxu1  ;;  %11129 = vmatpush3.bf16.msra.mxu1 %v12278_v50  ;;  %5248 = vmatprep.mubr.bf16.mxu0 %v14655_v22  ;;  %v14692_v34 = vor.u32 %v4882_v2, %v14626_v60  ;;  %v6114_v50 = vrot.slane %v14584_v62, 1 }
 0x3c7   :  { %v4560_v56 = vrot.slane %v4531_v44, 7  ;;  %v4408_v15 = vpop.f32.mrb[127].mxu1  ;;  %6604 = vmatprep.mubr.bf16.mxu1 %v14671_v46  ;;  %11130 = vmatprep.subr.bf16.mxu1 %v12279_v20  ;;  %v14701_v18 = vsel %vm234_vm1, %v4857_v38, %v14626_v60  ;;  %v4627_v60 = vld [vmem:[#allocation2 + $0x58] sm:$0xff]  ;;  %v14714_v6 = vrot.slane %v14580_v32, 1  ;;  %v12288_v38 = vld [vmem:[%s16167_s2 + $0xcc8] ss:$12 sps:$4 sm:$0xff]  }
 0x3c8   :  { %v4432_v55 = vadd.f32 %v4406_v41, %v14450_v63  ;;  %v4409_v53 = vadd.f32 %v14447_v29, %v4408_v15  ;;  %v6105_v29 = vrot.slane %v14518_v17, 1  ;;  %v14724_v39 = vsel %vm1545_vm2, %v6106_v52, %v6114_v50  ;;  %v12286_v15 = vld [vmem:[%s16167_s2 + $0xcb0] ss:$12 sps:$4 sm:$0xff]  }
 0x3c9   :  { %v4561_v27 = vsel %vm2272_vm6, %v4559_v26, %v4560_v56  ;;  %v4567_v36 = vsel %vm2272_vm6, %v4560_v56, %v4566_v61  ;;  %v14730_v37 = vsel %vm1545_vm2, %v6116_v16, %v14714_v6  ;;  %v12285_v61 = vld [vmem:[%s16167_s2 + $0xbd8] ss:$12 sps:$4 sm:$0xff]   ;;  %v14745_v56 = vsel %vm1545_vm2, %v6114_v50, %v14714_v6 }
 0x3ca   :  { %4576 = vst.msk [vmem:[#allocation2 + $0x28] sm:$0xff] %vm23_vm0, %v4561_v27  ;;  %4579 = vst.msk [vmem:[#allocation2 + $0x40] sm:$0xff] %vm23_vm0, %v4567_v36  ;;  %v4468_v28 = vadd.f32 %v14593_v57, %v4432_v55  ;;  %v4435_v63 = vadd.f32 %v4409_v53, %v14453_v48  ;;  %11131 = vmatpush3.bf16.msra.mxu1 %v12283_v10  ;;  %v14697_v30 = vsel %vm1545_vm2, %v6105_v29, %v6106_v52  ;;  %v12287_v52 = vld [vmem:[%s16167_s2 + $0xbf0] ss:$12 sps:$4 sm:$0xff]   ;;  %v12289_v29 = vld [vmem:[%s16167_s2 + $0xc08] ss:$12 sps:$4 sm:$0xff]  }
 0x3cb   :  { %v14705_v48 = vsel %vm1545_vm2, %v6109_v0, %v6116_v16  ;;  %v4636_v16 = vld [vmem:[#allocation2 + $0xa0] sm:$0xff] }
 0x3cc   :  { %vm4486_vm14 = vcmp.gt.f32.partialorder %v4468_v28, 0.0  ;;  %v4522_v49 = vmul.f32 %v14608_v24, %v4468_v28  ;;  %v4471_v3 = vadd.f32 %v14593_v57, %v4435_v63  ;;  %v4595_v57 = vrot.slane %v4537_v40, 7 }
 0x3cd   :  { %6605 = vmatmul.mubr.bf16.vlgmr.msra.gmra.mrb[144].mxu1 %v14697_v30  ;;  %5249 = vmatmul.mubr.bf16.gmra.mrb[116].mxu0 %v14701_v18  ;;  %v14769_v40 = vpack.c.bf16 %v4636_v16, %v4636_v16  ;;  %v12334_v16 = vld [vmem:[%s16167_s2 + $0xb14] ss:$12 sps:$4 sm:$0xff]  }
 0x3ce   :  { %v4540_v43 = vsel %vm4486_vm14, %v4468_v28, %v4522_v49  ;;  %vm4489_vm15 = vcmp.gt.f32.partialorder %v4471_v3, 0.0  ;;  %v4525_v45 = vmul.f32 %v14608_v24, %v4471_v3  ;;  %6612 = vmatprep.mubr.bf16.mxu1 %v14705_v48  ;;  %5258 = vmatprep.mubr.bf16.mxu0 %v14692_v34  ;;  %v12290_v49 = vld [vmem:[%s16167_s2 + $0xce0] ss:$12 sps:$4 sm:$0xff]  }
 0x3cf   :  { %v4596_v14 = vrot.slane %v4540_v43, 7  ;;  %v12291_v43 = vld [vmem:[%s16167_s2 + $0xc20] ss:$12 sps:$4 sm:$0xff]  }
 0x3d0   :  { %v4543_v47 = vsel %vm4489_vm15, %v4471_v3, %v4525_v45  ;;  %v4875_v3 = vshll.u32 %v14769_v40, 16 }
 0x3d1   :  { %v4597_v0 = vsel %vm2272_vm6, %v4595_v57, %v4596_v14  ;;  %v4602_v51 = vrot.slane %v4543_v47, 7  ;;  %v4621_v24 = vld [vmem:[#allocation2 + $0x28] sm:$0xff]  ;;  %v4624_v19 = vld [vmem:[#allocation2 + $0x40] sm:$0xff]  ;;  %v12294_v47 = vld [vmem:[%s16167_s2 + $0xd10] ss:$12 sps:$4 sm:$0xff]  }
 0x3d2   :  { %4612 = vst.msk [vmem:[#allocation2 + $0x70] sm:$0xff] %vm23_vm0, %v4597_v0  ;;  %v14717_v58 = vpack.c.bf16 %v4621_v24, %v4618_v12  ;;  %v14719_v33 = vpack.c.bf16 %v4627_v60, %v4624_v19  ;;  %v12292_v57 = vld [vmem:[%s16167_s2 + $0xcf8] ss:$12 sps:$4 sm:$0xff]   ;;  %v4877_v12 = vrot.slane %v4875_v3, 1  ;;  %v4885_v0 = vshrl.u32 %v14769_v40, 16 }
 0x3d3   :  { %v4603_v8 = vsel %vm2272_vm6, %v4596_v14, %v4602_v51  ;;  %v12293_v60 = vld [vmem:[%s16167_s2 + $0xc38] ss:$12 sps:$4 sm:$0xff]   ;;  %v12295_v51 = vld [vmem:[%s16167_s2 + $0xc50] ss:$12 sps:$4 sm:$0xff]   ;;  %v12296_v24 = vld [vmem:[%s16167_s2 + $0xd28] ss:$12 sps:$4 sm:$0xff]  }
 0x3d4   :  { %4615 = vst.msk [vmem:[#allocation2 + $0x88] sm:$0xff] %vm23_vm0, %v4603_v8  ;;  %v4822_v20 = vshll.u32 %v14717_v58, 16  ;;  %v4827_v2 = vshll.u32 %v14719_v33, 16  ;;  %v4820_v44 = vshrl.u32 %v14717_v58, 16  ;;  %v4847_v27 = vshrl.u32 %v14719_v33, 16 }
 0x3d5   :  { %6613 = vmatmul.mubr.bf16.gmra.mrb[148].mxu1 %v14724_v39  ;;  %5259 = vmatmul.mubr.bf16.gmra.mrb[120].mxu0 %v14692_v34  ;;  %v4887_v19 = vor.u32 %v4885_v0, %v4877_v12  ;;  %v12297_v8 = vld [vmem:[%s16167_s2 + $0xc68] ss:$12 sps:$4 sm:$0xff]   ;;  %v12338_v3 = vld [vmem:[%s16167_s2 + $0xb40] ss:$12 sps:$4 sm:$0xff]  }
 0x3d6   :  { %6620 = vmatprep.mubr.bf16.mxu1 %v14730_v37  ;;  %v4824_v41 = vrot.slane %v4822_v20, 1  ;;  %5297 = vmatprep.mubr.bf16.mxu0 %v12633_v1  ;;  %v4829_v13 = vrot.slane %v4827_v2, 1  ;;  %v12298_v20 = vld [vmem:[%s16167_s2 + $0xd40] ss:$12 sps:$4 sm:$0xff]   ;;  %v12355_v0 = vld [vmem:[%s16167_s2 + $0xbbc] ss:$12 sps:$4 sm:$0xff]  }
 0x3d7   :  { %v12299_v2 = vld [vmem:[%s16167_s2 + $0xc80] ss:$12 sps:$4 sm:$0xff]  }
 0x3d8   :  { %v4825_v54 = vor.u32 %v4824_v41, %v4820_v44  ;;  %v4849_v28 = vor.u32 %v4847_v27, %v4829_v13  ;;  %v12300_v44 = vld [vmem:[%s16167_s2 + $0xd58] ss:$12 sps:$4 sm:$0xff]   ;;  %v12301_v41 = vld [vmem:[%s16167_s2 + $0xd70] ss:$12 sps:$4 sm:$0xff]   ;;  %v12326_v27 = vld [vmem:[%s16167_s2 + $0xae0] ss:$12 sps:$4 sm:$0xff]  }
 0x3d9   :  { %v4630_v26 = vld [vmem:[#allocation2 + $0x70] sm:$0xff] }
 0x3da   :  { %v14738_v10 = vsel %vm234_vm1, %v4825_v54, %v4829_v13  ;;  %v12311_v54 = vld [vmem:[%s16167_s2 + $0xa68] ss:$12 sps:$4 sm:$0xff]   ;;  %v12316_v13 = vld [vmem:[%s16167_s2 + $0xa84] ss:$12 sps:$4 sm:$0xff]  }
 0x3db   :  { %v4633_v4 = vld [vmem:[#allocation2 + $0x88] sm:$0xff] }
 0x3dc   :  { %v14750_v55 = vpack.c.bf16 %v4633_v4, %v4630_v26  ;;  %v12322_v26 = vld [vmem:[%s16167_s2 + $0xab4] ss:$12 sps:$4 sm:$0xff]   ;;  %v12320_v4 = vld [vmem:[%s16167_s2 + $0xab0] ss:$12 sps:$4 sm:$0xff]  }
 0x3dd   :  { %6621 = vmatmul.mubr.bf16.gmra.mrb[152].mxu1 %v14745_v56  ;;  %10127 = vmatmul.mubr.msk.bf16.vlgmr.msra.gmra.mrb[108].mxu0 %vm23_vm0, %v14738_v10 }
 0x3de   :  { %v4851_v53 = vshll.u32 %v14750_v55, 16  ;;  %6628 = vmatprep.mubr.bf16.mxu1 %v14714_v6  ;;  %11025 = vmatpush3.bf16.msra.mxu0 %v12285_v61  ;;  %v4871_v45 = vshrl.u32 %v14750_v55, 16  ;;  %v12319_v61 = vld [vmem:[%s16167_s2 + $0xa9c] ss:$12 sps:$4 sm:$0xff]  }
 0x3df   :  { %5307 = vmatprep.mubr.bf16.mxu0 %v12633_v1  ;;  %11026 = vmatprep.subr.bf16.mxu0 %v12286_v15  ;;  %v12325_v15 = vld [vmem:[%s16167_s2 + $0xacc] ss:$12 sps:$4 sm:$0xff]  }
 0x3e0   :  { %v4853_v36 = vrot.slane %v4851_v53, 1  ;;  %v12323_v53 = vld [vmem:[%s16167_s2 + $0xac8] ss:$12 sps:$4 sm:$0xff]  }
 0x3e2   :  { %11027 = vmatpush3.bf16.msra.mxu0 %v12287_v52  ;;  %v4854_v63 = vsel %vm234_vm1, %v4849_v28, %v4853_v36  ;;  %v4873_v14 = vor.u32 %v4871_v45, %v4853_v36  ;;  %v12328_v52 = vld [vmem:[%s16167_s2 + $0xae4] ss:$12 sps:$4 sm:$0xff]   ;;  %v12331_v36 = vld [vmem:[%s16167_s2 + $0xafc] ss:$12 sps:$4 sm:$0xff]  }
 0x3e3   :  { %11028 = vmatprep.subr.bf16.mxu0 %v12288_v38  ;;  %v12329_v38 = vld [vmem:[%s16167_s2 + $0xaf8] ss:$12 sps:$4 sm:$0xff]   ;;  %v12332_v28 = vld [vmem:[%s16167_s2 + $0xb10] ss:$12 sps:$4 sm:$0xff]  }
 0x3e4   :  { %v4878_v50 = vsel %vm234_vm1, %v4873_v14, %v4877_v12  ;;  %v12341_v45 = vld [vmem:[%s16167_s2 + $0xb58] ss:$12 sps:$4 sm:$0xff]   ;;  %v12344_v14 = vld [vmem:[%s16167_s2 + $0xb70] ss:$12 sps:$4 sm:$0xff]  }
 0x3e5   :  { %6629 = vmatmul.mubr.bf16.gmra.mrb[156].mxu1 %v14714_v6  ;;  %10128 = vmatmul.mubr.msk.bf16.gmra.mrb[112].mxu0 %vm23_vm0, %v4854_v63  ;;  %v12349_v12 = vld [vmem:[%s16167_s2 + $0xb8c] ss:$12 sps:$4 sm:$0xff]  }
 0x3e6   :  { %11029 = vmatpush3.bf16.msra.mxu0 %v12289_v29  ;;  %5317 = vmatprep.mubr.bf16.mxu0 %v12633_v1  ;;  %v12335_v29 = vld [vmem:[%s16167_s2 + $0xb28] ss:$12 sps:$4 sm:$0xff]  }
 0x3e7   :  { %11030 = vmatprep.subr.bf16.mxu0 %v12290_v49  ;;  %v12340_v49 = vld [vmem:[%s16167_s2 + $0xb44] ss:$12 sps:$4 sm:$0xff]  }
 0x3ea   :  { %11031 = vmatpush3.bf16.msra.mxu0 %v12291_v43  ;;  %v12343_v43 = vld [vmem:[%s16167_s2 + $0xb5c] ss:$12 sps:$4 sm:$0xff]  }
 0x3eb   :  { %11032 = vmatprep.subr.bf16.mxu0 %v12292_v57  ;;  %v12346_v57 = vld [vmem:[%s16167_s2 + $0xb74] ss:$12 sps:$4 sm:$0xff]  }
 0x3ed   :  { %10129 = vmatmul.mubr.msk.bf16.gmra.mrb[116].mxu0 %vm23_vm0, %v4878_v50 }
 0x3ee   :  { %11033 = vmatpush3.bf16.msra.mxu0 %v12293_v60  ;;  %5327 = vmatprep.mubr.bf16.mxu0 %v12633_v1  ;;  %v12347_v60 = vld [vmem:[%s16167_s2 + $0xb88] ss:$12 sps:$4 sm:$0xff]  }
 0x3ef   :  { %11034 = vmatprep.subr.bf16.mxu0 %v12294_v47  ;;  %v12352_v47 = vld [vmem:[%s16167_s2 + $0xba4] ss:$12 sps:$4 sm:$0xff]  }
 0x3f2   :  { %11035 = vmatpush3.bf16.msra.mxu0 %v12295_v51  ;;  %v12353_v51 = vld [vmem:[%s16167_s2 + $0xbb8] ss:$12 sps:$4 sm:$0xff]  }
 0x3f3   :  { %11036 = vmatprep.subr.bf16.mxu0 %v12296_v24  ;;  %v12356_v24 = vld [vmem:[%s16167_s2 + $0xba8] ss:$12 sps:$4 sm:$0xff]  }
 0x3f5   :  { %10130 = vmatmul.mubr.msk.bf16.gmra.mrb[124].mxu0 %vm23_vm0, %v4887_v19 }
 0x3f6   :  { %11037 = vmatpush3.bf16.msra.mxu0 %v12297_v8  ;;  %5366 = vmatprep.mubr.bf16.mxu0 %v14569_v9  ;;  %v12304_v9 = vld [vmem:[%s16167_s2 + $0xa24] ss:$12 sps:$4 sm:$0xff]  }
 0x3f7   :  { %11038 = vmatprep.subr.bf16.mxu0 %v12298_v20 }
 0x3fa   :  { %11039 = vmatpush3.bf16.msra.mxu0 %v12299_v2 }
 0x3fb   :  { %11372 = vmatprep.subr.bf16.mxu0 %v12300_v44 }
 0x3fd   :  { %5367 = vmatmul.mubr.bf16.vlgmr.msra.gmra.mrb[128].mxu0 %v14611_v31  ;;  %v12302_v31 = vld [vmem:[%s16167_s2 + $0xa20] ss:$12 sps:$4 sm:$0xff]  }
 0x3fe   :  { %5374 = vmatprep.mubr.bf16.mxu0 %v14637_v21  ;;  %11373 = vmatpush3.bf16.msra.mxu0 %v12300_v44  ;;  %v12307_v21 = vld [vmem:[%s16167_s2 + $0xa3c] ss:$12 sps:$4 sm:$0xff]  }
 0x3ff   :  { %11374 = vmatprep.subr.bf16.mxu0 %v12301_v41 }
 0x402   :  { %11375 = vmatpush3.bf16.msra.mxu0 %v12301_v41 }
 0x403   :  { %5756 = vmatprep.subr.bf16.mxu0 %v12304_v9 }
 0x405   :  { %5375 = vmatmul.mubr.bf16.gmra.mrb[132].mxu0 %v14664_v25  ;;  %v12310_v25 = vld [vmem:[%s16167_s2 + $0xa54] ss:$12 sps:$4 sm:$0xff]  }
 0x406   :  { %5382 = vmatprep.mubr.bf16.mxu0 %v14655_v22  ;;  %v12305_v22 = vld [vmem:[%s16167_s2 + $0xa38] ss:$12 sps:$4 sm:$0xff]  }
 0x40d   :  { %5383 = vmatmul.mubr.bf16.gmra.mrb[136].mxu0 %v14701_v18  ;;  %v12313_v18 = vld [vmem:[%s16167_s2 + $0xa6c] ss:$12 sps:$4 sm:$0xff]  }
 0x40e   :  { %5390 = vmatprep.mubr.bf16.mxu0 %v14692_v34 }
 0x415   :  { %5391 = vmatmul.mubr.bf16.gmra.mrb[140].mxu0 %v14692_v34  ;;  %v12308_v34 = vld [vmem:[%s16167_s2 + $0xa50] ss:$12 sps:$4 sm:$0xff]  }
 0x416   :  { %11376 = vmatprep.mubr.msk.bf16.mxu0 %vm23_vm0, %v14738_v10  ;;  %v12314_v10 = vld [vmem:[%s16167_s2 + $0xa80] ss:$12 sps:$4 sm:$0xff]  }
 0x41d   :  { %11377 = vmatmul.mubr.msk.bf16.vlgmr.msra.gmra.mrb[144].mxu0 %vm23_vm0, %v4854_v63  ;;  %v12337_v63 = vld [vmem:[%s16167_s2 + $0xb2c] ss:$12 sps:$4 sm:$0xff]  }
 0x41e   :  { %5757 = vmatpush1.bf16.msra.mxu0 %v12302_v31  ;;  %11380 = vmatprep.mubr.msk.bf16.mxu0 %vm23_vm0, %v4878_v50  ;;  %v12350_v50 = vld [vmem:[%s16167_s2 + $0xba0] ss:$12 sps:$4 sm:$0xff]  }
 0x41f   :  { %5758 = vmatprep.subr.bf16.mxu0 %v12307_v21 }
 0x422   :  { %5759 = vmatpush1.bf16.msra.mxu0 %v12305_v22 }
 0x423   :  { %5760 = vmatprep.subr.bf16.mxu0 %v12310_v25 }
 0x425   :  { %11381 = vmatmul.mubr.msk.bf16.gmra.mrb[148].mxu0 %vm23_vm0, %v4887_v19 }
 0x426   :  { %5761 = vmatpush1.bf16.msra.mxu0 %v12308_v34  ;;  %5788 = vmatprep.mubr.bf16.mxu0 %v14511_v35  ;;  %v12317_v35 = vld [vmem:[%s16167_s2 + $0xa98] ss:$12 sps:$4 sm:$0xff]  }
 0x427   :  { %5762 = vmatprep.subr.bf16.mxu0 %v12313_v18 }
 0x42a   :  { %5763 = vmatpush1.bf16.msra.mxu0 %v12311_v54 }
 0x42b   :  { %5764 = vmatprep.subr.bf16.mxu0 %v12316_v13 }
 0x42e   :  { %5765 = vmatpush1.bf16.msra.mxu0 %v12314_v10 }
 0x42f   :  { %5766 = vmatprep.subr.bf16.mxu0 %v12319_v61 }
 0x432   :  { %5767 = vmatpush1.bf16.msra.mxu0 %v12317_v35  ;;  %v12358_v35 = vld [vmem:[%s16167_s2 + $0xd80] ss:$12 sps:$4 sm:$0xff]  }
 0x433   :  { %5768 = vmatprep.subr.bf16.mxu0 %v12322_v26 }
 0x436   :  { %5769 = vmatpush1.bf16.msra.mxu0 %v12320_v4  ;;  %v12363_v4 = vld [vmem:[%s16167_s2 + $0xd9c] ss:$12 sps:$4 sm:$0xff]  }
 0x437   :  { %5770 = vmatprep.subr.bf16.mxu0 %v12325_v15  ;;  %v12361_v15 = vld [vmem:[%s16167_s2 + $0xd98] ss:$12 sps:$4 sm:$0xff]  }
 0x43a   :  { %5771 = vmatpush1.bf16.msra.mxu0 %v12323_v53  ;;  %v12366_v53 = vld [vmem:[%s16167_s2 + $0xdb4] ss:$12 sps:$4 sm:$0xff]  }
 0x43b   :  { %5772 = vmatprep.subr.bf16.mxu0 %v12328_v52 }
 0x43e   :  { %5773 = vmatpush1.bf16.msra.mxu0 %v12326_v27 }
 0x43f   :  { %5774 = vmatprep.subr.bf16.mxu0 %v12331_v36 }
 0x442   :  { %5775 = vmatpush1.bf16.msra.mxu0 %v12329_v38 }
 0x443   :  { %5776 = vmatprep.subr.bf16.mxu0 %v12334_v16  ;;  %v12364_v16 = vld [vmem:[%s16167_s2 + $0xdb0] ss:$12 sps:$4 sm:$0xff]  }
 0x446   :  { %5777 = vmatpush1.bf16.msra.mxu0 %v12332_v28 }
 0x447   :  { %5778 = vmatprep.subr.bf16.mxu0 %v12337_v63 }
 0x44a   :  { %5779 = vmatpush1.bf16.msra.mxu0 %v12335_v29  ;;  %v12369_v29 = vld [vmem:[%s16167_s2 + $0xdcc] ss:$12 sps:$4 sm:$0xff]  }
 0x44b   :  { %5780 = vmatprep.subr.bf16.mxu0 %v12340_v49  ;;  %v12367_v49 = vld [vmem:[%s16167_s2 + $0xdc8] ss:$12 sps:$4 sm:$0xff]  }
 0x44e   :  { %5781 = vmatpush1.bf16.msra.mxu0 %v12338_v3  ;;  %v12372_v3 = vld [vmem:[%s16167_s2 + $0xde4] ss:$12 sps:$4 sm:$0xff]  }
 0x44f   :  { %5782 = vmatprep.subr.bf16.mxu0 %v12343_v43 }
 0x452   :  { %5783 = vmatpush1.bf16.msra.mxu0 %v12341_v45 }
 0x453   :  { %5784 = vmatprep.subr.bf16.mxu0 %v12346_v57 }
 0x456   :  { %5785 = vmatpush1.bf16.msra.mxu0 %v12344_v14 }
 0x457   :  { %5786 = vmatprep.subr.bf16.mxu0 %v12349_v12 }
 0x45a   :  { %5787 = vmatpush1.bf16.msra.mxu0 %v12347_v60 }
 0x45b   :  { %5825 = vmatprep.subr.bf16.mxu0 %v12352_v47 }
 0x45d   :  { %5789 = vmatmul.mubr.bf16.vlgmr.msra.gmra.mrb[108].mxu0 %v14518_v17  ;;  %v12357_v17 = vld [vmem:[%s16167_s2 + $0xbc0] ss:$12 sps:$4 sm:$0xff]  }
 0x45e   :  { %5798 = vmatprep.mubr.bf16.mxu0 %v14542_v11  ;;  %5826 = vmatpush1.bf16.msra.mxu0 %v12350_v50 }
 0x45f   :  { %5827 = vmatprep.subr.bf16.mxu0 %v12355_v0 }
 0x462   :  { %5828 = vmatpush1.bf16.msra.mxu0 %v12353_v51 }
 0x463   :  { %11384 = vmatprep.subr.bf16.mxu0 %v12356_v24 }
 0x465   :  { %5799 = vmatmul.mubr.bf16.gmra.mrb[112].mxu0 %v14545_v7  ;;  %v12360_v7 = vld [vmem:[%s16167_s2 + $0xd84] ss:$12 sps:$4 sm:$0xff]  }
 0x466   :  { %5808 = vmatprep.mubr.bf16.mxu0 %v14586_v5 }
 0x46d   :  { %5809 = vmatmul.mubr.bf16.gmra.mrb[116].mxu0 %v14584_v62 }
 0x46e   :  { %5818 = vmatprep.mubr.bf16.mxu0 %v14580_v32 }
 0x475   :  { %5819 = vmatmul.mubr.bf16.gmra.mrb[152].mxu0 %v14580_v32 }
 0x476   :  { %5857 = vmatprep.mubr.bf16.mxu0 %v12633_v1 }
 0x47d   :  { %10189 = vmatmul.mubr.msk.bf16.vlgmr.msra.gmra.mrb[108].mxu0 %vm23_vm0, %v14717_v58 }
 0x47e   :  { %11385 = vmatpush3.bf16.msra.mxu0 %v12356_v24  ;;  %5867 = vmatprep.mubr.bf16.mxu0 %v12633_v1  ;;  %v12375_v24 = vld [vmem:[%s16167_s2 + $0xdfc] ss:$12 sps:$4 sm:$0xff]  }
 0x47f   :  { %11386 = vmatprep.subr.bf16.mxu0 %v12357_v17 }
 0x480   :  { %v11086_v11 = vpop.f32.mrb[128].mxu1 }
 0x481   :  { %v11087_v62 = vpop.f32.mrb[129].mxu1 }
 0x482   :  { %v14959_v32 = vadd.f32 %v11087_v62, %v11086_v11  ;;  %v11089_v5 = vpop.f32.mrb[130].mxu1  ;;  %11387 = vmatpush3.bf16.msra.mxu0 %v12357_v17  ;;  %v12373_v17 = vld [vmem:[%s16167_s2 + $0xdf8] ss:$12 sps:$4 sm:$0xff]   ;;  %v12378_v11 = vld [vmem:[%s16167_s2 + $0xe14] ss:$12 sps:$4 sm:$0xff]  }
 0x483   :  { %v11090_v19 = vpop.f32.mrb[131].mxu1  ;;  %6434 = vmatprep.subr.bf16.mxu0 %v12360_v7 }
 0x484   :  { %v14961_v8 = vadd.f32 %v11090_v19, %v11089_v5 }
 0x485   :  { %10190 = vmatmul.mubr.msk.bf16.gmra.mrb[112].mxu0 %vm23_vm0, %v14719_v33 }
 0x486   :  { %5877 = vmatprep.mubr.bf16.mxu0 %v12633_v1 }
 0x488   :  { %v11092_v20 = vpop.f32.mrb[132].mxu1 }
 0x489   :  { %v11093_v2 = vpop.f32.mrb[133].mxu1 }
 0x48a   :  { %v14966_v44 = vadd.f32 %v11093_v2, %v11092_v20  ;;  %v11095_v41 = vpop.f32.mrb[134].mxu1  ;;  %v12376_v20 = vld [vmem:[%s16167_s2 + $0xe10] ss:$12 sps:$4 sm:$0xff]  }
 0x48b   :  { %v11096_v9 = vpop.f32.mrb[135].mxu1 }
 0x48c   :  { %v14968_v31 = vadd.f32 %v11096_v9, %v11095_v41  ;;  %v12381_v9 = vld [vmem:[%s16167_s2 + $0xe2c] ss:$12 sps:$4 sm:$0xff]  }
 0x48d   :  { %10191 = vmatmul.mubr.msk.bf16.gmra.mrb[116].mxu0 %vm23_vm0, %v14750_v55 }
 0x48e   :  { %5887 = vmatprep.mubr.bf16.mxu0 %v12633_v1 }
 0x490   :  { %v11098_v21 = vpop.f32.mrb[136].mxu1 }
 0x491   :  { %v11099_v22 = vpop.f32.mrb[137].mxu1 }
 0x492   :  { %v14973_v25 = vadd.f32 %v11099_v22, %v11098_v21  ;;  %v11101_v34 = vpop.f32.mrb[138].mxu1  ;;  %v12379_v21 = vld [vmem:[%s16167_s2 + $0xe28] ss:$12 sps:$4 sm:$0xff]   ;;  %v12384_v22 = vld [vmem:[%s16167_s2 + $0xe44] ss:$12 sps:$4 sm:$0xff]  }
 0x493   :  { %v11102_v18 = vpop.f32.mrb[139].mxu1 }
 0x494   :  { %v14975_v54 = vadd.f32 %v11102_v18, %v11101_v34 }
 0x495   :  { %10192 = vmatmul.mubr.msk.bf16.gmra.mrb[156].mxu0 %vm23_vm0, %v14769_v40 }
 0x496   :  { %11388 = vmatprep.mubr.msk.bf16.mxu0 %vm23_vm0, %v14717_v58 }
 0x498   :  { %v11104_v13 = vpop.f32.mrb[140].mxu1 }
 0x499   :  { %v11105_v10 = vpop.f32.mrb[141].mxu1 }
 0x49a   :  { %v11107_v61 = vpop.f32.mrb[142].mxu1  ;;  %v12382_v10 = vld [vmem:[%s16167_s2 + $0xe40] ss:$12 sps:$4 sm:$0xff]  }
 0x49b   :  { %v11108_v26 = vpop.f32.mrb[143].mxu1 }
 0x49c   :  { %v12385_v26 = vld [vmem:[%s16167_s2 + $0xe58] ss:$12 sps:$4 sm:$0xff]  }
 0x49d   :  { %11389 = vmatmul.mubr.msk.bf16.vlgmr.msra.gmra.mrb[144].mxu0 %vm23_vm0, %v14719_v33 }
 0x49e   :  { %6435 = vmatpush1.bf16.msra.mxu0 %v12358_v35  ;;  %11392 = vmatprep.mubr.msk.bf16.mxu0 %vm23_vm0, %v14750_v55  ;;  %v12387_v35 = vld [vmem:[%s16167_s2 + $0xe5c] ss:$12 sps:$4 sm:$0xff]  }
 0x49f   :  { %6436 = vmatprep.subr.bf16.mxu0 %v12363_v4  ;;  %v12390_v4 = vld [vmem:[%s16167_s2 + $0xe74] ss:$12 sps:$4 sm:$0xff]  }
 0x4a0   :  { %v11132_v52 = vpop.f32.mrb[144].mxu1 }
 0x4a1   :  { %v11133_v27 = vpop.f32.mrb[145].mxu1 }
 0x4a2   :  { %v14997_v36 = vadd.f32 %v11133_v27, %v11132_v52  ;;  %v11135_v38 = vpop.f32.mrb[146].mxu1  ;;  %6437 = vmatpush1.bf16.msra.mxu0 %v12361_v15  ;;  %v12388_v15 = vld [vmem:[%s16167_s2 + $0xe70] ss:$12 sps:$4 sm:$0xff]   ;;  %v12391_v52 = vld [vmem:[%s16167_s2 + $0xe88] ss:$12 sps:$4 sm:$0xff]  }
 0x4a3   :  { %v11136_v28 = vpop.f32.mrb[147].mxu1  ;;  %6438 = vmatprep.subr.bf16.mxu0 %v12366_v53  ;;  %v12393_v53 = vld [vmem:[%s16167_s2 + $0xe8c] ss:$12 sps:$4 sm:$0xff]   ;;  %v12396_v27 = vld [vmem:[%s16167_s2 + $0xea4] ss:$12 sps:$4 sm:$0xff]  }
 0x4a4   :  { %v15002_v63 = vadd.f32 %v11136_v28, %v11135_v38 }
 0x4a5   :  { %11393 = vmatmul.mubr.msk.bf16.gmra.mrb[160].mxu0 %vm23_vm0, %v14769_v40 }
 0x4a6   :  { %6439 = vmatpush1.bf16.msra.mxu0 %v12364_v16  ;;  %6466 = vmatprep.mubr.bf16.mxu0 %v14671_v46  ;;  %v12370_v46 = vld [vmem:[%s16167_s2 + $0xde0] ss:$12 sps:$4 sm:$0xff]  }
 0x4a7   :  { %6440 = vmatprep.subr.bf16.mxu0 %v12369_v29  ;;  %v12394_v29 = vld [vmem:[%s16167_s2 + $0xea0] ss:$12 sps:$4 sm:$0xff]  }
 0x4a8   :  { %v11138_v43 = vpop.f32.mrb[148].mxu1  ;;  %v5260_v45 = vpop.f32.mrb[120].mxu0 }
 0x4a9   :  { %v11139_v57 = vpop.f32.mrb[149].mxu1  ;;  %v5261_v14 = vpop.f32.mrb[121].mxu0  ;;  %v12402_v45 = vld [vmem:[%s16167_s2 + $0xed4] ss:$12 sps:$4 sm:$0xff]  }
 0x4aa   :  { %v15016_v12 = vadd.f32 %v11139_v57, %v11138_v43  ;;  %v11141_v60 = vpop.f32.mrb[150].mxu1  ;;  %6441 = vmatpush1.bf16.msra.mxu0 %v12367_v49  ;;  %v5262_v47 = vpop.f32.mrb[122].mxu0  ;;  %v12397_v43 = vld [vmem:[%s16167_s2 + $0xeb8] ss:$12 sps:$4 sm:$0xff]  }
 0x4ab   :  { %v11142_v50 = vpop.f32.mrb[151].mxu1  ;;  %v5263_v0 = vpop.f32.mrb[123].mxu0  ;;  %6442 = vmatprep.subr.bf16.mxu0 %v12372_v3  ;;  %v12399_v3 = vld [vmem:[%s16167_s2 + $0xebc] ss:$12 sps:$4 sm:$0xff]  }
 0x4ac   :  { %v15021_v51 = vadd.f32 %v11142_v50, %v11141_v60  ;;  %v12405_v0 = vld [vmem:[%s16167_s2 + $0xeec] ss:$12 sps:$4 sm:$0xff]  }
 0x4ae   :  { %6443 = vmatpush1.bf16.msra.mxu0 %v12370_v46  ;;  %v12400_v46 = vld [vmem:[%s16167_s2 + $0xed0] ss:$12 sps:$4 sm:$0xff]  }
 0x4af   :  { %6444 = vmatprep.subr.bf16.mxu0 %v12375_v24 }
 0x4b0   :  { %v11144_v7 = vpop.f32.mrb[152].mxu1 }
 0x4b1   :  { %v11145_v62 = vpop.f32.mrb[153].mxu1 }
 0x4b2   :  { %v15032_v5 = vadd.f32 %v11145_v62, %v11144_v7  ;;  %v11147_v19 = vpop.f32.mrb[154].mxu1  ;;  %6445 = vmatpush1.bf16.msra.mxu0 %v12373_v17  ;;  %v12403_v7 = vld [vmem:[%s16167_s2 + $0xee8] ss:$12 sps:$4 sm:$0xff]  }
 0x4b3   :  { %v11148_v2 = vpop.f32.mrb[155].mxu1  ;;  %6446 = vmatprep.subr.bf16.mxu0 %v12378_v11 }
 0x4b4   :  { %v15037_v41 = vadd.f32 %v11148_v2, %v11147_v19  ;;  %v12408_v19 = vld [vmem:[%s16167_s2 + $0xf04] ss:$12 sps:$4 sm:$0xff]  }
 0x4b6   :  { %6447 = vmatpush1.bf16.msra.mxu0 %v12376_v20 }
 0x4b7   :  { %6448 = vmatprep.subr.bf16.mxu0 %v12381_v9 }
 0x4b8   :  { %v11150_v34 = vpop.f32.mrb[156].mxu1 }
 0x4b9   :  { %v11151_v18 = vpop.f32.mrb[157].mxu1 }
 0x4ba   :  { %v11153_v13 = vpop.f32.mrb[158].mxu1  ;;  %6449 = vmatpush1.bf16.msra.mxu0 %v12379_v21  ;;  %v12406_v21 = vld [vmem:[%s16167_s2 + $0xf00] ss:$12 sps:$4 sm:$0xff]  }
 0x4bb   :  { %v11154_v61 = vpop.f32.mrb[159].mxu1  ;;  %6450 = vmatprep.subr.bf16.mxu0 %v12384_v22  ;;  %v12409_v13 = vld [vmem:[%s16167_s2 + $0xf18] ss:$12 sps:$4 sm:$0xff]  }
 0x4be   :  { %6451 = vmatpush1.bf16.msra.mxu0 %v12382_v10 }
 0x4bf   :  { %6452 = vmatprep.subr.bf16.mxu0 %v12387_v35 }
 0x4c2   :  { %6453 = vmatpush1.bf16.msra.mxu0 %v12385_v26 }
 0x4c3   :  { %6454 = vmatprep.subr.bf16.mxu0 %v12390_v4 }
 0x4c6   :  { %6455 = vmatpush1.bf16.msra.mxu0 %v12388_v15 }
 0x4c7   :  { %6456 = vmatprep.subr.bf16.mxu0 %v12393_v53 }
 0x4c8   :  { %v5329_v38 = vpop.f32.mrb[124].mxu0 }
 0x4c9   :  { %v5330_v16 = vpop.f32.mrb[125].mxu0  ;;  %v6112_v38 = vrot.slane %v14719_v33, 1  ;;  %v12416_v33 = vld [vmem:[%s16167_s2 + $0x10e4] ss:$12 sps:$4 sm:$0xff]  }
 0x4ca   :  { %6457 = vmatpush1.bf16.msra.mxu0 %v12391_v52  ;;  %v5331_v28 = vpop.f32.mrb[126].mxu0  ;;  %7476 = vmatprep.subr.bf16.mxu1 %v12416_v33  ;;  %v12479_v33 = vld [vmem:[%s16167_s2 + $0x127c] ss:$12 sps:$4 sm:$0xff]  }
 0x4cb   :  { %v5332_v49 = vpop.f32.mrb[127].mxu0  ;;  %6458 = vmatprep.subr.bf16.mxu0 %v12396_v27  ;;  %v6111_v27 = vrot.slane %v14717_v58, 1  ;;  %v12414_v58 = vld [vmem:[%s16167_s2 + $0x10e0] ss:$12 sps:$4 sm:$0xff]  }
 0x4cc   :  { %7477 = vmatpush1.bf16.msra.mxu1 %v12414_v58  ;;  %v12474_v58 = vld [vmem:[%s16167_s2 + $0x1264] ss:$12 sps:$4 sm:$0xff]  }
 0x4cd   :  { %v6113_v49 = vsel %vm1545_vm2, %v6111_v27, %v6112_v38  ;;  %v12459_v27 = vld [vmem:[%s16167_s2 + $0x1248] ss:$12 sps:$4 sm:$0xff]  }
 0x4ce   :  { %6459 = vmatpush1.bf16.msra.mxu0 %v12394_v29  ;;  %v12413_v29 = vld [vmem:[%s16167_s2 + $0xf20] ss:$12 sps:$4 sm:$0xff]  }
 0x4cf   :  { %6460 = vmatprep.subr.bf16.mxu0 %v12399_v3  ;;  %v12419_v3 = vld [vmem:[%s16167_s2 + $0x10fc] ss:$12 sps:$4 sm:$0xff]  }
 0x4d0   :  { %v11040_v57 = vpop.f32.mrb[128].mxu0  ;;  %7478 = vmatprep.subr.bf16.mxu1 %v12419_v3  ;;  %v12482_v3 = vld [vmem:[%s16167_s2 + $0xff8] ss:$12 sps:$4 sm:$0xff]  }
 0x4d1   :  { %v11041_v14 = vpop.f32.mrb[129].mxu0 }
 0x4d2   :  { %6461 = vmatpush1.bf16.msra.mxu0 %v12397_v43  ;;  %v11042_v60 = vadd.f32 %v11041_v14, %v11040_v57  ;;  %v11043_v47 = vpop.f32.mrb[130].mxu0  ;;  %v6118_v43 = vrot.slane %v14750_v55, 1  ;;  %v12422_v57 = vld [vmem:[%s16167_s2 + $0x1114] ss:$12 sps:$4 sm:$0xff]   ;;  %v12425_v55 = vld [vmem:[%s16167_s2 + $0x112c] ss:$12 sps:$4 sm:$0xff]  }
 0x4d3   :  { %v11044_v50 = vpop.f32.mrb[131].mxu0  ;;  %6462 = vmatprep.subr.bf16.mxu0 %v12402_v45  ;;  %v12417_v45 = vld [vmem:[%s16167_s2 + $0x10f8] ss:$12 sps:$4 sm:$0xff]  }
 0x4d4   :  { %v11507_v24 = vadd.f32 %v14959_v32, %v11042_v60  ;;  %v11045_v17 = vadd.f32 %v11044_v50, %v11043_v47  ;;  %v6119_v14 = vsel %vm1545_vm2, %v6112_v38, %v6118_v43  ;;  %7479 = vmatpush1.bf16.msra.mxu1 %v12417_v45  ;;  %v6124_v60 = vrot.slane %v14769_v40, 1  ;;  %v12423_v47 = vld [vmem:[%s16167_s2 + $0x1128] ss:$12 sps:$4 sm:$0xff]  }
 0x4d5   :  { %7480 = vmatprep.subr.bf16.mxu1 %v12422_v57  ;;  %v12431_v40 = vld [vmem:[%s16167_s2 + $0x115c] ss:$12 sps:$4 sm:$0xff]  }
 0x4d6   :  { %v11513_v11 = vadd.f32 %v14961_v8, %v11045_v17  ;;  %6463 = vmatpush1.bf16.msra.mxu0 %v12400_v46  ;;  %v15096_v62 = vadd.f32 %v11507_v24, %v14997_v36  ;;  %v12411_v36 = vld [vmem:[%s16167_s2 + $0xf1c] ss:$12 sps:$4 sm:$0xff]   ;;  %v12428_v46 = vld [vmem:[%s16167_s2 + $0x1144] ss:$12 sps:$4 sm:$0xff]   ;;  %v6125_v50 = vsel %vm1545_vm2, %v6118_v43, %v6124_v60 }
 0x4d7   :  { %6464 = vmatprep.subr.bf16.mxu0 %v12405_v0  ;;  %v12426_v0 = vld [vmem:[%s16167_s2 + $0x1140] ss:$12 sps:$4 sm:$0xff]   ;;  %v12429_v24 = vld [vmem:[%s16167_s2 + $0x1158] ss:$12 sps:$4 sm:$0xff]   ;;  %v12462_v38 = vld [vmem:[%s16167_s2 + $0x11a8] ss:$12 sps:$4 sm:$0xff]  }
 0x4d8   :  { %v11046_v20 = vpop.f32.mrb[132].mxu0  ;;  %v15102_v2 = vadd.f32 %v11513_v11, %v15002_v63  ;;  %v15283_v57 = vld [vmem:[%s16169_s3 + $0x6] sm:$0x7] }
 0x4d9   :  { %v11047_v32 = vpop.f32.mrb[133].mxu0 }
 0x4da   :  { %6465 = vmatpush1.bf16.msra.mxu0 %v12403_v7  ;;  %v11048_v8 = vadd.f32 %v11047_v32, %v11046_v20  ;;  %v11049_v9 = vpop.f32.mrb[134].mxu0  ;;  %v12434_v20 = vld [vmem:[%s16167_s2 + $0x1174] ss:$12 sps:$4 sm:$0xff]  }
 0x4db   :  { %v11050_v22 = vpop.f32.mrb[135].mxu0  ;;  %6503 = vmatprep.subr.bf16.mxu0 %v12408_v19  ;;  %v12432_v19 = vld [vmem:[%s16167_s2 + $0x1170] ss:$12 sps:$4 sm:$0xff]  }
 0x4dc   :  { %v11504_v34 = vadd.f32 %v14966_v44, %v11048_v8  ;;  %v11051_v18 = vadd.f32 %v11050_v22, %v11049_v9  ;;  %v12412_v44 = vld [vmem:[%s16167_s2 + $0xf08] ss:$12 sps:$4 sm:$0xff]   ;;  %v12437_v8 = vld [vmem:[%s16167_s2 + $0x118c] ss:$12 sps:$4 sm:$0xff]  }
 0x4dd   :  { %6467 = vmatmul.mubr.bf16.vlgmr.msra.gmra.mrb[108].mxu0 %v14697_v30  ;;  %v12435_v9 = vld [vmem:[%s16167_s2 + $0x1188] ss:$12 sps:$4 sm:$0xff]   ;;  %v12438_v22 = vld [vmem:[%s16167_s2 + $0x11a0] ss:$12 sps:$4 sm:$0xff]  }
 0x4de   :  { %v11510_v63 = vadd.f32 %v14968_v31, %v11051_v18  ;;  %6476 = vmatprep.mubr.bf16.mxu0 %v14705_v48  ;;  %6504 = vmatpush1.bf16.msra.mxu0 %v12406_v21  ;;  %v15118_v10 = vadd.f32 %v11504_v34, %v15016_v12  ;;  %v12440_v21 = vld [vmem:[%s16167_s2 + $0x11a4] ss:$12 sps:$4 sm:$0xff]   ;;  %v12446_v18 = vld [vmem:[%s16167_s2 + $0x11d4] ss:$12 sps:$4 sm:$0xff]  }
 0x4df   :  { %6505 = vmatprep.subr.bf16.mxu0 %v12411_v36  ;;  %v12443_v36 = vld [vmem:[%s16167_s2 + $0x11bc] ss:$12 sps:$4 sm:$0xff]   ;;  %v12441_v34 = vld [vmem:[%s16167_s2 + $0x11b8] ss:$12 sps:$4 sm:$0xff]  }
 0x4e0   :  { %v11052_v61 = vpop.f32.mrb[136].mxu0  ;;  %v15124_v30 = vadd.f32 %v11510_v63, %v15021_v51  ;;  %v12444_v63 = vld [vmem:[%s16167_s2 + $0x11d0] ss:$12 sps:$4 sm:$0xff]  }
 0x4e1   :  { %v11053_v31 = vpop.f32.mrb[137].mxu0 }
 0x4e2   :  { %v11054_v35 = vadd.f32 %v11053_v31, %v11052_v61  ;;  %v11055_v48 = vpop.f32.mrb[138].mxu0  ;;  %6506 = vmatpush1.bf16.msra.mxu0 %v12409_v13  ;;  %v12449_v13 = vld [vmem:[%s16167_s2 + $0x11ec] ss:$12 sps:$4 sm:$0xff]   ;;  %v12452_v61 = vld [vmem:[%s16167_s2 + $0x1204] ss:$12 sps:$4 sm:$0xff]  }
 0x4e3   :  { %v11056_v26 = vpop.f32.mrb[139].mxu0  ;;  %11396 = vmatprep.subr.bf16.mxu0 %v12412_v44  ;;  %v12450_v31 = vld [vmem:[%s16167_s2 + $0x1200] ss:$12 sps:$4 sm:$0xff]  }
 0x4e4   :  { %v11057_v4 = vadd.f32 %v11056_v26, %v11055_v48  ;;  %v12455_v26 = vld [vmem:[%s16167_s2 + $0x121c] ss:$12 sps:$4 sm:$0xff]  }
 0x4e5   :  { %6477 = vmatmul.mubr.bf16.gmra.mrb[112].mxu0 %v14724_v39 }
 0x4e6   :  { %6486 = vmatprep.mubr.bf16.mxu0 %v14730_v37 }
 0x4e8   :  { %v11058_v12 = vpop.f32.mrb[140].mxu0 }
 0x4e9   :  { %v11059_v15 = vpop.f32.mrb[141].mxu0  ;;  %v12453_v12 = vld [vmem:[%s16167_s2 + $0x1218] ss:$12 sps:$4 sm:$0xff]  }
 0x4ea   :  { %v11061_v53 = vpop.f32.mrb[142].mxu0 }
 0x4eb   :  { %v11062_v52 = vpop.f32.mrb[143].mxu0  ;;  %v12456_v53 = vld [vmem:[%s16167_s2 + $0x1230] ss:$12 sps:$4 sm:$0xff]  }
 0x4ec   :  { %v12458_v52 = vld [vmem:[%s16167_s2 + $0x1234] ss:$12 sps:$4 sm:$0xff]  }
 0x4ed   :  { %6487 = vmatmul.mubr.bf16.gmra.mrb[116].mxu0 %v14745_v56 }
 0x4ee   :  { %6496 = vmatprep.mubr.bf16.mxu0 %v14714_v6 }
 0x4f5   :  { %6497 = vmatmul.mubr.bf16.gmra.mrb[164].mxu0 %v14714_v6 }
 0x4f6   :  { %6535 = vmatprep.mubr.bf16.mxu0 %v12633_v1 }
 0x4f8   :  { %v11382_v51 = vpop.f32.mrb[148].mxu0 }
 0x4f9   :  { %v5447_v39 = vpop.f32.mrb[149].mxu0  ;;  %v12461_v51 = vld [vmem:[%s16167_s2 + $0x124c] ss:$12 sps:$4 sm:$0xff]  }
 0x4fa   :  { %v5448_v16 = vadd.f32 %v11054_v35, %v5447_v39  ;;  %v11383_v37 = vpop.f32.mrb[150].mxu0 }
 0x4fb   :  { %v5450_v28 = vpop.f32.mrb[151].mxu0 }
 0x4fc   :  { %v5451_v56 = vadd.f32 %v11057_v4, %v5450_v28  ;;  %v15139_v6 = vadd.f32 %v14973_v25, %v5448_v16 }
 0x4fd   :  { %10323 = vmatmul.mubr.msk.bf16.vlgmr.msra.gmra.mrb[108].mxu0 %vm23_vm0, %v6113_v49 }
 0x4fe   :  { %6545 = vmatprep.mubr.bf16.mxu0 %v12633_v1  ;;  %11397 = vmatpush3.bf16.msra.mxu0 %v12412_v44  ;;  %v15153_v25 = vadd.f32 %v14975_v54, %v5451_v56  ;;  %v12420_v54 = vld [vmem:[%s16167_s2 + $0x1110] ss:$12 sps:$4 sm:$0xff]   ;;  %v12447_v44 = vld [vmem:[%s16167_s2 + $0x11e8] ss:$12 sps:$4 sm:$0xff]  }
 0x4ff   :  { %11398 = vmatprep.subr.bf16.mxu0 %v12413_v29  ;;  %7481 = vmatpush1.bf16.msra.mxu1 %v12420_v54  ;;  %v15288_v54 = vld [vmem:[%s16170_s4 + $0x6] sm:$0x7] }
 0x500   :  { %7482 = vmatprep.subr.bf16.mxu1 %v12425_v55  ;;  %v15292_v55 = vrot.slane %v15283_v57, %v13618_v59 }
 0x502   :  { %11399 = vmatpush3.bf16.msra.mxu0 %v12413_v29 }
 0x503   :  { %7483 = vmatpush1.bf16.msra.mxu1 %v12423_v47  ;;  %7545 = vmatprep.subr.bf16.mxu0 %v12474_v58  ;;  %v15300_v47 = vrot.slane %v15288_v54, %v13618_v59 }
 0x504   :  { %7484 = vmatprep.subr.bf16.mxu1 %v12428_v46 }
 0x505   :  { %10324 = vmatmul.mubr.msk.bf16.gmra.mrb[112].mxu0 %vm23_vm0, %v6119_v14 }
 0x506   :  { %6555 = vmatprep.mubr.bf16.mxu0 %v12633_v1 }
 0x507   :  { %7485 = vmatpush1.bf16.msra.mxu1 %v12426_v0 }
 0x508   :  { %7486 = vmatprep.subr.bf16.mxu1 %v12431_v40 }
 0x50b   :  { %7487 = vmatpush1.bf16.msra.mxu1 %v12429_v24 }
 0x50c   :  { %7488 = vmatprep.subr.bf16.mxu1 %v12434_v20 }
 0x50d   :  { %10325 = vmatmul.mubr.msk.bf16.gmra.mrb[116].mxu0 %vm23_vm0, %v6125_v50 }
 0x50e   :  { %6565 = vmatprep.mubr.bf16.mxu0 %v12633_v1 }
 0x50f   :  { %7489 = vmatpush1.bf16.msra.mxu1 %v12432_v19 }
 0x510   :  { %7490 = vmatprep.subr.bf16.mxu1 %v12437_v8 }
 0x513   :  { %7491 = vmatpush1.bf16.msra.mxu1 %v12435_v9 }
 0x514   :  { %7492 = vmatprep.subr.bf16.mxu1 %v12440_v21 }
 0x515   :  { %10326 = vmatmul.mubr.msk.bf16.gmra.mrb[168].mxu0 %vm23_vm0, %v6124_v60 }
 0x516   :  { %11400 = vmatprep.mubr.msk.bf16.mxu0 %vm23_vm0, %v6113_v49  ;;  %v12472_v49 = vld [vmem:[%s16167_s2 + $0x1260] ss:$12 sps:$4 sm:$0xff]  }
 0x517   :  { %7493 = vmatpush1.bf16.msra.mxu1 %v12438_v22 }
 0x518   :  { %7494 = vmatprep.subr.bf16.mxu1 %v12443_v36 }
 0x51b   :  { %7495 = vmatpush1.bf16.msra.mxu1 %v12441_v34 }
 0x51c   :  { %7496 = vmatprep.subr.bf16.mxu1 %v12446_v18 }
 0x51d   :  { %11401 = vmatmul.mubr.msk.bf16.vlgmr.msra.gmra.mrb[144].mxu0 %vm23_vm0, %v6119_v14 }
 0x51e   :  { %11404 = vmatprep.mubr.msk.bf16.mxu0 %vm23_vm0, %v6125_v50  ;;  %7546 = vmatpush1.bf16.msra.mxu0 %v12472_v49  ;;  %v15304_v50 = vrot.slane %v15288_v54, %v13625_v42 }
 0x51f   :  { %7497 = vmatpush1.bf16.msra.mxu1 %v12444_v63  ;;  %7547 = vmatprep.subr.bf16.mxu0 %v12479_v33 }
 0x520   :  { %7498 = vmatprep.subr.bf16.mxu1 %v12449_v13 }
 0x523   :  { %7499 = vmatpush1.bf16.msra.mxu1 %v12447_v44 }
 0x524   :  { %7500 = vmatprep.subr.bf16.mxu1 %v12452_v61 }
 0x525   :  { %11405 = vmatmul.mubr.msk.bf16.gmra.mrb[172].mxu0 %vm23_vm0, %v6124_v60  ;;  %v15296_v60 = vrot.slane %v15283_v57, %v13625_v42 }
 0x526   :  { %7577 = vmatprep.mubr.bf16.mxu0 %v12633_v1 }
 0x527   :  { %7501 = vmatpush1.bf16.msra.mxu1 %v12450_v31 }
 0x528   :  { %7502 = vmatprep.subr.bf16.mxu1 %v12455_v26 }
 0x52b   :  { %7503 = vmatpush1.bf16.msra.mxu1 %v12453_v12 }
 0x52c   :  { %7504 = vmatprep.subr.bf16.mxu1 %v12458_v52 }
 0x52f   :  { %7505 = vmatpush1.bf16.msra.mxu1 %v12456_v53 }
 0x530   :  { %7506 = vmatprep.subr.bf16.mxu1 %v12461_v51 }
 0x533   :  { %7507 = vmatpush1.bf16.msra.mxu1 %v12459_v27 }
 0x534   :  { %11162 = vmatprep.subr.bf16.mxu1 %v12462_v38  ;;  %v12632_v38 = vld [vmem:[#allocation2] sm:$0xff] }
 0x548   :  { %v5820_v17 = vpop.f32.mrb[152].mxu0 }
 0x549   :  { %v5821_v11 = vpop.f32.mrb[153].mxu0 }
 0x54a   :  { %v5822_v7 = vpop.f32.mrb[154].mxu0 }
 0x54b   :  { %v5823_v32 = vpop.f32.mrb[155].mxu0 }
 0x568   :  { %v5889_v35 = vpop.f32.mrb[156].mxu0 }
 0x569   :  { %v5890_v48 = vpop.f32.mrb[157].mxu0 }
 0x56a   :  { %v5891_v4 = vpop.f32.mrb[158].mxu0 }
 0x56b   :  { %v5892_v15 = vpop.f32.mrb[159].mxu0 }
 0x578   :  { %v11394_v39 = vpop.f32.mrb[160].mxu0 }
 0x579   :  { %v6007_v16 = vpop.f32.mrb[161].mxu0 }
 0x57a   :  { %v15260_v37 = vadd.f32 %v6007_v16, %v15139_v6  ;;  %v11395_v28 = vpop.f32.mrb[162].mxu0  ;;  %v12477_v6 = vld [vmem:[%s16167_s2 + $0x1278] ss:$12 sps:$4 sm:$0xff]  }
 0x57b   :  { %v6010_v29 = vpop.f32.mrb[163].mxu0  ;;  %7548 = vmatpush1.bf16.msra.mxu0 %v12477_v6 }
 0x57c   :  { %v15263_v56 = vadd.f32 %v6010_v29, %v15153_v25  ;;  %11208 = vmatprep.subr.bf16.mxu0 %v12482_v3 }
 0x5c8   :  { %v6498_v25 = vpop.f32.mrb[164].mxu0 }
 0x5c9   :  { %v6499_v43 = vpop.f32.mrb[165].mxu0 }
 0x5ca   :  { %v6500_v45 = vpop.f32.mrb[166].mxu0 }
 0x5cb   :  { %v6501_v14 = vpop.f32.mrb[167].mxu0 }
 0x5d0   :  { %v6537_v46 = vpop.f32.mrb[108].mxu0 }
 0x5d1   :  { %v6734_v0 = vadd.f32 %v15292_v55, %v6537_v46  ;;  %v6539_v40 = vpop.f32.mrb[109].mxu0 }
 0x5d2   :  { %v6735_v24 = vadd.f32 %v15296_v60, %v6539_v40  ;;  %v6541_v17 = vpop.f32.mrb[110].mxu0 }
 0x5d3   :  { %vm6752_vm3 = vcmp.gt.f32.partialorder %v6734_v0, 0.0  ;;  %v6788_v11 = vmul.f32 %v15300_v47, %v6734_v0  ;;  %v6737_v7 = vadd.f32 %v15292_v55, %v6541_v17  ;;  %v6543_v19 = vpop.f32.mrb[111].mxu0 }
 0x5d4   :  { %vm6753_vm4 = vcmp.gt.f32.partialorder %v6735_v24, 0.0  ;;  %v6789_v20 = vmul.f32 %v15304_v50, %v6735_v24  ;;  %v6738_v32 = vadd.f32 %v15296_v60, %v6543_v19 }
 0x5d5   :  { %v6806_v8 = vsel %vm6752_vm3, %v6734_v0, %v6788_v11  ;;  %vm6755_vm5 = vcmp.gt.f32.partialorder %v6737_v7, 0.0  ;;  %v6791_v9 = vmul.f32 %v15300_v47, %v6737_v7 }
 0x5d6   :  { %v6807_v21 = vsel %vm6753_vm4, %v6735_v24, %v6789_v20  ;;  %vm6756_vm7 = vcmp.gt.f32.partialorder %v6738_v32, 0.0  ;;  %v6792_v22 = vmul.f32 %v15304_v50, %v6738_v32  ;;  %v6833_v34 = vrot.slane %v6806_v8, 7 }
 0x5d7   :  { %v6809_v36 = vsel %vm6755_vm5, %v6737_v7, %v6791_v9  ;;  %v6836_v44 = vrot.slane %v6807_v21, 7 }
 0x5d8   :  { %v6834_v18 = vrot.slane %v6809_v36, 7  ;;  %v6810_v63 = vsel %vm6756_vm7, %v6738_v32, %v6792_v22  ;;  %v6547_v13 = vpop.f32.mrb[112].mxu0 }
 0x5d9   :  { %v6837_v61 = vrot.slane %v6810_v63, 7  ;;  %v6740_v31 = vadd.f32 %v15292_v55, %v6547_v13  ;;  %v6549_v35 = vpop.f32.mrb[113].mxu0 }
 0x5da   :  { %v6835_v48 = vsel %vm2272_vm6, %v6833_v34, %v6834_v18  ;;  %v6741_v26 = vadd.f32 %v15296_v60, %v6549_v35  ;;  %v6551_v4 = vpop.f32.mrb[114].mxu0 }
 0x5db   :  { %v6838_v12 = vsel %vm2272_vm6, %v6836_v44, %v6837_v61  ;;  %vm6758_vm8 = vcmp.gt.f32.partialorder %v6740_v31, 0.0  ;;  %v6794_v15 = vmul.f32 %v15300_v47, %v6740_v31  ;;  %v6743_v53 = vadd.f32 %v15292_v55, %v6551_v4  ;;  %v6553_v52 = vpop.f32.mrb[115].mxu0 }
 0x5dc   :  { %vm6759_vm9 = vcmp.gt.f32.partialorder %v6741_v26, 0.0  ;;  %v6795_v51 = vmul.f32 %v15304_v50, %v6741_v26  ;;  %v6744_v27 = vadd.f32 %v15296_v60, %v6553_v52  ;;  %v15322_v39 = vpack.c.bf16 %v6838_v12, %v12632_v38 }
 0x5dd   :  { %v6812_v16 = vsel %vm6758_vm8, %v6740_v31, %v6794_v15  ;;  %vm6761_vm10 = vcmp.gt.f32.partialorder %v6743_v53, 0.0  ;;  %v6797_v28 = vmul.f32 %v15300_v47, %v6743_v53  ;;  %v15325_v29 = vpack.c.bf16 %v6835_v48, %v12632_v38 }
 0x5de   :  { %v6842_v49 = vrot.slane %v6812_v16, 7  ;;  %v6813_v58 = vsel %vm6759_vm9, %v6741_v26, %v6795_v51  ;;  %vm6762_vm11 = vcmp.gt.f32.partialorder %v6744_v27, 0.0  ;;  %v6798_v33 = vmul.f32 %v15304_v50, %v6744_v27 }
 0x5df   :  { %v6844_v6 = vrot.slane %v6813_v58, 7  ;;  %v6815_v3 = vsel %vm6761_vm10, %v6743_v53, %v6797_v28  ;;  %v7090_v25 = vshll.u32 %v15322_v39, 16  ;;  %v7088_v0 = vshrl.u32 %v15322_v39, 16 }
 0x5e0   :  { %v6843_v43 = vsel %vm2272_vm6, %v6834_v18, %v6842_v49  ;;  %v6869_v45 = vrot.slane %v6815_v3, 7  ;;  %v6816_v14 = vsel %vm6762_vm11, %v6744_v27, %v6798_v33  ;;  %v6557_v46 = vpop.f32.mrb[116].mxu0  ;;  %v7076_v7 = vshrl.u32 %v15325_v29, 16 }
 0x5e1   :  { %v6845_v40 = vsel %vm2272_vm6, %v6837_v61, %v6844_v6  ;;  %v6872_v24 = vrot.slane %v6816_v14, 7  ;;  %v6746_v17 = vadd.f32 %v15292_v55, %v6557_v46  ;;  %v6559_v11 = vpop.f32.mrb[117].mxu0  ;;  %v7092_v8 = vrot.slane %v7090_v25, 1  ;;  %v12463_v25 = vld [vmem:[%s16167_s2 + $0x10e8] ss:$12 sps:$4 sm:$0xff]  }
 0x5e2   :  { %v6747_v19 = vadd.f32 %v15296_v60, %v6559_v11  ;;  %v6561_v20 = vpop.f32.mrb[118].mxu0  ;;  %v15335_v32 = vpack.c.bf16 %v12632_v38, %v6845_v40  ;;  %v7078_v9 = vshll.u32 %v15325_v29, 16  ;;  %v15340_v34 = vpack.c.bf16 %v12632_v38, %v6843_v43  ;;  %v12464_v14 = vld [vmem:[%s16167_s2 + $0x11c0] ss:$12 sps:$4 sm:$0xff]  }
 0x5e3   :  { %vm6764_vm12 = vcmp.gt.f32.partialorder %v6746_v17, 0.0  ;;  %v6800_v21 = vmul.f32 %v15300_v47, %v6746_v17  ;;  %v6749_v22 = vadd.f32 %v15292_v55, %v6561_v20  ;;  %v6563_v36 = vpop.f32.mrb[119].mxu0  ;;  %v7093_v12 = vor.u32 %v7092_v8, %v7088_v0  ;;  %v12466_v8 = vld [vmem:[%s16167_s2 + $0x11d8] ss:$12 sps:$4 sm:$0xff]  }
 0x5e4   :  { %vm6765_vm13 = vcmp.gt.f32.partialorder %v6747_v19, 0.0  ;;  %v6801_v18 = vmul.f32 %v15304_v50, %v6747_v19  ;;  %v6750_v63 = vadd.f32 %v15296_v60, %v6563_v36  ;;  %v7095_v13 = vshll.u32 %v15335_v32, 16 }
 0x5e5   :  { %v6818_v44 = vsel %vm6764_vm12, %v6746_v17, %v6800_v21  ;;  %vm6767_vm14 = vcmp.gt.f32.partialorder %v6749_v22, 0.0  ;;  %v6803_v61 = vmul.f32 %v15300_v47, %v6749_v22  ;;  %v7080_v31 = vrot.slane %v7078_v9, 1  ;;  %v12465_v17 = vld [vmem:[%s16167_s2 + $0x1100] ss:$12 sps:$4 sm:$0xff]  }
 0x5e6   :  { %v6870_v35 = vrot.slane %v6818_v44, 7  ;;  %v6819_v48 = vsel %vm6765_vm13, %v6747_v19, %v6801_v18  ;;  %vm6768_vm15 = vcmp.gt.f32.partialorder %v6750_v63, 0.0  ;;  %v6804_v55 = vmul.f32 %v15304_v50, %v6750_v63 }
 0x5e7   :  { %v6873_v26 = vrot.slane %v6819_v48, 7  ;;  %v6821_v4 = vsel %vm6767_vm14, %v6749_v22, %v6803_v61  ;;  %v7097_v15 = vrot.slane %v7095_v13, 1  ;;  %v7083_v27 = vshll.u32 %v15340_v34, 16 }
 0x5e8   :  { %v6871_v53 = vsel %vm2272_vm6, %v6869_v45, %v6870_v35  ;;  %v6878_v52 = vrot.slane %v6821_v4, 7  ;;  %v6822_v60 = vsel %vm6768_vm15, %v6750_v63, %v6804_v55  ;;  %v6567_v51 = vpop.f32.mrb[168].mxu0  ;;  %v15353_v58 = vpack.c.bf16 %v12632_v38, %v12632_v38 }
 0x5e9   :  { %v6874_v16 = vsel %vm2272_vm6, %v6872_v24, %v6873_v26  ;;  %v6880_v47 = vrot.slane %v6822_v60, 7  ;;  %v6568_v28 = vpop.f32.mrb[169].mxu0  ;;  %v15351_v49 = vsel %vm234_vm1, %v7093_v12, %v7097_v15  ;;  %v7081_v6 = vor.u32 %v7080_v31, %v7076_v7 }
 0x5ea   :  { %v6879_v50 = vsel %vm2272_vm6, %v6870_v35, %v6878_v52  ;;  %v6569_v33 = vpop.f32.mrb[170].mxu0  ;;  %7508 = vmatprep.mubr.bf16.mxu1 %v15351_v49  ;;  %v7085_v3 = vrot.slane %v7083_v27, 1  ;;  %v7147_v46 = vshll.u32 %v15353_v58, 16  ;;  %v7119_v11 = vshrl.u32 %v15335_v32, 16 }
 0x5eb   :  { %v6881_v43 = vsel %vm2272_vm6, %v6873_v26, %v6880_v47  ;;  %v6570_v45 = vpop.f32.mrb[171].mxu0  ;;  %v15364_v38 = vpack.c.bf16 %v6879_v50, %v6871_v53  ;;  %v15381_v19 = vrot.slane %v15283_v57, %v13565_v23  ;;  %v7111_v20 = vshrl.u32 %v15340_v34, 16  ;;  %v12467_v26 = vld [vmem:[%s16167_s2 + $0x1118] ss:$12 sps:$4 sm:$0xff]   ;;  %v12470_v50 = vld [vmem:[%s16167_s2 + $0x1208] ss:$12 sps:$4 sm:$0xff]  }
 0x5ec   :  { %v15368_v0 = vsel %vm234_vm1, %v7081_v6, %v7085_v3  ;;  %v15370_v40 = vpack.c.bf16 %v6881_v43, %v6874_v16  ;;  %v15387_v9 = vrot.slane %v7147_v46, 1  ;;  %v7121_v22 = vor.u32 %v7119_v11, %v7097_v15 }
 0x5ed   :  { %7509 = vmatmul.mubr.bf16.vlgmr.msra.gmra.mrb[160].mxu1 %v15368_v0  ;;  %v7115_v24 = vshll.u32 %v15364_v38, 16  ;;  %v15393_v57 = vrot.slane %v15288_v54, %v13565_v23  ;;  %v7113_v48 = vor.u32 %v7111_v20, %v7085_v3  ;;  %v7135_v60 = vshrl.u32 %v15364_v38, 16 }
 0x5ee   :  { %11163 = vmatpush3.bf16.msra.mxu1 %v12463_v25  ;;  %v7123_v7 = vshll.u32 %v15370_v40, 16  ;;  %v7143_v63 = vshrl.u32 %v15370_v40, 16  ;;  %v7162_v16 = vshrl.u32 %v15353_v58, 16 }
 0x5ef   :  { %11164 = vmatprep.subr.bf16.mxu1 %v12464_v14  ;;  %v7117_v18 = vrot.slane %v7115_v24, 1  ;;  %v12471_v24 = vld [vmem:[%s16167_s2 + $0x1148] ss:$12 sps:$4 sm:$0xff]  }
 0x5f0   :  { %v11402_v21 = vpop.f32.mrb[144].mxu0  ;;  %v7125_v36 = vrot.slane %v7123_v7, 1 }
 0x5f1   :  { %v11506_v13 = vadd.f32 %v15118_v10, %v11402_v21  ;;  %v6669_v44 = vpop.f32.mrb[145].mxu0  ;;  %v15411_v53 = vsel %vm234_vm1, %v7113_v48, %v7117_v18  ;;  %v7137_v28 = vor.u32 %v7135_v60, %v7117_v18  ;;  %v12475_v21 = vld [vmem:[%s16167_s2 + $0x1220] ss:$12 sps:$4 sm:$0xff]  }
 0x5f2   :  { %v11509_v61 = vadd.f32 %v15096_v62, %v6669_v44  ;;  %v11403_v31 = vpop.f32.mrb[146].mxu0  ;;  %11165 = vmatpush3.bf16.msra.mxu1 %v12465_v17  ;;  %v15397_v35 = vsel %vm234_vm1, %v7121_v22, %v7125_v36  ;;  %v7145_v55 = vor.u32 %v7143_v63, %v7125_v36  ;;  %v12468_v62 = vld [vmem:[%s16167_s2 + $0x11f0] ss:$12 sps:$4 sm:$0xff]   ;;  %v15437_v17 = vor.u32 %v7162_v16, %v15387_v9 }
 0x5f3   :  { %v6742_v10 = vadd.f32 %v11506_v13, %v15381_v19  ;;  %v11512_v4 = vadd.f32 %v15124_v30, %v11403_v31  ;;  %v6672_v54 = vpop.f32.mrb[147].mxu0  ;;  %7518 = vmatprep.mubr.bf16.mxu1 %v15397_v35  ;;  %11166 = vmatprep.subr.bf16.mxu1 %v12466_v8  ;;  %v15447_v18 = vsel %vm234_vm1, %v7137_v28, %v15387_v9 }
 0x5f4   :  { %v6736_v12 = vadd.f32 %v11509_v61, %v15381_v19  ;;  %v11515_v15 = vadd.f32 %v15102_v2, %v6672_v54  ;;  %v15415_v52 = vsel %vm234_vm1, %v7145_v55, %v15387_v9  ;;  %v12469_v2 = vld [vmem:[%s16167_s2 + $0x1130] ss:$12 sps:$4 sm:$0xff]   ;;  %v12480_v9 = vld [vmem:[%s16167_s2 + $0x1238] ss:$12 sps:$4 sm:$0xff]  }
 0x5f5   :  { %vm6760_vm3 = vcmp.gt.f32.partialorder %v6742_v10, 0.0  ;;  %v6796_v30 = vmul.f32 %v15393_v57, %v6742_v10  ;;  %7519 = vmatmul.mubr.bf16.gmra.mrb[164].mxu1 %v15411_v53  ;;  %v6745_v47 = vadd.f32 %v11512_v4, %v15381_v19  ;;  %v6898_v54 = vld [vmem:[#allocation2 + $0x10] sm:$0xff] }
 0x5f6   :  { %vm6754_vm4 = vcmp.gt.f32.partialorder %v6736_v12, 0.0  ;;  %v6790_v51 = vmul.f32 %v15393_v57, %v6736_v12  ;;  %v6739_v27 = vadd.f32 %v11515_v15, %v15381_v19  ;;  %7528 = vmatprep.mubr.bf16.mxu1 %v15415_v52  ;;  %11167 = vmatpush3.bf16.msra.mxu1 %v12467_v26  ;;  %v12481_v26 = vld [vmem:[%s16167_s2 + $0x1178] ss:$12 sps:$4 sm:$0xff]  }
 0x5f7   :  { %11168 = vmatprep.subr.bf16.mxu1 %v12468_v62  ;;  %v6814_v33 = vsel %vm6760_vm3, %v6742_v10, %v6796_v30  ;;  %vm6763_vm7 = vcmp.gt.f32.partialorder %v6745_v47, 0.0  ;;  %v6907_v62 = vld [vmem:[#allocation2 + $0x58] sm:$0xff] }
 0x5f8   :  { %v6808_v6 = vsel %vm6754_vm4, %v6736_v12, %v6790_v51  ;;  %vm6757_vm5 = vcmp.gt.f32.partialorder %v6739_v27, 0.0  ;;  %v6793_v3 = vmul.f32 %v15393_v57, %v6739_v27  ;;  %v11406_v25 = vpop.f32.mrb[172].mxu0  ;;  %v6846_v11 = vrot.slane %v6814_v33, 7  ;;  %v12483_v12 = vld [vmem:[%s16167_s2 + $0x1250] ss:$12 sps:$4 sm:$0xff]  }
 0x5f9   :  { %v6685_v43 = vpop.f32.mrb[173].mxu0  ;;  %v6839_v7 = vrot.slane %v6808_v6, 7  ;;  %v12496_v6 = vld [vmem:[%s16167_s2 + $0x1280] ss:$12 sps:$4 sm:$0xff]  }
 0x5fa   :  { %v6811_v45 = vsel %vm6757_vm5, %v6739_v27, %v6793_v3  ;;  %v6686_v14 = vadd.f32 %v15032_v5, %v6685_v43  ;;  %v11407_v46 = vpop.f32.mrb[174].mxu0  ;;  %11169 = vmatpush3.bf16.msra.mxu1 %v12469_v2  ;;  %v6799_v5 = vmul.f32 %v15393_v57, %v6745_v47  ;;  %v12485_v2 = vld [vmem:[%s16167_s2 + $0x1190] ss:$12 sps:$4 sm:$0xff]   ;;  %v12484_v43 = vld [vmem:[%s16167_s2 + $0xf38] ss:$12 sps:$4 sm:$0xff]  }
 0x5fb   :  { %v6840_v20 = vrot.slane %v6811_v45, 7  ;;  %v6688_v8 = vpop.f32.mrb[175].mxu0  ;;  %11170 = vmatprep.subr.bf16.mxu1 %v12470_v50  ;;  %v12486_v45 = vld [vmem:[%s16167_s2 + $0x1010] ss:$12 sps:$4 sm:$0xff]  }
 0x5fc   :  { %v6712_v22 = vadd.f32 %v6686_v14, %v15260_v37  ;;  %v6689_v36 = vadd.f32 %v15037_v41, %v6688_v8  ;;  %v12476_v41 = vld [vmem:[%s16167_s2 + $0x1160] ss:$12 sps:$4 sm:$0xff]   ;;  %v6817_v61 = vsel %vm6763_vm7, %v6745_v47, %v6799_v5  ;;  %v12487_v47 = vld [vmem:[%s16167_s2 + $0x1268] ss:$12 sps:$4 sm:$0xff]  }
 0x5fd   :  { %v6841_v63 = vsel %vm2272_vm6, %v6839_v7, %v6840_v20  ;;  %v6847_v13 = vsel %vm2272_vm6, %v6840_v20, %v6846_v11  ;;  %7529 = vmatmul.mubr.bf16.gmra.mrb[168].mxu1 %v15447_v18  ;;  %v6875_v10 = vrot.slane %v6817_v61, 7  ;;  %v12506_v11 = vld [vmem:[%s16167_s2 + $0xf34] ss:$12 sps:$4 sm:$0xff]   ;;  %v12488_v7 = vld [vmem:[%s16167_s2 + $0xf50] ss:$12 sps:$4 sm:$0xff]  }
 0x5fe   :  { %6856 = vst.msk [vmem:[#allocation2 + $0x28] sm:$0xff] %vm23_vm0, %v6841_v63  ;;  %6859 = vst.msk [vmem:[#allocation2 + $0x40] sm:$0xff] %vm23_vm0, %v6847_v13  ;;  %v6748_v44 = vadd.f32 %v15381_v19, %v6712_v22  ;;  %v6715_v37 = vadd.f32 %v6689_v36, %v15263_v56  ;;  %11171 = vmatpush3.bf16.msra.mxu1 %v12471_v24  ;;  %7538 = vmatprep.mubr.bf16.mxu1 %v15437_v17  ;;  %v6916_v20 = vld [vmem:[#allocation2 + $0xa0] sm:$0xff]  ;;  %v12490_v36 = vld [vmem:[%s16167_s2 + $0xf68] ss:$12 sps:$4 sm:$0xff]  }
 0x5ff   :  { %11172 = vmatprep.subr.bf16.mxu1 %v12475_v21  ;;  %v15521_v63 = vpack.c.bf16 %v6916_v20, %v6916_v20  ;;  %v12491_v13 = vld [vmem:[%s16167_s2 + $0x1040] ss:$12 sps:$4 sm:$0xff]  }
 0x600   :  { %vm6766_vm8 = vcmp.gt.f32.partialorder %v6748_v44, 0.0  ;;  %v6802_v31 = vmul.f32 %v15393_v57, %v6748_v44  ;;  %v6751_v48 = vadd.f32 %v15381_v19, %v6715_v37  ;;  %v12534_v20 = vld [vmem:[%s16167_s2 + $0xfc0] ss:$12 sps:$4 sm:$0xff]  }
 0x601   :  { %v7155_v37 = vshll.u32 %v15521_v63, 16 }
 0x602   :  { %v6820_v55 = vsel %vm6766_vm8, %v6748_v44, %v6802_v31  ;;  %vm6769_vm9 = vcmp.gt.f32.partialorder %v6751_v48, 0.0  ;;  %v6805_v56 = vmul.f32 %v15393_v57, %v6751_v48  ;;  %11173 = vmatpush3.bf16.msra.mxu1 %v12476_v41  ;;  %v12492_v41 = vld [vmem:[%s16167_s2 + $0xf80] ss:$12 sps:$4 sm:$0xff]   ;;  %v12494_v31 = vld [vmem:[%s16167_s2 + $0xf98] ss:$12 sps:$4 sm:$0xff]  }
 0x603   :  { %v6876_v4 = vrot.slane %v6820_v55, 7  ;;  %11174 = vmatprep.subr.bf16.mxu1 %v12480_v9 }
 0x604   :  { %v6823_v15 = vsel %vm6769_vm9, %v6751_v48, %v6805_v56  ;;  %v12495_v48 = vld [vmem:[%s16167_s2 + $0x1070] ss:$12 sps:$4 sm:$0xff]   ;;  %v7165_v56 = vshrl.u32 %v15521_v63, 16 }
 0x605   :  { %v6877_v19 = vsel %vm2272_vm6, %v6875_v10, %v6876_v4  ;;  %v6882_v30 = vrot.slane %v6823_v15, 7  ;;  %7539 = vmatmul.mubr.bf16.gmra.mrb[172].mxu1 %v15437_v17  ;;  %v6901_v57 = vld [vmem:[#allocation2 + $0x28] sm:$0xff]  ;;  %v6904_v60 = vld [vmem:[#allocation2 + $0x40] sm:$0xff] }
 0x606   :  { %6892 = vst.msk [vmem:[#allocation2 + $0x70] sm:$0xff] %vm23_vm0, %v6877_v19  ;;  %11175 = vmatpush3.bf16.msra.mxu1 %v12481_v26  ;;  %7646 = vmatprep.mubr.bf16.mxu1 %v15351_v49  ;;  %v15476_v51 = vpack.c.bf16 %v6901_v57, %v6898_v54  ;;  %v15478_v27 = vpack.c.bf16 %v6907_v62, %v6904_v60  ;;  %v12497_v26 = vld [vmem:[%s16167_s2 + $0xfb0] ss:$12 sps:$4 sm:$0xff]   ;;  %v12500_v54 = vld [vmem:[%s16167_s2 + $0x10a0] ss:$12 sps:$4 sm:$0xff]  }
 0x607   :  { %v6883_v16 = vsel %vm2272_vm6, %v6876_v4, %v6882_v30  ;;  %11176 = vmatprep.subr.bf16.mxu1 %v12483_v12  ;;  %v12499_v4 = vld [vmem:[%s16167_s2 + $0xfc8] ss:$12 sps:$4 sm:$0xff]   ;;  %v12501_v62 = vld [vmem:[%s16167_s2 + $0xfe0] ss:$12 sps:$4 sm:$0xff]   ;;  %v12502_v12 = vld [vmem:[%s16167_s2 + $0x1358] ss:$12 sps:$4 sm:$0xff]  }
 0x608   :  { %6895 = vst.msk [vmem:[#allocation2 + $0x88] sm:$0xff] %vm23_vm0, %v6883_v16  ;;  %v7102_v28 = vshll.u32 %v15476_v51, 16  ;;  %v7107_v49 = vshll.u32 %v15478_v27, 16  ;;  %v7100_v50 = vshrl.u32 %v15476_v51, 16  ;;  %v7127_v8 = vshrl.u32 %v15478_v27, 16 }
 0x609   :  { %v12511_v15 = vld [vmem:[%s16167_s2 + $0xf4c] ss:$12 sps:$4 sm:$0xff]   ;;  %v12507_v30 = vld [vmem:[%s16167_s2 + $0x1370] ss:$12 sps:$4 sm:$0xff]   ;;  %v12509_v57 = vld [vmem:[%s16167_s2 + $0xf48] ss:$12 sps:$4 sm:$0xff]  }
 0x60a   :  { %v7104_v33 = vrot.slane %v7102_v28, 1  ;;  %11177 = vmatpush3.bf16.msra.mxu1 %v12485_v2  ;;  %v7109_v25 = vrot.slane %v7107_v49, 1  ;;  %v12503_v19 = vld [vmem:[%s16167_s2 + $0x1298] ss:$12 sps:$4 sm:$0xff]   ;;  %v12508_v2 = vld [vmem:[%s16167_s2 + $0x12b0] ss:$12 sps:$4 sm:$0xff]  }
 0x60b   :  { %11408 = vmatprep.subr.bf16.mxu1 %v12487_v47  ;;  %v12516_v60 = vld [vmem:[%s16167_s2 + $0xf64] ss:$12 sps:$4 sm:$0xff]   ;;  %v12512_v16 = vld [vmem:[%s16167_s2 + $0x1388] ss:$12 sps:$4 sm:$0xff]  }
 0x60c   :  { %v7105_v3 = vor.u32 %v7104_v33, %v7100_v50  ;;  %v7129_v5 = vor.u32 %v7127_v8, %v7109_v25  ;;  %v12521_v28 = vld [vmem:[%s16167_s2 + $0xf7c] ss:$12 sps:$4 sm:$0xff]   ;;  %v12517_v50 = vld [vmem:[%s16167_s2 + $0x13a0] ss:$12 sps:$4 sm:$0xff]   ;;  %v12519_v33 = vld [vmem:[%s16167_s2 + $0xf78] ss:$12 sps:$4 sm:$0xff]  }
 0x60d   :  { %7647 = vmatmul.mubr.bf16.vlgmr.msra.gmra.mrb[176].mxu1 %v15368_v0  ;;  %v6910_v46 = vld [vmem:[#allocation2 + $0x70] sm:$0xff]  ;;  %v8389_v8 = vrot.slane %v15335_v32, 1 }
 0x60e   :  { %v7110_v14 = vsel %vm234_vm1, %v7105_v3, %v7109_v25  ;;  %7654 = vmatprep.mubr.bf16.mxu1 %v15397_v35  ;;  %11409 = vmatpush3.bf16.msra.mxu1 %v12487_v47  ;;  %v12489_v35 = vld [vmem:[%s16167_s2 + $0x1028] ss:$12 sps:$4 sm:$0xff]   ;;  %v12514_v47 = vld [vmem:[%s16167_s2 + $0xf60] ss:$12 sps:$4 sm:$0xff]   ;;  %v12522_v25 = vld [vmem:[%s16167_s2 + $0x13b8] ss:$12 sps:$4 sm:$0xff]  }
 0x60f   :  { %10531 = vmatmul.mubr.msk.bf16.vlgmr.msra.gmra.mrb[176].mxu0 %vm23_vm0, %v7110_v14  ;;  %v6913_v24 = vld [vmem:[#allocation2 + $0x88] sm:$0xff]  ;;  %11410 = vmatprep.subr.bf16.mxu1 %v12496_v6 }
 0x610   :  { %11209 = vmatpush3.bf16.msra.mxu0 %v12484_v43  ;;  %7587 = vmatprep.mubr.bf16.mxu0 %v12633_v1  ;;  %v15511_v0 = vpack.c.bf16 %v6913_v24, %v6910_v46  ;;  %v12513_v49 = vld [vmem:[%s16167_s2 + $0x12c8] ss:$12 sps:$4 sm:$0xff]   ;;  %v12518_v3 = vld [vmem:[%s16167_s2 + $0x12e0] ss:$12 sps:$4 sm:$0xff]   ;;  %v12524_v43 = vld [vmem:[%s16167_s2 + $0xf90] ss:$12 sps:$4 sm:$0xff]  }
 0x611   :  { %11210 = vmatprep.subr.bf16.mxu0 %v12486_v45  ;;  %v12531_v45 = vld [vmem:[%s16167_s2 + $0xfac] ss:$12 sps:$4 sm:$0xff]   ;;  %v12527_v46 = vld [vmem:[%s16167_s2 + $0x13d0] ss:$12 sps:$4 sm:$0xff]   ;;  %v12529_v24 = vld [vmem:[%s16167_s2 + $0xfa8] ss:$12 sps:$4 sm:$0xff]  }
 0x612   :  { %v7131_v21 = vshll.u32 %v15511_v0, 16  ;;  %11411 = vmatpush3.bf16.msra.mxu1 %v12496_v6  ;;  %v7151_v9 = vshrl.u32 %v15511_v0, 16  ;;  %v12526_v6 = vld [vmem:[%s16167_s2 + $0xf94] ss:$12 sps:$4 sm:$0xff]  }
 0x613   :  { %8036 = vmatprep.subr.bf16.mxu1 %v12506_v11  ;;  %v12536_v11 = vld [vmem:[%s16167_s2 + $0xfc4] ss:$12 sps:$4 sm:$0xff]  }
 0x614   :  { %11211 = vmatpush3.bf16.msra.mxu0 %v12488_v7  ;;  %v7133_v22 = vrot.slane %v7131_v21, 1  ;;  %v12528_v7 = vld [vmem:[%s16167_s2 + $0x1310] ss:$12 sps:$4 sm:$0xff]  }
 0x615   :  { %11212 = vmatprep.subr.bf16.mxu0 %v12489_v35  ;;  %7655 = vmatmul.mubr.bf16.gmra.mrb[180].mxu1 %v15411_v53  ;;  %v12493_v53 = vld [vmem:[%s16167_s2 + $0x1058] ss:$12 sps:$4 sm:$0xff]   ;;  %v12532_v35 = vld [vmem:[%s16167_s2 + $0x13e8] ss:$12 sps:$4 sm:$0xff]  }
 0x616   :  { %v7134_v44 = vsel %vm234_vm1, %v7129_v5, %v7133_v22  ;;  %7662 = vmatprep.mubr.bf16.mxu1 %v15415_v52  ;;  %v7153_v61 = vor.u32 %v7151_v9, %v7133_v22  ;;  %v7157_v52 = vrot.slane %v7155_v37, 1  ;;  %v12541_v21 = vld [vmem:[%s16167_s2 + $0xfdc] ss:$12 sps:$4 sm:$0xff]   ;;  %v8388_v22 = vrot.slane %v15322_v39, 1  ;;  %v12544_v37 = vld [vmem:[%s16167_s2 + $0xff4] ss:$12 sps:$4 sm:$0xff]  }
 0x617   :  { %10532 = vmatmul.mubr.msk.bf16.gmra.mrb[180].mxu0 %vm23_vm0, %v7134_v44  ;;  %v12533_v5 = vld [vmem:[%s16167_s2 + $0x1328] ss:$12 sps:$4 sm:$0xff]   ;;  %v8386_v9 = vrot.slane %v15340_v34, 1 }
 0x618   :  { %11213 = vmatpush3.bf16.msra.mxu0 %v12490_v36  ;;  %7597 = vmatprep.mubr.bf16.mxu0 %v12633_v1  ;;  %v7158_v55 = vsel %vm234_vm1, %v7153_v61, %v7157_v52  ;;  %v7167_v10 = vor.u32 %v7165_v56, %v7157_v52  ;;  %v12537_v36 = vld [vmem:[%s16167_s2 + $0x1400] ss:$12 sps:$4 sm:$0xff]   ;;  %v8396_v61 = vrot.slane %v15370_v40, 1  ;;  %v12545_v56 = vld [vmem:[%s16167_s2 + $0x1008] ss:$12 sps:$4 sm:$0xff]  }
 0x619   :  { %11214 = vmatprep.subr.bf16.mxu0 %v12491_v13  ;;  %v12539_v13 = vld [vmem:[%s16167_s2 + $0xfd8] ss:$12 sps:$4 sm:$0xff]  }
 0x61a   :  { %v12547_v52 = vld [vmem:[%s16167_s2 + $0x100c] ss:$12 sps:$4 sm:$0xff]  }
 0x61c   :  { %11215 = vmatpush3.bf16.msra.mxu0 %v12492_v41  ;;  %v12560_v41 = vld [vmem:[%s16167_s2 + $0x1418] ss:$12 sps:$4 sm:$0xff]  }
 0x61d   :  { %11216 = vmatprep.subr.bf16.mxu0 %v12493_v53  ;;  %7663 = vmatmul.mubr.bf16.gmra.mrb[184].mxu1 %v15447_v18  ;;  %v12498_v18 = vld [vmem:[%s16167_s2 + $0x1088] ss:$12 sps:$4 sm:$0xff]   ;;  %v12542_v53 = vld [vmem:[%s16167_s2 + $0xff0] ss:$12 sps:$4 sm:$0xff]  }
 0x61e   :  { %7670 = vmatprep.mubr.bf16.mxu1 %v15437_v17 }
 0x61f   :  { %10533 = vmatmul.mubr.msk.bf16.gmra.mrb[184].mxu0 %vm23_vm0, %v7158_v55 }
 0x620   :  { %11217 = vmatpush3.bf16.msra.mxu0 %v12494_v31  ;;  %7607 = vmatprep.mubr.bf16.mxu0 %v12633_v1  ;;  %v8385_v31 = vrot.slane %v15325_v29, 1 }
 0x621   :  { %11218 = vmatprep.subr.bf16.mxu0 %v12495_v48  ;;  %v12564_v48 = vld [vmem:[%s16167_s2 + $0x1430] ss:$12 sps:$4 sm:$0xff]  }
 0x624   :  { %11219 = vmatpush3.bf16.msra.mxu0 %v12497_v26  ;;  %v15706_v26 = vsel %vm1545_vm2, %v8389_v8, %v8396_v61 }
 0x625   :  { %11220 = vmatprep.subr.bf16.mxu0 %v12498_v18  ;;  %7671 = vmatmul.mubr.bf16.gmra.mrb[188].mxu1 %v15437_v17  ;;  %v12504_v17 = vld [vmem:[%s16167_s2 + $0xf30] ss:$12 sps:$4 sm:$0xff]  }
 0x626   :  { %11412 = vmatprep.mubr.msk.bf16.mxu1 %vm23_vm0, %v7110_v14  ;;  %v12523_v14 = vld [vmem:[%s16167_s2 + $0x12f8] ss:$12 sps:$4 sm:$0xff]  }
 0x627   :  { %10534 = vmatmul.mubr.msk.bf16.gmra.mrb[188].mxu0 %vm23_vm0, %v7167_v10  ;;  %v12550_v18 = vld [vmem:[%s16167_s2 + $0x1024] ss:$12 sps:$4 sm:$0xff]  }
 0x628   :  { %11221 = vmatpush3.bf16.msra.mxu0 %v12499_v4  ;;  %8206 = vmatprep.mubr.bf16.mxu0 %v15322_v39  ;;  %v12548_v4 = vld [vmem:[%s16167_s2 + $0x1020] ss:$12 sps:$4 sm:$0xff]  }
 0x629   :  { %11222 = vmatprep.subr.bf16.mxu0 %v12500_v54  ;;  %v15717_v54 = vrot.slane %v15353_v58, 1 }
 0x62c   :  { %11223 = vmatpush3.bf16.msra.mxu0 %v12501_v62  ;;  %v12553_v62 = vld [vmem:[%s16167_s2 + $0x103c] ss:$12 sps:$4 sm:$0xff]  }
 0x62d   :  { %11254 = vmatprep.subr.bf16.mxu0 %v12502_v12  ;;  %11413 = vmatmul.mubr.msk.bf16.vlgmr.msra.gmra.mrb[192].mxu1 %vm23_vm0, %v7134_v44  ;;  %v15674_v44 = vsel %vm1545_vm2, %v8388_v22, %v8389_v8  ;;  %v12591_v8 = vld [vmem:[%s16167_s2 + $0x1308] ss:$12 sps:$4 sm:$0xff]  }
 0x62e   :  { %8037 = vmatpush1.bf16.msra.mxu1 %v12504_v17  ;;  %11416 = vmatprep.mubr.msk.bf16.mxu1 %vm23_vm0, %v7158_v55  ;;  %v15699_v55 = vsel %vm1545_vm2, %v8385_v31, %v8386_v9  ;;  %v12551_v17 = vld [vmem:[%s16167_s2 + $0x1038] ss:$12 sps:$4 sm:$0xff]  }
 0x62f   :  { %8207 = vmatmul.mubr.bf16.vlgmr.msra.gmra.mrb[192].mxu0 %v15325_v29  ;;  %8038 = vmatprep.subr.bf16.mxu1 %v12511_v15  ;;  %v15731_v15 = vsel %vm1545_vm2, %v8396_v61, %v15717_v54 }
 0x630   :  { %8214 = vmatprep.mubr.bf16.mxu0 %v15335_v32  ;;  %11255 = vmatpush3.bf16.msra.mxu0 %v12503_v19  ;;  %v12556_v19 = vld [vmem:[%s16167_s2 + $0x1054] ss:$12 sps:$4 sm:$0xff]  }
 0x631   :  { %11256 = vmatprep.subr.bf16.mxu0 %v12507_v30  ;;  %v12554_v30 = vld [vmem:[%s16167_s2 + $0x1050] ss:$12 sps:$4 sm:$0xff]  }
 0x632   :  { %8039 = vmatpush1.bf16.msra.mxu1 %v12509_v57  ;;  %v12559_v57 = vld [vmem:[%s16167_s2 + $0x106c] ss:$12 sps:$4 sm:$0xff]  }
 0x633   :  { %8040 = vmatprep.subr.bf16.mxu1 %v12516_v60 }
 0x634   :  { %11257 = vmatpush3.bf16.msra.mxu0 %v12508_v2  ;;  %v12557_v2 = vld [vmem:[%s16167_s2 + $0x1068] ss:$12 sps:$4 sm:$0xff]  }
 0x635   :  { %11258 = vmatprep.subr.bf16.mxu0 %v12512_v16  ;;  %11417 = vmatmul.mubr.msk.bf16.gmra.mrb[196].mxu1 %vm23_vm0, %v7167_v10  ;;  %v8394_v10 = vrot.slane %v15364_v38, 1  ;;  %v12563_v16 = vld [vmem:[%s16167_s2 + $0x1084] ss:$12 sps:$4 sm:$0xff]  }
 0x636   :  { %8041 = vmatpush1.bf16.msra.mxu1 %v12514_v47  ;;  %8068 = vmatprep.mubr.bf16.mxu1 %v15322_v39  ;;  %v12538_v39 = vld [vmem:[%s16167_s2 + $0x1340] ss:$12 sps:$4 sm:$0xff]  }
 0x637   :  { %8215 = vmatmul.mubr.bf16.gmra.mrb[196].mxu0 %v15340_v34  ;;  %8042 = vmatprep.subr.bf16.mxu1 %v12521_v28  ;;  %v15723_v12 = vsel %vm1545_vm2, %v8386_v9, %v8394_v10  ;;  %v15745_v60 = vsel %vm1545_vm2, %v8394_v10, %v15717_v54  ;;  %v12561_v47 = vld [vmem:[%s16167_s2 + $0x1080] ss:$12 sps:$4 sm:$0xff]   ;;  %v8391_v28 = vrot.slane %v15476_v51, 1 }
 0x638   :  { %8222 = vmatprep.mubr.bf16.mxu0 %v15370_v40  ;;  %11259 = vmatpush3.bf16.msra.mxu0 %v12513_v49  ;;  %v8392_v49 = vrot.slane %v15478_v27, 1 }
 0x639   :  { %11260 = vmatprep.subr.bf16.mxu0 %v12517_v50  ;;  %v12567_v50 = vld [vmem:[%s16167_s2 + $0x109c] ss:$12 sps:$4 sm:$0xff]  }
 0x63a   :  { %8043 = vmatpush1.bf16.msra.mxu1 %v12519_v33  ;;  %v12565_v33 = vld [vmem:[%s16167_s2 + $0x1098] ss:$12 sps:$4 sm:$0xff]  }
 0x63b   :  { %8044 = vmatprep.subr.bf16.mxu1 %v12526_v6  ;;  %v15768_v6 = vsel %vm1545_vm2, %v8391_v28, %v8392_v49 }
 0x63c   :  { %11261 = vmatpush3.bf16.msra.mxu0 %v12518_v3  ;;  %v12570_v3 = vld [vmem:[%s16167_s2 + $0x10b4] ss:$12 sps:$4 sm:$0xff]  }
 0x63d   :  { %11262 = vmatprep.subr.bf16.mxu0 %v12522_v25  ;;  %v8398_v25 = vrot.slane %v15511_v0, 1 }
 0x63e   :  { %8045 = vmatpush1.bf16.msra.mxu1 %v12524_v43  ;;  %v12568_v43 = vld [vmem:[%s16167_s2 + $0x10b0] ss:$12 sps:$4 sm:$0xff]  }
 0x63f   :  { %8223 = vmatmul.mubr.bf16.gmra.mrb[200].mxu0 %v15364_v38  ;;  %8046 = vmatprep.subr.bf16.mxu1 %v12531_v45  ;;  %v15780_v45 = vrot.slane %v15521_v63, 1 }
 0x640   :  { %11263 = vmatpush3.bf16.msra.mxu0 %v12523_v14  ;;  %8230 = vmatprep.mubr.bf16.mxu0 %v15353_v58  ;;  %v12573_v14 = vld [vmem:[%s16167_s2 + $0x10cc] ss:$12 sps:$4 sm:$0xff]  }
 0x641   :  { %11264 = vmatprep.subr.bf16.mxu0 %v12527_v46  ;;  %v15787_v46 = vsel %vm1545_vm2, %v8392_v49, %v8398_v25  ;;  %v12612_v49 = vld [vmem:[%s16167_s2 + $0x13b0] ss:$12 sps:$4 sm:$0xff]  }
 0x642   :  { %8047 = vmatpush1.bf16.msra.mxu1 %v12529_v24  ;;  %v12571_v24 = vld [vmem:[%s16167_s2 + $0x10c8] ss:$12 sps:$4 sm:$0xff]  }
 0x643   :  { %8048 = vmatprep.subr.bf16.mxu1 %v12536_v11  ;;  %v15797_v11 = vsel %vm1545_vm2, %v8398_v25, %v15780_v45  ;;  %v12620_v25 = vld [vmem:[%s16167_s2 + $0x13e4] ss:$12 sps:$4 sm:$0xff]  }
 0x644   :  { %11265 = vmatpush3.bf16.msra.mxu0 %v12528_v7  ;;  %v12582_v7 = vld [vmem:[%s16167_s2 + $0x12c0] ss:$12 sps:$4 sm:$0xff]  }
 0x645   :  { %11266 = vmatprep.subr.bf16.mxu0 %v12532_v35  ;;  %v12590_v35 = vld [vmem:[%s16167_s2 + $0x12f4] ss:$12 sps:$4 sm:$0xff]  }
 0x646   :  { %8049 = vmatpush1.bf16.msra.mxu1 %v12534_v20  ;;  %v12588_v20 = vld [vmem:[%s16167_s2 + $0x12f0] ss:$12 sps:$4 sm:$0xff]  }
 0x647   :  { %8231 = vmatmul.mubr.bf16.gmra.mrb[204].mxu0 %v15353_v58  ;;  %8050 = vmatprep.subr.bf16.mxu1 %v12541_v21  ;;  %v12596_v21 = vld [vmem:[%s16167_s2 + $0x1324] ss:$12 sps:$4 sm:$0xff]  }
 0x648   :  { %11267 = vmatpush3.bf16.msra.mxu0 %v12533_v5  ;;  %8884 = vmatprep.mubr.bf16.mxu0 %v15674_v44 }
 0x649   :  { %11268 = vmatprep.subr.bf16.mxu0 %v12537_v36 }
 0x64a   :  { %8051 = vmatpush1.bf16.msra.mxu1 %v12539_v13  ;;  %v12594_v13 = vld [vmem:[%s16167_s2 + $0x1320] ss:$12 sps:$4 sm:$0xff]  }
 0x64b   :  { %8052 = vmatprep.subr.bf16.mxu1 %v12544_v37  ;;  %v12599_v37 = vld [vmem:[%s16167_s2 + $0x133c] ss:$12 sps:$4 sm:$0xff]  }
 0x64c   :  { %11269 = vmatpush3.bf16.msra.mxu0 %v12538_v39  ;;  %v12597_v39 = vld [vmem:[%s16167_s2 + $0x1338] ss:$12 sps:$4 sm:$0xff]  }
 0x64d   :  { %11432 = vmatprep.subr.bf16.mxu0 %v12560_v41 }
 0x64e   :  { %8053 = vmatpush1.bf16.msra.mxu1 %v12542_v53 }
 0x64f   :  { %8885 = vmatmul.mubr.bf16.vlgmr.msra.gmra.mrb[208].mxu0 %v15699_v55  ;;  %8054 = vmatprep.subr.bf16.mxu1 %v12547_v52  ;;  %v12600_v52 = vld [vmem:[%s16167_s2 + $0x1350] ss:$12 sps:$4 sm:$0xff]  }
 0x650   :  { %8892 = vmatprep.mubr.bf16.mxu0 %v15706_v26  ;;  %11433 = vmatpush3.bf16.msra.mxu0 %v12560_v41  ;;  %v12602_v41 = vld [vmem:[%s16167_s2 + $0x1354] ss:$12 sps:$4 sm:$0xff]  }
 0x651   :  { %11434 = vmatprep.subr.bf16.mxu0 %v12564_v48 }
 0x652   :  { %8055 = vmatpush1.bf16.msra.mxu1 %v12545_v56  ;;  %v12603_v56 = vld [vmem:[%s16167_s2 + $0x1368] ss:$12 sps:$4 sm:$0xff]  }
 0x653   :  { %8056 = vmatprep.subr.bf16.mxu1 %v12550_v18  ;;  %v12608_v18 = vld [vmem:[%s16167_s2 + $0x1384] ss:$12 sps:$4 sm:$0xff]  }
 0x654   :  { %11435 = vmatpush3.bf16.msra.mxu0 %v12564_v48  ;;  %v12605_v48 = vld [vmem:[%s16167_s2 + $0x136c] ss:$12 sps:$4 sm:$0xff]  }
 0x656   :  { %8057 = vmatpush1.bf16.msra.mxu1 %v12548_v4 }
 0x657   :  { %8893 = vmatmul.mubr.bf16.gmra.mrb[212].mxu0 %v15723_v12  ;;  %8058 = vmatprep.subr.bf16.mxu1 %v12553_v62 }
 0x658   :  { %8900 = vmatprep.mubr.bf16.mxu0 %v15731_v15 }
 0x65a   :  { %8059 = vmatpush1.bf16.msra.mxu1 %v12551_v17  ;;  %v12606_v17 = vld [vmem:[%s16167_s2 + $0x1380] ss:$12 sps:$4 sm:$0xff]  }
 0x65b   :  { %8060 = vmatprep.subr.bf16.mxu1 %v12556_v19 }
 0x65e   :  { %8061 = vmatpush1.bf16.msra.mxu1 %v12554_v30  ;;  %v12611_v30 = vld [vmem:[%s16167_s2 + $0x139c] ss:$12 sps:$4 sm:$0xff]  }
 0x65f   :  { %8901 = vmatmul.mubr.bf16.gmra.mrb[216].mxu0 %v15745_v60  ;;  %8062 = vmatprep.subr.bf16.mxu1 %v12559_v57  ;;  %v12609_v57 = vld [vmem:[%s16167_s2 + $0x1398] ss:$12 sps:$4 sm:$0xff]  }
 0x660   :  { %8908 = vmatprep.mubr.bf16.mxu0 %v15717_v54 }
 0x662   :  { %8063 = vmatpush1.bf16.msra.mxu1 %v12557_v2  ;;  %v12614_v2 = vld [vmem:[%s16167_s2 + $0x13b4] ss:$12 sps:$4 sm:$0xff]  }
 0x663   :  { %8064 = vmatprep.subr.bf16.mxu1 %v12563_v16 }
 0x666   :  { %8065 = vmatpush1.bf16.msra.mxu1 %v12561_v47 }
 0x667   :  { %8909 = vmatmul.mubr.bf16.gmra.mrb[220].mxu0 %v15717_v54  ;;  %8066 = vmatprep.subr.bf16.mxu1 %v12567_v50 }
 0x668   :  { %11436 = vmatprep.mubr.msk.bf16.mxu0 %vm23_vm0, %v15768_v6 }
 0x66a   :  { %8067 = vmatpush1.bf16.msra.mxu1 %v12565_v33  ;;  %v12617_v33 = vld [vmem:[%s16167_s2 + $0x13cc] ss:$12 sps:$4 sm:$0xff]  }
 0x66b   :  { %8105 = vmatprep.subr.bf16.mxu1 %v12570_v3  ;;  %v12615_v3 = vld [vmem:[%s16167_s2 + $0x13c8] ss:$12 sps:$4 sm:$0xff]  }
 0x66d   :  { %8069 = vmatmul.mubr.bf16.vlgmr.msra.gmra.mrb[200].mxu1 %v15325_v29  ;;  %v12574_v29 = vld [vmem:[%s16167_s2 + $0x10b8] ss:$12 sps:$4 sm:$0xff]  }
 0x66e   :  { %8078 = vmatprep.mubr.bf16.mxu1 %v15335_v32  ;;  %8106 = vmatpush1.bf16.msra.mxu1 %v12568_v43  ;;  %v12575_v32 = vld [vmem:[%s16167_s2 + $0x10d0] ss:$12 sps:$4 sm:$0xff]  }
 0x66f   :  { %11437 = vmatmul.mubr.msk.bf16.vlgmr.msra.gmra.mrb[224].mxu0 %vm23_vm0, %v15787_v46  ;;  %8107 = vmatprep.subr.bf16.mxu1 %v12573_v14 }
 0x670   :  { %11440 = vmatprep.mubr.msk.bf16.mxu0 %vm23_vm0, %v15797_v11 }
 0x672   :  { %8108 = vmatpush1.bf16.msra.mxu1 %v12571_v24 }
 0x673   :  { %11420 = vmatprep.subr.bf16.mxu1 %v12574_v29 }
 0x675   :  { %8079 = vmatmul.mubr.bf16.gmra.mrb[204].mxu1 %v15340_v34  ;;  %v12578_v34 = vld [vmem:[%s16167_s2 + $0x1294] ss:$12 sps:$4 sm:$0xff]  }
 0x676   :  { %8088 = vmatprep.mubr.bf16.mxu1 %v15370_v40  ;;  %v12579_v40 = vld [vmem:[%s16167_s2 + $0x12a8] ss:$12 sps:$4 sm:$0xff]  }
 0x677   :  { %11441 = vmatmul.mubr.msk.bf16.gmra.mrb[228].mxu0 %vm23_vm0, %v15780_v45 }
 0x67d   :  { %8089 = vmatmul.mubr.bf16.gmra.mrb[208].mxu1 %v15364_v38  ;;  %v12581_v38 = vld [vmem:[%s16167_s2 + $0x12ac] ss:$12 sps:$4 sm:$0xff]  }
 0x67e   :  { %8098 = vmatprep.mubr.bf16.mxu1 %v15353_v58 }
 0x685   :  { %8099 = vmatmul.mubr.bf16.gmra.mrb[212].mxu1 %v15353_v58  ;;  %v12576_v58 = vld [vmem:[%s16167_s2 + $0x1290] ss:$12 sps:$4 sm:$0xff]  }
 0x686   :  { %8137 = vmatprep.mubr.bf16.mxu1 %v12633_v1 }
 0x68d   :  { %10593 = vmatmul.mubr.msk.bf16.vlgmr.msra.gmra.mrb[200].mxu1 %vm23_vm0, %v15476_v51 }
 0x68e   :  { %11421 = vmatpush3.bf16.msra.mxu1 %v12574_v29  ;;  %8147 = vmatprep.mubr.bf16.mxu1 %v12633_v1 }
 0x68f   :  { %11422 = vmatprep.subr.bf16.mxu1 %v12575_v32 }
 0x692   :  { %11423 = vmatpush3.bf16.msra.mxu1 %v12575_v32 }
 0x693   :  { %8714 = vmatprep.subr.bf16.mxu1 %v12578_v34  ;;  %v12618_v34 = vld [vmem:[%s16167_s2 + $0x13e0] ss:$12 sps:$4 sm:$0xff]  }
 0x695   :  { %10594 = vmatmul.mubr.msk.bf16.gmra.mrb[204].mxu1 %vm23_vm0, %v15478_v27 }
 0x696   :  { %8157 = vmatprep.mubr.bf16.mxu1 %v12633_v1 }
 0x69d   :  { %10595 = vmatmul.mubr.msk.bf16.gmra.mrb[208].mxu1 %vm23_vm0, %v15511_v0 }
 0x69e   :  { %8167 = vmatprep.mubr.bf16.mxu1 %v12633_v1 }
 0x6a5   :  { %10596 = vmatmul.mubr.msk.bf16.gmra.mrb[216].mxu1 %vm23_vm0, %v15521_v63 }
 0x6a6   :  { %11424 = vmatprep.mubr.msk.bf16.mxu1 %vm23_vm0, %v15476_v51  ;;  %v12584_v51 = vld [vmem:[%s16167_s2 + $0x12c4] ss:$12 sps:$4 sm:$0xff]  }
 0x6ad   :  { %11425 = vmatmul.mubr.msk.bf16.vlgmr.msra.gmra.mrb[192].mxu1 %vm23_vm0, %v15478_v27  ;;  %v12587_v27 = vld [vmem:[%s16167_s2 + $0x12dc] ss:$12 sps:$4 sm:$0xff]  }
 0x6ae   :  { %8715 = vmatpush1.bf16.msra.mxu1 %v12576_v58  ;;  %11428 = vmatprep.mubr.msk.bf16.mxu1 %vm23_vm0, %v15511_v0  ;;  %v12585_v0 = vld [vmem:[%s16167_s2 + $0x12d8] ss:$12 sps:$4 sm:$0xff]  }
 0x6af   :  { %8716 = vmatprep.subr.bf16.mxu1 %v12581_v38 }
 0x6b2   :  { %8717 = vmatpush1.bf16.msra.mxu1 %v12579_v40 }
 0x6b3   :  { %8718 = vmatprep.subr.bf16.mxu1 %v12584_v51  ;;  %v12623_v51 = vld [vmem:[%s16167_s2 + $0x13fc] ss:$12 sps:$4 sm:$0xff]  }
 0x6b5   :  { %11429 = vmatmul.mubr.msk.bf16.gmra.mrb[220].mxu1 %vm23_vm0, %v15521_v63  ;;  %v12593_v63 = vld [vmem:[%s16167_s2 + $0x130c] ss:$12 sps:$4 sm:$0xff]  }
 0x6b6   :  { %8719 = vmatpush1.bf16.msra.mxu1 %v12582_v7  ;;  %8746 = vmatprep.mubr.bf16.mxu1 %v15674_v44 }
 0x6b7   :  { %8720 = vmatprep.subr.bf16.mxu1 %v12587_v27 }
 0x6ba   :  { %8721 = vmatpush1.bf16.msra.mxu1 %v12585_v0 }
 0x6bb   :  { %8722 = vmatprep.subr.bf16.mxu1 %v12590_v35 }
 0x6be   :  { %8723 = vmatpush1.bf16.msra.mxu1 %v12588_v20 }
 0x6bf   :  { %8724 = vmatprep.subr.bf16.mxu1 %v12593_v63 }
 0x6c0   :  { %v7510_v5 = vpop.f32.mrb[160].mxu1 }
 0x6c1   :  { %v7512_v22 = vpop.f32.mrb[161].mxu1 }
 0x6c2   :  { %v7514_v36 = vpop.f32.mrb[162].mxu1  ;;  %8725 = vmatpush1.bf16.msra.mxu1 %v12591_v8  ;;  %v12621_v8 = vld [vmem:[%s16167_s2 + $0x13f8] ss:$12 sps:$4 sm:$0xff]  }
 0x6c3   :  { %v7516_v44 = vpop.f32.mrb[163].mxu1  ;;  %8726 = vmatprep.subr.bf16.mxu1 %v12596_v21  ;;  %v12626_v21 = vld [vmem:[%s16167_s2 + $0x1414] ss:$12 sps:$4 sm:$0xff]  }
 0x6c6   :  { %8727 = vmatpush1.bf16.msra.mxu1 %v12594_v13 }
 0x6c7   :  { %8728 = vmatprep.subr.bf16.mxu1 %v12599_v37 }
 0x6c8   :  { %v15886_v9 = vpop.f32.mrb[164].mxu1 }
 0x6c9   :  { %v15888_v53 = vpop.f32.mrb[165].mxu1 }
 0x6ca   :  { %8729 = vmatpush1.bf16.msra.mxu1 %v12597_v39  ;;  %v15890_v61 = vpop.f32.mrb[166].mxu1 }
 0x6cb   :  { %v15895_v31 = vpop.f32.mrb[167].mxu1  ;;  %8730 = vmatprep.subr.bf16.mxu1 %v12602_v41 }
 0x6ce   :  { %8731 = vmatpush1.bf16.msra.mxu1 %v12600_v52 }
 0x6cf   :  { %8732 = vmatprep.subr.bf16.mxu1 %v12605_v48  ;;  %v12629_v48 = vld [vmem:[%s16167_s2 + $0x142c] ss:$12 sps:$4 sm:$0xff]  }
 0x6d0   :  { %v15906_v10 = vpop.f32.mrb[168].mxu1 }
 0x6d1   :  { %v15908_v4 = vpop.f32.mrb[169].mxu1 }
 0x6d2   :  { %8733 = vmatpush1.bf16.msra.mxu1 %v12603_v56  ;;  %v15910_v62 = vpop.f32.mrb[170].mxu1 }
 0x6d3   :  { %v15915_v19 = vpop.f32.mrb[171].mxu1  ;;  %8734 = vmatprep.subr.bf16.mxu1 %v12608_v18 }
 0x6d6   :  { %8735 = vmatpush1.bf16.msra.mxu1 %v12606_v17 }
 0x6d7   :  { %8736 = vmatprep.subr.bf16.mxu1 %v12611_v30 }
 0x6d8   :  { %v7540_v16 = vpop.f32.mrb[172].mxu1 }
 0x6d9   :  { %v7541_v47 = vpop.f32.mrb[173].mxu1 }
 0x6da   :  { %8737 = vmatpush1.bf16.msra.mxu1 %v12609_v57  ;;  %v7542_v28 = vpop.f32.mrb[174].mxu1 }
 0x6db   :  { %v7543_v50 = vpop.f32.mrb[175].mxu1  ;;  %8738 = vmatprep.subr.bf16.mxu1 %v12614_v2  ;;  %v12627_v2 = vld [vmem:[%s16167_s2 + $0x1428] ss:$12 sps:$4 sm:$0xff]  }
 0x6de   :  { %8739 = vmatpush1.bf16.msra.mxu1 %v12612_v49 }
 0x6df   :  { %8740 = vmatprep.subr.bf16.mxu1 %v12617_v33 }
 0x6e0   :  { %v11178_v43 = vpop.f32.mrb[176].mxu1 }
 0x6e1   :  { %v11179_v14 = vpop.f32.mrb[177].mxu1 }
 0x6e2   :  { %v7579_v24 = vpop.f32.mrb[176].mxu0  ;;  %8741 = vmatpush1.bf16.msra.mxu1 %v12615_v3  ;;  %v15938_v29 = vadd.f32 %v11179_v14, %v11178_v43  ;;  %v11181_v32 = vpop.f32.mrb[178].mxu1 }
 0x6e3   :  { %v15943_v58 = vadd.f32 %v7579_v24, %v7510_v5  ;;  %v7581_v38 = vpop.f32.mrb[177].mxu0  ;;  %v11182_v40 = vpop.f32.mrb[179].mxu1  ;;  %8742 = vmatprep.subr.bf16.mxu1 %v12620_v25 }
 0x6e4   :  { %v15948_v7 = vadd.f32 %v7581_v38, %v7512_v22  ;;  %v7583_v27 = vpop.f32.mrb[178].mxu0  ;;  %v15950_v0 = vadd.f32 %v11182_v40, %v11181_v32 }
 0x6e5   :  { %v15952_v35 = vadd.f32 %v7583_v27, %v7514_v36  ;;  %v7585_v20 = vpop.f32.mrb[179].mxu0 }
 0x6e6   :  { %v15954_v63 = vadd.f32 %v7585_v20, %v7516_v44  ;;  %8743 = vmatpush1.bf16.msra.mxu1 %v12618_v34  ;;  %v12624_v44 = vld [vmem:[%s16167_s2 + $0x1410] ss:$12 sps:$4 sm:$0xff]  }
 0x6e7   :  { %8744 = vmatprep.subr.bf16.mxu1 %v12623_v51 }
 0x6e8   :  { %v11184_v5 = vpop.f32.mrb[180].mxu1 }
 0x6e9   :  { %v11185_v22 = vpop.f32.mrb[181].mxu1 }
 0x6ea   :  { %v7589_v13 = vpop.f32.mrb[180].mxu0  ;;  %8745 = vmatpush1.bf16.msra.mxu1 %v12621_v8  ;;  %v15962_v37 = vadd.f32 %v11185_v22, %v11184_v5  ;;  %v11187_v36 = vpop.f32.mrb[182].mxu1 }
 0x6eb   :  { %v15968_v39 = vadd.f32 %v7589_v13, %v15886_v9  ;;  %v7591_v41 = vpop.f32.mrb[181].mxu0  ;;  %v11188_v52 = vpop.f32.mrb[183].mxu1  ;;  %8783 = vmatprep.subr.bf16.mxu1 %v12626_v21 }
 0x6ec   :  { %v15974_v56 = vadd.f32 %v7591_v41, %v15888_v53  ;;  %v7593_v18 = vpop.f32.mrb[182].mxu0  ;;  %v11189_v17 = vadd.f32 %v11188_v52, %v11187_v36 }
 0x6ed   :  { %v15977_v30 = vadd.f32 %v7593_v18, %v15890_v61  ;;  %v7595_v57 = vpop.f32.mrb[183].mxu0  ;;  %8747 = vmatmul.mubr.bf16.vlgmr.msra.gmra.mrb[200].mxu1 %v15699_v55 }
 0x6ee   :  { %v15981_v9 = vadd.f32 %v7595_v57, %v15895_v31  ;;  %8756 = vmatprep.mubr.bf16.mxu1 %v15706_v26  ;;  %8784 = vmatpush1.bf16.msra.mxu1 %v12624_v44 }
 0x6ef   :  { %8785 = vmatprep.subr.bf16.mxu1 %v12629_v48 }
 0x6f0   :  { %v11190_v53 = vpop.f32.mrb[184].mxu1 }
 0x6f1   :  { %v11191_v16 = vpop.f32.mrb[185].mxu1 }
 0x6f2   :  { %v7599_v47 = vpop.f32.mrb[184].mxu0  ;;  %v11192_v28 = vadd.f32 %v11191_v16, %v11190_v53  ;;  %v11193_v61 = vpop.f32.mrb[186].mxu1  ;;  %8786 = vmatpush1.bf16.msra.mxu1 %v12627_v2 }
 0x6f3   :  { %v15988_v49 = vadd.f32 %v7599_v47, %v15906_v10  ;;  %v7601_v55 = vpop.f32.mrb[185].mxu0  ;;  %v11194_v31 = vpop.f32.mrb[187].mxu1 }
 0x6f4   :  { %v15991_v50 = vadd.f32 %v7601_v55, %v15908_v4  ;;  %v7603_v26 = vpop.f32.mrb[186].mxu0  ;;  %v11195_v33 = vadd.f32 %v11194_v31, %v11193_v61 }
 0x6f5   :  { %v15994_v3 = vadd.f32 %v7603_v26, %v15910_v62  ;;  %v7605_v25 = vpop.f32.mrb[187].mxu0  ;;  %8757 = vmatmul.mubr.bf16.gmra.mrb[204].mxu1 %v15723_v12 }
 0x6f6   :  { %v15998_v43 = vadd.f32 %v7605_v25, %v15915_v19  ;;  %8766 = vmatprep.mubr.bf16.mxu1 %v15731_v15 }
 0x6f8   :  { %v11196_v10 = vpop.f32.mrb[188].mxu1 }
 0x6f9   :  { %v11197_v14 = vpop.f32.mrb[189].mxu1 }
 0x6fa   :  { %v7609_v24 = vpop.f32.mrb[188].mxu0  ;;  %v11199_v32 = vpop.f32.mrb[190].mxu1 }
 0x6fb   :  { %v7610_v34 = vpop.f32.mrb[189].mxu0  ;;  %v11200_v4 = vpop.f32.mrb[191].mxu1 }
 0x6fc   :  { %v7611_v38 = vpop.f32.mrb[190].mxu0 }
 0x6fd   :  { %v7612_v40 = vpop.f32.mrb[191].mxu0  ;;  %8767 = vmatmul.mubr.bf16.gmra.mrb[208].mxu1 %v15745_v60 }
 0x6fe   :  { %8776 = vmatprep.mubr.bf16.mxu1 %v15717_v54 }
 0x702   :  { %v11224_v62 = vpop.f32.mrb[192].mxu0 }
 0x703   :  { %v11225_v51 = vpop.f32.mrb[193].mxu0 }
 0x704   :  { %v11226_v12 = vadd.f32 %v11225_v51, %v11224_v62  ;;  %v11227_v27 = vpop.f32.mrb[194].mxu0 }
 0x705   :  { %v11228_v19 = vpop.f32.mrb[195].mxu0  ;;  %8777 = vmatmul.mubr.bf16.gmra.mrb[224].mxu1 %v15717_v54 }
 0x706   :  { %v11229_v15 = vadd.f32 %v11228_v19, %v11227_v27  ;;  %8815 = vmatprep.mubr.bf16.mxu1 %v12633_v1  ;;  %v16006_v20 = vadd.f32 %v11226_v12, %v15938_v29 }
 0x708   :  { %v11418_v8 = vpop.f32.mrb[196].mxu1  ;;  %v16009_v21 = vadd.f32 %v11229_v15, %v15950_v0 }
 0x709   :  { %v7727_v60 = vpop.f32.mrb[197].mxu1 }
 0x70a   :  { %v11230_v5 = vpop.f32.mrb[196].mxu0  ;;  %v7728_v22 = vadd.f32 %v11192_v28, %v7727_v60  ;;  %v11419_v13 = vpop.f32.mrb[198].mxu1 }
 0x70b   :  { %v11231_v36 = vpop.f32.mrb[197].mxu0  ;;  %v7730_v44 = vpop.f32.mrb[199].mxu1 }
 0x70c   :  { %v11232_v41 = vadd.f32 %v11231_v36, %v11230_v5  ;;  %v11233_v52 = vpop.f32.mrb[198].mxu0  ;;  %v7731_v48 = vadd.f32 %v11195_v33, %v7730_v44 }
 0x70d   :  { %v11234_v54 = vpop.f32.mrb[199].mxu0  ;;  %10727 = vmatmul.mubr.msk.bf16.vlgmr.msra.gmra.mrb[200].mxu1 %vm23_vm0, %v15768_v6 }
 0x70e   :  { %v11235_v18 = vadd.f32 %v11234_v54, %v11233_v52  ;;  %8825 = vmatprep.mubr.bf16.mxu1 %v12633_v1  ;;  %v11540_v29 = vadd.f32 %v11232_v41, %v15962_v37 }
 0x710   :  { %v16015_v0 = vadd.f32 %v11235_v18, %v11189_v17 }
 0x712   :  { %v11236_v57 = vpop.f32.mrb[200].mxu0 }
 0x713   :  { %v11237_v2 = vpop.f32.mrb[201].mxu0 }
 0x714   :  { %v11238_v53 = vadd.f32 %v11237_v2, %v11236_v57  ;;  %v11239_v16 = vpop.f32.mrb[202].mxu0 }
 0x715   :  { %v11240_v47 = vpop.f32.mrb[203].mxu0  ;;  %10728 = vmatmul.mubr.msk.bf16.gmra.mrb[204].mxu1 %vm23_vm0, %v15787_v46 }
 0x716   :  { %v11241_v28 = vadd.f32 %v11240_v47, %v11239_v16  ;;  %8835 = vmatprep.mubr.bf16.mxu1 %v12633_v1  ;;  %v16020_v61 = vadd.f32 %v11238_v53, %v7728_v22 }
 0x718   :  { %v16022_v6 = vadd.f32 %v11241_v28, %v7731_v48 }
 0x71a   :  { %v11242_v55 = vpop.f32.mrb[204].mxu0 }
 0x71b   :  { %v11243_v31 = vpop.f32.mrb[205].mxu0 }
 0x71c   :  { %v11245_v37 = vpop.f32.mrb[206].mxu0 }
 0x71d   :  { %v11246_v17 = vpop.f32.mrb[207].mxu0  ;;  %10729 = vmatmul.mubr.msk.bf16.gmra.mrb[208].mxu1 %vm23_vm0, %v15797_v11  ;;  %v16032_v37 = vld [vmem:[%s16169_s3 + $0x9] sm:$0x7] }
 0x71e   :  { %8845 = vmatprep.mubr.bf16.mxu1 %v12633_v1 }
 0x722   :  { %v11270_v26 = vpop.f32.mrb[208].mxu0 }
 0x723   :  { %v11271_v33 = vpop.f32.mrb[209].mxu0 }
 0x724   :  { %v11272_v25 = vadd.f32 %v11271_v33, %v11270_v26  ;;  %v11273_v46 = vpop.f32.mrb[210].mxu0  ;;  %v9037_v33 = vld [vmem:[%s16171_s1 + $0x28] sm:$0xff] }
 0x725   :  { %v11274_v10 = vpop.f32.mrb[211].mxu0  ;;  %10730 = vmatmul.mubr.msk.bf16.gmra.mrb[228].mxu1 %vm23_vm0, %v15780_v45 }
 0x726   :  { %v11275_v14 = vadd.f32 %v11274_v10, %v11273_v46  ;;  %v9034_v10 = vld [vmem:[%s16171_s1 + $0x10] sm:$0xff] }
 0x72a   :  { %v11276_v24 = vpop.f32.mrb[212].mxu0 }
 0x72b   :  { %v11277_v32 = vpop.f32.mrb[213].mxu0 }
 0x72c   :  { %v11278_v34 = vadd.f32 %v11277_v32, %v11276_v24  ;;  %v11279_v4 = vpop.f32.mrb[214].mxu0 }
 0x72d   :  { %v11280_v38 = vpop.f32.mrb[215].mxu0 }
 0x72e   :  { %v11281_v40 = vadd.f32 %v11280_v38, %v11279_v4  ;;  %v9010_v4 = vrot.slane %v16032_v37, %v13565_v23  ;;  %v10741_v23 = vld [vmem:[%s16171_s1 + $0x58] sm:$0xff] }
 0x732   :  { %v11282_v62 = vpop.f32.mrb[216].mxu0 }
 0x733   :  { %v11283_v51 = vpop.f32.mrb[217].mxu0 }
 0x734   :  { %v11284_v11 = vadd.f32 %v11283_v51, %v11282_v62  ;;  %v11285_v12 = vpop.f32.mrb[218].mxu0 }
 0x735   :  { %v11286_v1 = vpop.f32.mrb[219].mxu0 }
 0x736   :  { %v11287_v27 = vadd.f32 %v11286_v1, %v11285_v12  ;;  %v9052_v12 = vrot.slane %v9037_v33, 1  ;;  %v9047_v1 = vrot.slane %v9034_v10, 1 }
 0x73a   :  { %v11288_v19 = vpop.f32.mrb[220].mxu0 }
 0x73b   :  { %v11289_v15 = vpop.f32.mrb[221].mxu0 }
 0x73c   :  { %v11291_v8 = vpop.f32.mrb[222].mxu0 }
 0x73d   :  { %v11292_v60 = vpop.f32.mrb[223].mxu0 }
 0x742   :  { %v11438_v5 = vpop.f32.mrb[224].mxu0 }
 0x743   :  { %v8949_v22 = vpop.f32.mrb[225].mxu0 }
 0x744   :  { %v11439_v45 = vpop.f32.mrb[226].mxu0 }
 0x745   :  { %v8952_v13 = vpop.f32.mrb[227].mxu0 }
 0x74a   :  { %v11442_v36 = vpop.f32.mrb[228].mxu0 }
 0x74b   :  { %v8965_v44 = vpop.f32.mrb[229].mxu0 }
 0x74c   :  { %v8966_v41 = vadd.f32 %v11284_v11, %v8965_v44  ;;  %v11443_v52 = vpop.f32.mrb[230].mxu0 }
 0x74d   :  { %v8968_v48 = vpop.f32.mrb[231].mxu0  ;;  %v9128_v52 = vrot.slane %v10741_v23, 1 }
 0x74e   :  { %v8969_v54 = vadd.f32 %v11287_v27, %v8968_v48 }
 0x758   :  { %v8100_v18 = vpop.f32.mrb[212].mxu1 }
 0x759   :  { %v8101_v57 = vpop.f32.mrb[213].mxu1 }
 0x75a   :  { %v8102_v2 = vpop.f32.mrb[214].mxu1 }
 0x75b   :  { %v8103_v53 = vpop.f32.mrb[215].mxu1 }
 0x778   :  { %v8169_v16 = vpop.f32.mrb[216].mxu1 }
 0x779   :  { %v8170_v47 = vpop.f32.mrb[217].mxu1 }
 0x77a   :  { %v8171_v28 = vpop.f32.mrb[218].mxu1 }
 0x77b   :  { %v8172_v55 = vpop.f32.mrb[219].mxu1 }
 0x780   :  { %v11426_v31 = vpop.f32.mrb[192].mxu1 }
 0x781   :  { %v11541_v17 = vadd.f32 %v11540_v29, %v11426_v31  ;;  %v8271_v26 = vpop.f32.mrb[193].mxu1 }
 0x782   :  { %v11545_v46 = vadd.f32 %v16006_v20, %v8271_v26  ;;  %v11427_v24 = vpop.f32.mrb[194].mxu1  ;;  %v10738_v20 = vld [vmem:[%s16171_s1 + $0x40] sm:$0xff] }
 0x783   :  { %v11542_v32 = vadd.f32 %v11541_v17, %v11278_v34  ;;  %v11549_v38 = vadd.f32 %v16015_v0, %v11427_v24  ;;  %v8274_v62 = vpop.f32.mrb[195].mxu1 }
 0x784   :  { %v11546_v29 = vadd.f32 %v11545_v46, %v11272_v25  ;;  %v11553_v51 = vadd.f32 %v16009_v21, %v8274_v62  ;;  %v9123_v25 = vrot.slane %v10738_v20, 1 }
 0x785   :  { %v11543_v11 = vadd.f32 %v11542_v32, %v11438_v5  ;;  %v11550_v27 = vadd.f32 %v11549_v38, %v11281_v40  ;;  %v9053_v40 = vsel %vm1545_vm2, %v9047_v1, %v9052_v12 }
 0x786   :  { %v11547_v19 = vadd.f32 %v11546_v29, %v8949_v22  ;;  %v11554_v15 = vadd.f32 %v11553_v51, %v11275_v14  ;;  %v9032_v51 = vld [vmem:[%s16171_s1] sm:$0xff] }
 0x787   :  { %v9022_v34 = vadd.f32 %v11543_v11, %v9010_v4  ;;  %v11551_v0 = vadd.f32 %v11550_v27, %v11439_v45  ;;  %v9035_v11 = vld [vmem:[%s16171_s1 + $0x18] sm:$0xff]  ;;  %v16089_v27 = vrot.slane %v16032_v37, %v13618_v59 }
 0x788   :  { %v9016_v8 = vadd.f32 %v11547_v19, %v9010_v4  ;;  %v11555_v60 = vadd.f32 %v11554_v15, %v8952_v13  ;;  %v11430_v21 = vpop.f32.mrb[220].mxu1  ;;  %v9129_v13 = vsel %vm1545_vm2, %v9123_v25, %v9128_v52  ;;  %v9045_v19 = vrot.slane %v9032_v51, 1 }
 0x789   :  { %v9071_v5 = vadd.f32 %v9052_v12, %v9022_v34  ;;  %v9025_v36 = vadd.f32 %v11551_v0, %v9010_v4  ;;  %v8287_v44 = vpop.f32.mrb[221].mxu1  ;;  %v9033_v12 = vld [vmem:[%s16171_s1 + $0x8] sm:$0xff]  ;;  %v16093_v15 = vrot.slane %v16032_v37, %v13625_v42  ;;  %v9048_v23 = vrot.slane %v9035_v11, 1 }
 0x78a   :  { %v9065_v48 = vadd.f32 %v9047_v1, %v9016_v8  ;;  %v9019_v18 = vadd.f32 %v11555_v60, %v9010_v4  ;;  %v8288_v14 = vadd.f32 %v8287_v44, %v16020_v61  ;;  %v11431_v22 = vpop.f32.mrb[222].mxu1  ;;  %v9036_v1 = vld [vmem:[%s16171_s1 + $0x20] sm:$0xff]  ;;  %v9046_v8 = vrot.slane %v9033_v12, 1 }
 0x78b   :  { %v8290_v57 = vpop.f32.mrb[223].mxu1  ;;  %v9094_v16 = vrot.slane %v9071_v5, 7  ;;  %v9141_v47 = vadd.f32 %v9123_v25, %v9025_v36  ;;  %v9050_v25 = vrot.slane %v9036_v1, 1  ;;  %v9049_v44 = vsel %vm1545_vm2, %v9045_v19, %v9048_v23 }
 0x78c   :  { %v9068_v2 = vadd.f32 %v9053_v40, %v9019_v18  ;;  %v8992_v53 = vadd.f32 %v8966_v41, %v8288_v14  ;;  %v8291_v45 = vadd.f32 %v8290_v57, %v16022_v6  ;;  %v9087_v28 = vrot.slane %v9065_v48, 7 }
 0x78d   :  { %v9163_v6 = vrot.slane %v9141_v47, 7 }
 0x78e   :  { %v9088_v55 = vrot.slane %v9068_v2, 7  ;;  %v9028_v31 = vadd.f32 %v9010_v4, %v8992_v53  ;;  %v8995_v17 = vadd.f32 %v8969_v54, %v8291_v45 }
 0x790   :  { %v9089_v26 = vsel %vm2272_vm6, %v9087_v28, %v9088_v55  ;;  %v9095_v33 = vsel %vm2272_vm6, %v9088_v55, %v9094_v16  ;;  %v9144_v46 = vadd.f32 %v9129_v13, %v9028_v31  ;;  %v9031_v61 = vadd.f32 %v9010_v4, %v8995_v17  ;;  %v10739_v17 = vld [vmem:[%s16171_s1 + $0x48] sm:$0xff] }
 0x791   :  { %9104 = vst.msk [vmem:[%s16172_s5 + $0x10] sm:$0xff] %vm23_vm0, %v9089_v26  ;;  %9107 = vst.msk [vmem:[%s16172_s5 + $0x28] sm:$0xff] %vm23_vm0, %v9095_v33  ;;  %v10736_v26 = vld [vmem:[%s16171_s1 + $0x30] sm:$0xff] }
 0x792   :  { %v9164_v41 = vrot.slane %v9144_v46, 7  ;;  %v9147_v10 = vadd.f32 %v9128_v52, %v9031_v61  ;;  %v9051_v52 = vsel %vm1545_vm2, %v9046_v8, %v9050_v25  ;;  %v10737_v61 = vld [vmem:[%s16171_s1 + $0x38] sm:$0xff] }
 0x794   :  { %v9165_v54 = vsel %vm2272_vm6, %v9163_v6, %v9164_v41  ;;  %v9170_v24 = vrot.slane %v9147_v10, 7 }
 0x795   :  { %10744 = vst.msk [vmem:[%s16172_s5 + $0x40] sm:$0xff] %vm23_vm0, %v9165_v54 }
 0x796   :  { %v9171_v32 = vsel %vm2272_vm6, %v9164_v41, %v9170_v24  ;;  %v9124_v41 = vrot.slane %v10739_v17, 1  ;;  %v9121_v24 = vrot.slane %v10736_v26, 1 }
 0x797   :  { %10747 = vst.msk [vmem:[%s16172_s5 + $0x58] sm:$0xff] %vm23_vm0, %v9171_v32 }
 0x798   :  { %v9125_v1 = vsel %vm1545_vm2, %v9121_v24, %v9124_v41 }
 0x7d8   :  { %v8778_v4 = vpop.f32.mrb[224].mxu1 }
 0x7d9   :  { %v8779_v38 = vpop.f32.mrb[225].mxu1 }
 0x7da   :  { %v8780_v62 = vpop.f32.mrb[226].mxu1  ;;  %v9122_v38 = vrot.slane %v10737_v61, 1 }
 0x7db   :  { %v8781_v29 = vpop.f32.mrb[227].mxu1 }
 0x7e0   :  { %v8817_v20 = vpop.f32.mrb[200].mxu1 }
 0x7e1   :  { %v11517_v34 = vadd.f32 %v8817_v20, %v15943_v58  ;;  %v8819_v0 = vpop.f32.mrb[201].mxu1 }
 0x7e2   :  { %v11519_v60 = vadd.f32 %v8819_v0, %v15948_v7  ;;  %v8821_v21 = vpop.f32.mrb[202].mxu1 }
 0x7e3   :  { %v9014_v5 = vadd.f32 %v11517_v34, %v16089_v27  ;;  %v11521_v59 = vadd.f32 %v8821_v21, %v15952_v35  ;;  %v8823_v36 = vpop.f32.mrb[203].mxu1 }
 0x7e4   :  { %v9015_v40 = vadd.f32 %v11519_v60, %v16093_v15  ;;  %v11523_v42 = vadd.f32 %v8823_v36, %v15954_v63 }
 0x7e5   :  { %v9063_v37 = vadd.f32 %v9045_v19, %v9014_v5  ;;  %v9017_v58 = vadd.f32 %v11521_v59, %v16089_v27 }
 0x7e6   :  { %v9064_v48 = vadd.f32 %v9046_v8, %v9015_v40  ;;  %v9018_v7 = vadd.f32 %v11523_v42, %v16093_v15 }
 0x7e7   :  { %v9066_v18 = vadd.f32 %v9049_v44, %v9017_v58  ;;  %v9081_v57 = vrot.slane %v9063_v37, 7 }
 0x7e8   :  { %v9067_v14 = vadd.f32 %v9051_v52, %v9018_v7  ;;  %v8827_v22 = vpop.f32.mrb[204].mxu1  ;;  %v9084_v45 = vrot.slane %v9064_v48, 7 }
 0x7e9   :  { %v9082_v35 = vrot.slane %v9066_v18, 7  ;;  %v11525_v2 = vadd.f32 %v8827_v22, %v15968_v39  ;;  %v8829_v53 = vpop.f32.mrb[205].mxu1 }
 0x7ea   :  { %v9085_v16 = vrot.slane %v9067_v14, 7  ;;  %v11527_v63 = vadd.f32 %v8829_v53, %v15974_v56  ;;  %v8831_v47 = vpop.f32.mrb[206].mxu1 }
 0x7eb   :  { %v9083_v13 = vsel %vm2272_vm6, %v9081_v57, %v9082_v35  ;;  %v9020_v28 = vadd.f32 %v11525_v2, %v16089_v27  ;;  %v11529_v55 = vadd.f32 %v8831_v47, %v15977_v30  ;;  %v8833_v31 = vpop.f32.mrb[207].mxu1  ;;  %v10740_v30 = vld [vmem:[%s16171_s1 + $0x50] sm:$0xff] }
 0x7ec   :  { %9102 = vst [vmem:[%s16172_s5] sm:$0xff] %v9083_v13  ;;  %v9086_v39 = vsel %vm2272_vm6, %v9084_v45, %v9085_v16  ;;  %v9021_v56 = vadd.f32 %v11527_v63, %v16093_v15  ;;  %v11531_v33 = vadd.f32 %v8833_v31, %v15981_v9  ;;  %v9126_v9 = vrot.slane %v10740_v30, 1 }
 0x7ed   :  { %9103 = vst [vmem:[%s16172_s5 + $0x8] sm:$0xff] %v9086_v39  ;;  %v9069_v46 = vadd.f32 %v9048_v23, %v9020_v28  ;;  %v9023_v54 = vadd.f32 %v11529_v55, %v16089_v27 }
 0x7ee   :  { %v9070_v6 = vadd.f32 %v9050_v25, %v9021_v56  ;;  %v9024_v4 = vadd.f32 %v11531_v33, %v16093_v15 }
 0x7ef   :  { %v9090_v10 = vrot.slane %v9069_v46, 7  ;;  %v9139_v23 = vadd.f32 %v9121_v24, %v9023_v54 }
 0x7f0   :  { %v9092_v32 = vrot.slane %v9070_v6, 7  ;;  %v8837_v62 = vpop.f32.mrb[208].mxu1  ;;  %v9140_v25 = vadd.f32 %v9122_v38, %v9024_v4 }
 0x7f1   :  { %v9091_v29 = vsel %vm2272_vm6, %v9082_v35, %v9090_v10  ;;  %v11533_v51 = vadd.f32 %v8837_v62, %v15988_v49  ;;  %v8839_v11 = vpop.f32.mrb[209].mxu1  ;;  %v9127_v49 = vsel %vm1545_vm2, %v9122_v38, %v9126_v9  ;;  %v9157_v40 = vrot.slane %v9139_v23, 7 }
 0x7f2   :  { %9105 = vst [vmem:[%s16172_s5 + $0x18] sm:$0xff] %v9091_v29  ;;  %v9093_v12 = vsel %vm2272_vm6, %v9085_v16, %v9092_v32  ;;  %v11535_v20 = vadd.f32 %v8839_v11, %v15991_v50  ;;  %v8841_v19 = vpop.f32.mrb[210].mxu1  ;;  %v9160_v37 = vrot.slane %v9140_v25, 7 }
 0x7f3   :  { %9106 = vst [vmem:[%s16172_s5 + $0x20] sm:$0xff] %v9093_v12  ;;  %v9026_v34 = vadd.f32 %v11533_v51, %v16089_v27  ;;  %v11537_v0 = vadd.f32 %v8841_v19, %v15994_v3  ;;  %v8843_v8 = vpop.f32.mrb[211].mxu1 }
 0x7f4   :  { %v9027_v60 = vadd.f32 %v11535_v20, %v16093_v15  ;;  %v11539_v21 = vadd.f32 %v8843_v8, %v15998_v43 }
 0x7f5   :  { %v9142_v5 = vadd.f32 %v9125_v1, %v9026_v34  ;;  %v9029_v50 = vadd.f32 %v11537_v0, %v16089_v27 }
 0x7f6   :  { %v9143_v59 = vadd.f32 %v9127_v49, %v9027_v60  ;;  %v9030_v36 = vadd.f32 %v11539_v21, %v16093_v15 }
 0x7f7   :  { %v9158_v44 = vrot.slane %v9142_v5, 7  ;;  %v9145_v42 = vadd.f32 %v9124_v41, %v9029_v50 }
 0x7f8   :  { %v9161_v58 = vrot.slane %v9143_v59, 7  ;;  %v9146_v52 = vadd.f32 %v9126_v9, %v9030_v36  ;;  %v8847_v48 = vpop.f32.mrb[228].mxu1 }
 0x7f9   :  { %v9159_v3 = vsel %vm2272_vm6, %v9157_v40, %v9158_v44  ;;  %v9166_v7 = vrot.slane %v9145_v42, 7  ;;  %v8848_v18 = vpop.f32.mrb[229].mxu1 }
 0x7fa   :  { %10742 = vst [vmem:[%s16172_s5 + $0x30] sm:$0xff] %v9159_v3  ;;  %v9162_v43 = vsel %vm2272_vm6, %v9160_v37, %v9161_v58  ;;  %v9168_v27 = vrot.slane %v9146_v52, 7  ;;  %v8849_v14 = vpop.f32.mrb[230].mxu1 }
 0x7fb   :  { %10743 = vst [vmem:[%s16172_s5 + $0x38] sm:$0xff] %v9162_v43  ;;  %v9167_v15 = vsel %vm2272_vm6, %v9158_v44, %v9166_v7  ;;  %v8850_v22 = vpop.f32.mrb[231].mxu1 }
 0x7fc   :  { %10745 = vst [vmem:[%s16172_s5 + $0x48] sm:$0xff] %v9167_v15  ;;  %v9169_v57 = vsel %vm2272_vm6, %v9161_v58, %v9168_v27 }
 0x7fd   :  { %10746 = vst [vmem:[%s16172_s5 + $0x50] sm:$0xff] %v9169_v57 }

</bundles_post_ra>
